<compile_context>
chip_gen: v6e
topology: v6e:2x2x1
jax: 0.10.0
libtpu: 0.0.40
codegen_flags: <defaults>
</compile_context>

<pallas_src>
import functools
import math

import jax
import jax.numpy as jnp
from jax.experimental import pallas as pl
from jax.experimental.pallas import tpu as pltpu


# ----------------------------------------------------------------------------
# In-kernel helpers
# ----------------------------------------------------------------------------

def _ln(x, g, b):
    # x: (R, C) f32; g/b: (1, C)
    mu = jnp.mean(x, axis=-1, keepdims=True)
    xc = x - mu
    var = jnp.mean(xc * xc, axis=-1, keepdims=True)
    inv = jax.lax.rsqrt(var + 1e-5)
    return xc * inv * g + b


def _gelu_exact(x):
    # exact (erf-based) GELU, matching torch.nn.GELU default
    return 0.5 * x * (1.0 + jax.lax.erf(x * (1.0 / math.sqrt(2.0))))


def _mha(xq, xkv, wq_ref, wk_ref, wv_ref, wo_ref, bo_ref, num_heads, scale):
    # xq: (N, W) f32, xkv: (M, W) f32
    # wq/wk/wv refs: (H, W, D); wo ref: (H, D, W); bo ref: (1, W)
    out = None
    for h in range(num_heads):
        q = jnp.dot(xq, wq_ref[h], preferred_element_type=jnp.float32)    # (N, D)
        k = jnp.dot(xkv, wk_ref[h], preferred_element_type=jnp.float32)   # (M, D)
        v = jnp.dot(xkv, wv_ref[h], preferred_element_type=jnp.float32)   # (M, D)
        s = jnp.einsum('nd,md->nm', q, k,
                       preferred_element_type=jnp.float32) * scale        # (N, M)
        s = s - jnp.max(s, axis=-1, keepdims=True)
        p = jnp.exp(s)
        p = p * pl.reciprocal(jnp.sum(p, axis=-1, keepdims=True), approx=True)
        o = jnp.dot(p, v, preferred_element_type=jnp.float32)             # (N, D)
        proj = jnp.dot(o, wo_ref[h], preferred_element_type=jnp.float32)  # (N, W)
        out = proj if out is None else out + proj
    return out + bo_ref[...]


# ----------------------------------------------------------------------------
# Fused decoder-layer kernel (one pallas_call per layer, grid over batch)
# ----------------------------------------------------------------------------

def _decoder_layer_kernel(
        x_ref, mem_ref,
        ln1_g, ln1_b, ln2_g, ln2_b, ln3_g, ln3_b,
        ca_wq, ca_wk, ca_wv, ca_wo, ca_bo,
        sa_wq, sa_wk, sa_wv, sa_wo, sa_bo,
        w1_ref, b1_ref, w2_ref, b2_ref,
        o_ref, *, num_heads, scale):
    x = x_ref[...].astype(jnp.float32)        # (N, W)
    mem = mem_ref[...].astype(jnp.float32)    # (M, W)

    # cross-attention + residual
    qn = _ln(x, ln1_g[...], ln1_b[...])
    x = x + _mha(qn, mem, ca_wq, ca_wk, ca_wv, ca_wo, ca_bo, num_heads, scale)

    # self-attention + residual
    qn = _ln(x, ln2_g[...], ln2_b[...])
    x = x + _mha(qn, qn, sa_wq, sa_wk, sa_wv, sa_wo, sa_bo, num_heads, scale)

    # MLP + residual
    h = _ln(x, ln3_g[...], ln3_b[...])
    h = jnp.dot(h, w1_ref[...], preferred_element_type=jnp.float32) + b1_ref[...]
    h = _gelu_exact(h)
    h = jnp.dot(h, w2_ref[...], preferred_element_type=jnp.float32) + b2_ref[...]
    x = x + h

    o_ref[...] = x.astype(o_ref.dtype)


def decoder_layer(lp, x, mem, num_heads):
    B, N, W = x.shape
    _, M, _ = mem.shape
    D = W // num_heads
    scale = D ** (-0.5)
    kernel = functools.partial(_decoder_layer_kernel, num_heads=num_heads, scale=scale)

    def full2(shape):
        return pl.BlockSpec(shape, lambda b: (0, 0))

    def full3(shape):
        return pl.BlockSpec(shape, lambda b: (0, 0, 0))

    in_specs = [
        pl.BlockSpec((None, N, W), lambda b: (b, 0, 0)),    # x  -> kernel sees (N, W)
        pl.BlockSpec((None, M, W), lambda b: (b, 0, 0)),    # mem -> kernel sees (M, W)
        full2((1, W)), full2((1, W)),                       # ln1
        full2((1, W)), full2((1, W)),                       # ln2
        full2((1, W)), full2((1, W)),                       # ln3
        full3((num_heads, W, D)), full3((num_heads, W, D)), full3((num_heads, W, D)),
        full3((num_heads, D, W)), full2((1, W)),            # cross wo, bo
        full3((num_heads, W, D)), full3((num_heads, W, D)), full3((num_heads, W, D)),
        full3((num_heads, D, W)), full2((1, W)),            # self wo, bo
        full2((W, 4 * W)), full2((1, 4 * W)),
        full2((4 * W, W)), full2((1, W)),
    ]
    out_spec = pl.BlockSpec((None, N, W), lambda b: (b, 0, 0))

    return pl.pallas_call(
        kernel,
        out_shape=jax.ShapeDtypeStruct((B, N, W), x.dtype),
        grid=(B,),
        in_specs=in_specs,
        out_specs=out_spec,
        compiler_params=pltpu.CompilerParams(dimension_semantics=("parallel",)),
    )(x, mem,
      lp['ln1_g'], lp['ln1_b'], lp['ln2_g'], lp['ln2_b'], lp['ln3_g'], lp['ln3_b'],
      lp['cross']['wq'], lp['cross']['wk'], lp['cross']['wv'],
      lp['cross']['wo'], lp['cross']['bo'],
      lp['self']['wq'], lp['self']['wk'], lp['self']['wv'],
      lp['self']['wo'], lp['self']['bo'],
      lp['mlp_w1'], lp['mlp_b1'], lp['mlp_w2'], lp['mlp_b2'])


# ----------------------------------------------------------------------------
# Fused projection kernels (LN -> Linear [-> LN]) with row-tiled parallel grid
# ----------------------------------------------------------------------------

def _ln_linear_kernel(x_ref, g_ref, b_ref, w_ref, bias_ref, o_ref):
    x = x_ref[...].astype(jnp.float32)
    y = _ln(x, g_ref[...], b_ref[...])
    y = jnp.dot(y, w_ref[...], preferred_element_type=jnp.float32) + bias_ref[...]
    o_ref[...] = y.astype(o_ref.dtype)


def _ln_linear_ln_kernel(x_ref, g0_ref, b0_ref, w_ref, bias_ref, g1_ref, b1_ref, o_ref):
    x = x_ref[...].astype(jnp.float32)
    y = _ln(x, g0_ref[...], b0_ref[...])
    y = jnp.dot(y, w_ref[...], preferred_element_type=jnp.float32) + bias_ref[...]
    y = _ln(y, g1_ref[...], b1_ref[...])
    o_ref[...] = y.astype(o_ref.dtype)


def _row_tile(R):
    # Whole-slab block at small sizes; tile rows (multiple of 8) when large so the
    # grid can pipeline and shard across TensorCores on v7x.
    if R <= 512:
        return R
    for tm in (512, 256, 128, 64, 32, 16, 8):
        if R % tm == 0:
            return tm
    return R


def ln_linear(x, g, b, w, bias):
    R, Cin = x.shape
    Cout = w.shape[1]
    tm = _row_tile(R)
    return pl.pallas_call(
        _ln_linear_kernel,
        out_shape=jax.ShapeDtypeStruct((R, Cout), x.dtype),
        grid=(R // tm,),
        in_specs=[pl.BlockSpec((tm, Cin), lambda i: (i, 0)),
                  pl.BlockSpec((1, Cin), lambda i: (0, 0)),
                  pl.BlockSpec((1, Cin), lambda i: (0, 0)),
                  pl.BlockSpec((Cin, Cout), lambda i: (0, 0)),
                  pl.BlockSpec((1, Cout), lambda i: (0, 0))],
        out_specs=pl.BlockSpec((tm, Cout), lambda i: (i, 0)),
        compiler_params=pltpu.CompilerParams(dimension_semantics=("parallel",)),
    )(x, g, b, w, bias)


def ln_linear_ln(x, g0, b0, w, bias, g1, b1):
    R, Cin = x.shape
    Cout = w.shape[1]
    tm = _row_tile(R)
    return pl.pallas_call(
        _ln_linear_ln_kernel,
        out_shape=jax.ShapeDtypeStruct((R, Cout), x.dtype),
        grid=(R // tm,),
        in_specs=[pl.BlockSpec((tm, Cin), lambda i: (i, 0)),
                  pl.BlockSpec((1, Cin), lambda i: (0, 0)),
                  pl.BlockSpec((1, Cin), lambda i: (0, 0)),
                  pl.BlockSpec((Cin, Cout), lambda i: (0, 0)),
                  pl.BlockSpec((1, Cout), lambda i: (0, 0)),
                  pl.BlockSpec((1, Cout), lambda i: (0, 0)),
                  pl.BlockSpec((1, Cout), lambda i: (0, 0))],
        out_specs=pl.BlockSpec((tm, Cout), lambda i: (i, 0)),
        compiler_params=pltpu.CompilerParams(dimension_semantics=("parallel",)),
    )(x, g0, b0, w, bias, g1, b1)


# ----------------------------------------------------------------------------
# Model glue (10 pallas_calls total for the default 4-layer config)
# ----------------------------------------------------------------------------

def xtransformer_decoder(params, query, kv, num_heads, num_layers):
    B, Nk, Cv = kv.shape
    _, Nq, _ = query.shape
    W = params['mem_w'].shape[1]

    # memory_proj: LN -> Linear -> LN (one fused kernel)
    mem = ln_linear_ln(kv.reshape(B * Nk, Cv),
                       params['mem_ln0_g'], params['mem_ln0_b'],
                       params['mem_w'], params['mem_b'],
                       params['mem_ln1_g'], params['mem_ln1_b']).reshape(B, Nk, W)

    # node_proj: LN -> Linear (one fused kernel)
    q = ln_linear(query.reshape(B * Nq, Cv),
                  params['node_ln_g'], params['node_ln_b'],
                  params['node_w'], params['node_b']).reshape(B, Nq, W)

    def out_proj(z):
        Bz, Nz, _ = z.shape
        zf = ln_linear(z.reshape(Bz * Nz, W),
                       params['out_ln_g'], params['out_ln_b'],
                       params['out_w'], params['out_b'])
        return zf.reshape(Bz, Nz, Cv)

    # Inter-layer pooling / repeat_interleave is left as (tiny) XLA reshape ops;
    # at these sizes it is free index arithmetic compared with the fused layer kernels.
    node = []
    for idx in range(num_layers):
        lp = params['layers'][idx]
        if idx == 0:
            q = decoder_layer(lp, q, mem, num_heads)
        else:
            term = 2 ** (idx - 1)
            Ncur = q.shape[1]
            # sum_i q[:, i::term] / term  ==  mean over the interleave axis
            q_tmp = q.reshape(B, Ncur // term, term, W).mean(axis=2)
            node.append(out_proj(q_tmp))
            q = jnp.repeat(q_tmp, term, axis=1)          # torch.repeat_interleave
            q = decoder_layer(lp, q, mem, num_heads)
    term = 2 ** (num_layers - 1)
    Ncur = q.shape[1]
    q_tmp = q.reshape(B, Ncur // term, term, W).mean(axis=2)
    node.append(out_proj(q_tmp))
    return jnp.concatenate(node, axis=1)


# ----------------------------------------------------------------------------
# Deterministic parameter initialization (trunc_normal(0.02) weights, 0 biases,
# LayerNorm gamma=1 / beta=0), mirroring XTransformerDecoder._init_weights.
# Attention q/k/v/out projection weights are stored as per-head stacks so the
# fused kernel indexes heads on the leading dim (no lane slicing in-kernel).
# ----------------------------------------------------------------------------

def init_params(key, visual_dim, width, num_heads, num_layers):
    D = width // num_heads
    keys = iter(jax.random.split(key, 16 + num_layers * 16))

    def tn(shape):
        return 0.02 * jax.random.truncated_normal(next(keys), -2.0, 2.0, shape, jnp.float32)

    def lin(cin, cout):
        return tn((cin, cout)), jnp.zeros((1, cout), jnp.float32)

    def ln(c):
        return jnp.ones((1, c), jnp.float32), jnp.zeros((1, c), jnp.float32)

    p = {}
    p['mem_ln0_g'], p['mem_ln0_b'] = ln(visual_dim)
    p['mem_w'], p['mem_b'] = lin(visual_dim, width)
    p['mem_ln1_g'], p['mem_ln1_b'] = ln(width)
    p['node_ln_g'], p['node_ln_b'] = ln(visual_dim)
    p['node_w'], p['node_b'] = lin(visual_dim, width)
    p['out_ln_g'], p['out_ln_b'] = ln(width)
    p['out_w'], p['out_b'] = lin(width, visual_dim)

    layers = []
    for _ in range(num_layers):
        lp = {}
        lp['ln1_g'], lp['ln1_b'] = ln(width)
        lp['ln2_g'], lp['ln2_b'] = ln(width)
        lp['ln3_g'], lp['ln3_b'] = ln(width)
        for name in ('cross', 'self'):
            a = {}
            # per-head (H, W, D): column-split of the full (W, W) input-projection
            a['wq'] = tn((width, width)).reshape(width, num_heads, D).transpose(1, 0, 2)
            a['wk'] = tn((width, width)).reshape(width, num_heads, D).transpose(1, 0, 2)
            a['wv'] = tn((width, width)).reshape(width, num_heads, D).transpose(1, 0, 2)
            # qkv_bias=False -> q/k/v biases are structurally zero and are omitted.
            # per-head (H, D, W): row-split of the full (W, W) output projection
            a['wo'] = tn((width, width)).reshape(num_heads, D, width)
            a['bo'] = jnp.zeros((1, width), jnp.float32)
            lp[name] = a
        lp['mlp_w1'], lp['mlp_b1'] = lin(width, width * 4)
        lp['mlp_w2'], lp['mlp_b2'] = lin(width * 4, width)
        layers.append(lp)
    p['layers'] = layers
    return p


# ----------------------------------------------------------------------------

if __name__ == "__main__":
    visual_dim = 48
    width = 32
    heads = 4
    n_layers = 4
    B, Nq, Nkv = 2, 16, 8   # Nq must be divisible by 2**(n_layers-1)

    key = jax.random.PRNGKey(0)
    kq, kk, kp = jax.random.split(key, 3)
    query = jax.random.normal(kq, (B, Nq, visual_dim), jnp.float32)
    kv = jax.random.normal(kk, (B, Nkv, visual_dim), jnp.float32)
    params = init_params(kp, visual_dim, width, heads, n_layers)

    fwd = jax.jit(lambda p, q, m: xtransformer_decoder(p, q, m, heads, n_layers))
    out = jax.block_until_ready(fwd(params, query, kv))

    expected_seq = Nq + Nq // 2 + Nq // 4 + Nq // 8
    assert out.shape == (B, expected_seq, visual_dim), out.shape
    assert bool(jnp.all(jnp.isfinite(out)))
    print("KERNEL_OK")
</pallas_src>

<mosaic_0001>
module attributes {stable_mosaic.version = 11 : i64} {
  func.func @_ln_linear_ln_kernel(%arg0: i32, %arg1: memref<16x48xf32, #tpu.memory_space<vmem>>, %arg2: memref<1x48xf32, #tpu.memory_space<vmem>>, %arg3: memref<1x48xf32, #tpu.memory_space<vmem>>, %arg4: memref<48x32xf32, #tpu.memory_space<vmem>>, %arg5: memref<1x32xf32, #tpu.memory_space<vmem>>, %arg6: memref<1x32xf32, #tpu.memory_space<vmem>>, %arg7: memref<1x32xf32, #tpu.memory_space<vmem>>, %arg8: memref<16x32xf32, #tpu.memory_space<vmem>>) attributes {dimension_semantics = [#tpu.dimension_semantics<parallel>], iteration_bounds = array<i64: 1>, scalar_prefetch = 0 : i64, scratch_operands = 0 : i64, tpu.core_type = #tpu.core_type<tc>, window_params = [{transform_indices = @transform_0, window_bounds = array<i64: 16, 48>}, {pipeline_mode = #tpu.pipeline_mode<synchronous>, transform_indices = @transform_1, window_bounds = array<i64: 1, 48>}, {pipeline_mode = #tpu.pipeline_mode<synchronous>, transform_indices = @transform_2, window_bounds = array<i64: 1, 48>}, {pipeline_mode = #tpu.pipeline_mode<synchronous>, transform_indices = @transform_3, window_bounds = array<i64: 48, 32>}, {pipeline_mode = #tpu.pipeline_mode<synchronous>, transform_indices = @transform_4, window_bounds = array<i64: 1, 32>}, {pipeline_mode = #tpu.pipeline_mode<synchronous>, transform_indices = @transform_5, window_bounds = array<i64: 1, 32>}, {pipeline_mode = #tpu.pipeline_mode<synchronous>, transform_indices = @transform_6, window_bounds = array<i64: 1, 32>}, {transform_indices = @transform_7, window_bounds = array<i64: 16, 32>}]} {
    %c0 = arith.constant 0 : index
    %c0_0 = arith.constant 0 : index
    %0 = vector.load %arg1[%c0, %c0_0] : memref<16x48xf32, #tpu.memory_space<vmem>>, vector<16x48xf32>
    %c0_1 = arith.constant 0 : index
    %c0_2 = arith.constant 0 : index
    %1 = vector.load %arg2[%c0_1, %c0_2] : memref<1x48xf32, #tpu.memory_space<vmem>>, vector<1x48xf32>
    %c0_3 = arith.constant 0 : index
    %c0_4 = arith.constant 0 : index
    %2 = vector.load %arg3[%c0_3, %c0_4] : memref<1x48xf32, #tpu.memory_space<vmem>>, vector<1x48xf32>
    %cst = arith.constant dense<0.000000e+00> : vector<16xf32>
    %3 = vector.multi_reduction <add>, %0, %cst [1] : vector<16x48xf32> to vector<16xf32>
    %4 = vector.shape_cast %3 : vector<16xf32> to vector<16x1xf32>
    %cst_5 = arith.constant 4.800000e+01 : f32
    %5 = vector.broadcast %cst_5 : f32 to vector<16x1xf32>
    %6 = arith.divf %4, %5 : vector<16x1xf32>
    %7 = vector.broadcast %6 : vector<16x1xf32> to vector<16x48xf32>
    %8 = arith.subf %0, %7 : vector<16x48xf32>
    %9 = arith.mulf %8, %8 : vector<16x48xf32>
    %cst_6 = arith.constant dense<0.000000e+00> : vector<16xf32>
    %10 = vector.multi_reduction <add>, %9, %cst_6 [1] : vector<16x48xf32> to vector<16xf32>
    %11 = vector.shape_cast %10 : vector<16xf32> to vector<16x1xf32>
    %cst_7 = arith.constant 4.800000e+01 : f32
    %12 = vector.broadcast %cst_7 : f32 to vector<16x1xf32>
    %13 = arith.divf %11, %12 : vector<16x1xf32>
    %cst_8 = arith.constant 9.99999974E-6 : f32
    %14 = vector.broadcast %cst_8 : f32 to vector<16x1xf32>
    %15 = arith.addf %13, %14 : vector<16x1xf32>
    %16 = math.rsqrt %15 : vector<16x1xf32>
    %17 = vector.broadcast %16 : vector<16x1xf32> to vector<16x48xf32>
    %18 = arith.mulf %8, %17 : vector<16x48xf32>
    %19 = vector.broadcast %1 : vector<1x48xf32> to vector<16x48xf32>
    %20 = arith.mulf %18, %19 : vector<16x48xf32>
    %21 = vector.broadcast %2 : vector<1x48xf32> to vector<16x48xf32>
    %22 = arith.addf %20, %21 : vector<16x48xf32>
    %c0_9 = arith.constant 0 : index
    %c0_10 = arith.constant 0 : index
    %23 = vector.load %arg4[%c0_9, %c0_10] : memref<48x32xf32, #tpu.memory_space<vmem>>, vector<48x32xf32>
    %cst_11 = arith.constant dense<0.000000e+00> : vector<16x32xf32>
    %24 = tpu.matmul %22, %23, %cst_11 {dimension_numbers = #tpu.dot_dimension_numbers<[1], [0], [0], [1], [0, 0, 1, 1], [], []>} : vector<16x48xf32>, vector<48x32xf32>, vector<16x32xf32> -> vector<16x32xf32>
    %c0_12 = arith.constant 0 : index
    %c0_13 = arith.constant 0 : index
    %25 = vector.load %arg5[%c0_12, %c0_13] : memref<1x32xf32, #tpu.memory_space<vmem>>, vector<1x32xf32>
    %26 = vector.broadcast %25 : vector<1x32xf32> to vector<16x32xf32>
    %27 = arith.addf %24, %26 : vector<16x32xf32>
    %c0_14 = arith.constant 0 : index
    %c0_15 = arith.constant 0 : index
    %28 = vector.load %arg6[%c0_14, %c0_15] : memref<1x32xf32, #tpu.memory_space<vmem>>, vector<1x32xf32>
    %c0_16 = arith.constant 0 : index
    %c0_17 = arith.constant 0 : index
    %29 = vector.load %arg7[%c0_16, %c0_17] : memref<1x32xf32, #tpu.memory_space<vmem>>, vector<1x32xf32>
    %cst_18 = arith.constant dense<0.000000e+00> : vector<16xf32>
    %30 = vector.multi_reduction <add>, %27, %cst_18 [1] : vector<16x32xf32> to vector<16xf32>
    %31 = vector.shape_cast %30 : vector<16xf32> to vector<16x1xf32>
    %cst_19 = arith.constant 3.200000e+01 : f32
    %32 = vector.broadcast %cst_19 : f32 to vector<16x1xf32>
    %33 = arith.divf %31, %32 : vector<16x1xf32>
    %34 = vector.broadcast %33 : vector<16x1xf32> to vector<16x32xf32>
    %35 = arith.subf %27, %34 : vector<16x32xf32>
    %36 = arith.mulf %35, %35 : vector<16x32xf32>
    %cst_20 = arith.constant dense<0.000000e+00> : vector<16xf32>
    %37 = vector.multi_reduction <add>, %36, %cst_20 [1] : vector<16x32xf32> to vector<16xf32>
    %38 = vector.shape_cast %37 : vector<16xf32> to vector<16x1xf32>
    %cst_21 = arith.constant 3.200000e+01 : f32
    %39 = vector.broadcast %cst_21 : f32 to vector<16x1xf32>
    %40 = arith.divf %38, %39 : vector<16x1xf32>
    %cst_22 = arith.constant 9.99999974E-6 : f32
    %41 = vector.broadcast %cst_22 : f32 to vector<16x1xf32>
    %42 = arith.addf %40, %41 : vector<16x1xf32>
    %43 = math.rsqrt %42 : vector<16x1xf32>
    %44 = vector.broadcast %43 : vector<16x1xf32> to vector<16x32xf32>
    %45 = arith.mulf %35, %44 : vector<16x32xf32>
    %46 = vector.broadcast %28 : vector<1x32xf32> to vector<16x32xf32>
    %47 = arith.mulf %45, %46 : vector<16x32xf32>
    %48 = vector.broadcast %29 : vector<1x32xf32> to vector<16x32xf32>
    %49 = arith.addf %47, %48 : vector<16x32xf32>
    %c0_23 = arith.constant 0 : index
    %c0_24 = arith.constant 0 : index
    %50 = vector.load %arg8[%c0_23, %c0_24] : memref<16x32xf32, #tpu.memory_space<vmem>>, vector<16x32xf32>
    tpu.vector_store %arg8[%c0_23, %c0_24], %49 {strides = array<i32>} : memref<16x32xf32, #tpu.memory_space<vmem>>, vector<16x32xf32>,
    return
  }
  func.func @transform_0(%arg0: i32) -> (i32, i32) {
    %c0_i32 = arith.constant 0 : i32
    %c0_i32_0 = arith.constant 0 : i32
    return %arg0, %c0_i32 : i32, i32
  }
  func.func @transform_1(%arg0: i32) -> (i32, i32) {
    %c0_i32 = arith.constant 0 : i32
    %c0_i32_0 = arith.constant 0 : i32
    %c0_i32_1 = arith.constant 0 : i32
    return %c0_i32, %c0_i32_0 : i32, i32
  }
  func.func @transform_2(%arg0: i32) -> (i32, i32) {
    %c0_i32 = arith.constant 0 : i32
    %c0_i32_0 = arith.constant 0 : i32
    %c0_i32_1 = arith.constant 0 : i32
    return %c0_i32, %c0_i32_0 : i32, i32
  }
  func.func @transform_3(%arg0: i32) -> (i32, i32) {
    %c0_i32 = arith.constant 0 : i32
    %c0_i32_0 = arith.constant 0 : i32
    %c0_i32_1 = arith.constant 0 : i32
    return %c0_i32, %c0_i32_0 : i32, i32
  }
  func.func @transform_4(%arg0: i32) -> (i32, i32) {
    %c0_i32 = arith.constant 0 : i32
    %c0_i32_0 = arith.constant 0 : i32
    %c0_i32_1 = arith.constant 0 : i32
    return %c0_i32, %c0_i32_0 : i32, i32
  }
  func.func @transform_5(%arg0: i32) -> (i32, i32) {
    %c0_i32 = arith.constant 0 : i32
    %c0_i32_0 = arith.constant 0 : i32
    %c0_i32_1 = arith.constant 0 : i32
    return %c0_i32, %c0_i32_0 : i32, i32
  }
  func.func @transform_6(%arg0: i32) -> (i32, i32) {
    %c0_i32 = arith.constant 0 : i32
    %c0_i32_0 = arith.constant 0 : i32
    %c0_i32_1 = arith.constant 0 : i32
    return %c0_i32, %c0_i32_0 : i32, i32
  }
  func.func @transform_7(%arg0: i32) -> (i32, i32) {
    %c0_i32 = arith.constant 0 : i32
    %c0_i32_0 = arith.constant 0 : i32
    return %arg0, %c0_i32 : i32, i32
  }
}

module attributes {stable_mosaic.version = 11 : i64} {
  func.func @_ln_linear_kernel(%arg0: i32, %arg1: memref<32x48xf32, #tpu.memory_space<vmem>>, %arg2: memref<1x48xf32, #tpu.memory_space<vmem>>, %arg3: memref<1x48xf32, #tpu.memory_space<vmem>>, %arg4: memref<48x32xf32, #tpu.memory_space<vmem>>, %arg5: memref<1x32xf32, #tpu.memory_space<vmem>>, %arg6: memref<32x32xf32, #tpu.memory_space<vmem>>) attributes {dimension_semantics = [#tpu.dimension_semantics<parallel>], iteration_bounds = array<i64: 1>, scalar_prefetch = 0 : i64, scratch_operands = 0 : i64, tpu.core_type = #tpu.core_type<tc>, window_params = [{transform_indices = @transform_0, window_bounds = array<i64: 32, 48>}, {pipeline_mode = #tpu.pipeline_mode<synchronous>, transform_indices = @transform_1, window_bounds = array<i64: 1, 48>}, {pipeline_mode = #tpu.pipeline_mode<synchronous>, transform_indices = @transform_2, window_bounds = array<i64: 1, 48>}, {pipeline_mode = #tpu.pipeline_mode<synchronous>, transform_indices = @transform_3, window_bounds = array<i64: 48, 32>}, {pipeline_mode = #tpu.pipeline_mode<synchronous>, transform_indices = @transform_4, window_bounds = array<i64: 1, 32>}, {transform_indices = @transform_5, window_bounds = array<i64: 32, 32>}]} {
    %c0 = arith.constant 0 : index
    %c0_0 = arith.constant 0 : index
    %0 = vector.load %arg1[%c0, %c0_0] : memref<32x48xf32, #tpu.memory_space<vmem>>, vector<32x48xf32>
    %c0_1 = arith.constant 0 : index
    %c0_2 = arith.constant 0 : index
    %1 = vector.load %arg2[%c0_1, %c0_2] : memref<1x48xf32, #tpu.memory_space<vmem>>, vector<1x48xf32>
    %c0_3 = arith.constant 0 : index
    %c0_4 = arith.constant 0 : index
    %2 = vector.load %arg3[%c0_3, %c0_4] : memref<1x48xf32, #tpu.memory_space<vmem>>, vector<1x48xf32>
    %cst = arith.constant dense<0.000000e+00> : vector<32xf32>
    %3 = vector.multi_reduction <add>, %0, %cst [1] : vector<32x48xf32> to vector<32xf32>
    %4 = vector.shape_cast %3 : vector<32xf32> to vector<32x1xf32>
    %cst_5 = arith.constant 4.800000e+01 : f32
    %5 = vector.broadcast %cst_5 : f32 to vector<32x1xf32>
    %6 = arith.divf %4, %5 : vector<32x1xf32>
    %7 = vector.broadcast %6 : vector<32x1xf32> to vector<32x48xf32>
    %8 = arith.subf %0, %7 : vector<32x48xf32>
    %9 = arith.mulf %8, %8 : vector<32x48xf32>
    %cst_6 = arith.constant dense<0.000000e+00> : vector<32xf32>
    %10 = vector.multi_reduction <add>, %9, %cst_6 [1] : vector<32x48xf32> to vector<32xf32>
    %11 = vector.shape_cast %10 : vector<32xf32> to vector<32x1xf32>
    %cst_7 = arith.constant 4.800000e+01 : f32
    %12 = vector.broadcast %cst_7 : f32 to vector<32x1xf32>
    %13 = arith.divf %11, %12 : vector<32x1xf32>
    %cst_8 = arith.constant 9.99999974E-6 : f32
    %14 = vector.broadcast %cst_8 : f32 to vector<32x1xf32>
    %15 = arith.addf %13, %14 : vector<32x1xf32>
    %16 = math.rsqrt %15 : vector<32x1xf32>
    %17 = vector.broadcast %16 : vector<32x1xf32> to vector<32x48xf32>
    %18 = arith.mulf %8, %17 : vector<32x48xf32>
    %19 = vector.broadcast %1 : vector<1x48xf32> to vector<32x48xf32>
    %20 = arith.mulf %18, %19 : vector<32x48xf32>
    %21 = vector.broadcast %2 : vector<1x48xf32> to vector<32x48xf32>
    %22 = arith.addf %20, %21 : vector<32x48xf32>
    %c0_9 = arith.constant 0 : index
    %c0_10 = arith.constant 0 : index
    %23 = vector.load %arg4[%c0_9, %c0_10] : memref<48x32xf32, #tpu.memory_space<vmem>>, vector<48x32xf32>
    %cst_11 = arith.constant dense<0.000000e+00> : vector<32x32xf32>
    %24 = tpu.matmul %22, %23, %cst_11 {dimension_numbers = #tpu.dot_dimension_numbers<[1], [0], [0], [1], [0, 0, 1, 1], [], []>} : vector<32x48xf32>, vector<48x32xf32>, vector<32x32xf32> -> vector<32x32xf32>
    %c0_12 = arith.constant 0 : index
    %c0_13 = arith.constant 0 : index
    %25 = vector.load %arg5[%c0_12, %c0_13] : memref<1x32xf32, #tpu.memory_space<vmem>>, vector<1x32xf32>
    %26 = vector.broadcast %25 : vector<1x32xf32> to vector<32x32xf32>
    %27 = arith.addf %24, %26 : vector<32x32xf32>
    %c0_14 = arith.constant 0 : index
    %c0_15 = arith.constant 0 : index
    %28 = vector.load %arg6[%c0_14, %c0_15] : memref<32x32xf32, #tpu.memory_space<vmem>>, vector<32x32xf32>
    tpu.vector_store %arg6[%c0_14, %c0_15], %27 {strides = array<i32>} : memref<32x32xf32, #tpu.memory_space<vmem>>, vector<32x32xf32>,
    return
  }
  func.func @transform_0(%arg0: i32) -> (i32, i32) {
    %c0_i32 = arith.constant 0 : i32
    %c0_i32_0 = arith.constant 0 : i32
    return %arg0, %c0_i32 : i32, i32
  }
  func.func @transform_1(%arg0: i32) -> (i32, i32) {
    %c0_i32 = arith.constant 0 : i32
    %c0_i32_0 = arith.constant 0 : i32
    %c0_i32_1 = arith.constant 0 : i32
    return %c0_i32, %c0_i32_0 : i32, i32
  }
  func.func @transform_2(%arg0: i32) -> (i32, i32) {
    %c0_i32 = arith.constant 0 : i32
    %c0_i32_0 = arith.constant 0 : i32
    %c0_i32_1 = arith.constant 0 : i32
    return %c0_i32, %c0_i32_0 : i32, i32
  }
  func.func @transform_3(%arg0: i32) -> (i32, i32) {
    %c0_i32 = arith.constant 0 : i32
    %c0_i32_0 = arith.constant 0 : i32
    %c0_i32_1 = arith.constant 0 : i32
    return %c0_i32, %c0_i32_0 : i32, i32
  }
  func.func @transform_4(%arg0: i32) -> (i32, i32) {
    %c0_i32 = arith.constant 0 : i32
    %c0_i32_0 = arith.constant 0 : i32
    %c0_i32_1 = arith.constant 0 : i32
    return %c0_i32, %c0_i32_0 : i32, i32
  }
  func.func @transform_5(%arg0: i32) -> (i32, i32) {
    %c0_i32 = arith.constant 0 : i32
    %c0_i32_0 = arith.constant 0 : i32
    return %arg0, %c0_i32 : i32, i32
  }
}

module attributes {stable_mosaic.version = 11 : i64} {
  func.func @_ln_linear_kernel(%arg0: i32, %arg1: memref<32x32xf32, #tpu.memory_space<vmem>>, %arg2: memref<1x32xf32, #tpu.memory_space<vmem>>, %arg3: memref<1x32xf32, #tpu.memory_space<vmem>>, %arg4: memref<32x48xf32, #tpu.memory_space<vmem>>, %arg5: memref<1x48xf32, #tpu.memory_space<vmem>>, %arg6: memref<32x48xf32, #tpu.memory_space<vmem>>) attributes {dimension_semantics = [#tpu.dimension_semantics<parallel>], iteration_bounds = array<i64: 1>, scalar_prefetch = 0 : i64, scratch_operands = 0 : i64, tpu.core_type = #tpu.core_type<tc>, window_params = [{transform_indices = @transform_0, window_bounds = array<i64: 32, 32>}, {pipeline_mode = #tpu.pipeline_mode<synchronous>, transform_indices = @transform_1, window_bounds = array<i64: 1, 32>}, {pipeline_mode = #tpu.pipeline_mode<synchronous>, transform_indices = @transform_2, window_bounds = array<i64: 1, 32>}, {pipeline_mode = #tpu.pipeline_mode<synchronous>, transform_indices = @transform_3, window_bounds = array<i64: 32, 48>}, {pipeline_mode = #tpu.pipeline_mode<synchronous>, transform_indices = @transform_4, window_bounds = array<i64: 1, 48>}, {transform_indices = @transform_5, window_bounds = array<i64: 32, 48>}]} {
    %c0 = arith.constant 0 : index
    %c0_0 = arith.constant 0 : index
    %0 = vector.load %arg1[%c0, %c0_0] : memref<32x32xf32, #tpu.memory_space<vmem>>, vector<32x32xf32>
    %c0_1 = arith.constant 0 : index
    %c0_2 = arith.constant 0 : index
    %1 = vector.load %arg2[%c0_1, %c0_2] : memref<1x32xf32, #tpu.memory_space<vmem>>, vector<1x32xf32>
    %c0_3 = arith.constant 0 : index
    %c0_4 = arith.constant 0 : index
    %2 = vector.load %arg3[%c0_3, %c0_4] : memref<1x32xf32, #tpu.memory_space<vmem>>, vector<1x32xf32>
    %cst = arith.constant dense<0.000000e+00> : vector<32xf32>
    %3 = vector.multi_reduction <add>, %0, %cst [1] : vector<32x32xf32> to vector<32xf32>
    %4 = vector.shape_cast %3 : vector<32xf32> to vector<32x1xf32>
    %cst_5 = arith.constant 3.200000e+01 : f32
    %5 = vector.broadcast %cst_5 : f32 to vector<32x1xf32>
    %6 = arith.divf %4, %5 : vector<32x1xf32>
    %7 = vector.broadcast %6 : vector<32x1xf32> to vector<32x32xf32>
    %8 = arith.subf %0, %7 : vector<32x32xf32>
    %9 = arith.mulf %8, %8 : vector<32x32xf32>
    %cst_6 = arith.constant dense<0.000000e+00> : vector<32xf32>
    %10 = vector.multi_reduction <add>, %9, %cst_6 [1] : vector<32x32xf32> to vector<32xf32>
    %11 = vector.shape_cast %10 : vector<32xf32> to vector<32x1xf32>
    %cst_7 = arith.constant 3.200000e+01 : f32
    %12 = vector.broadcast %cst_7 : f32 to vector<32x1xf32>
    %13 = arith.divf %11, %12 : vector<32x1xf32>
    %cst_8 = arith.constant 9.99999974E-6 : f32
    %14 = vector.broadcast %cst_8 : f32 to vector<32x1xf32>
    %15 = arith.addf %13, %14 : vector<32x1xf32>
    %16 = math.rsqrt %15 : vector<32x1xf32>
    %17 = vector.broadcast %16 : vector<32x1xf32> to vector<32x32xf32>
    %18 = arith.mulf %8, %17 : vector<32x32xf32>
    %19 = vector.broadcast %1 : vector<1x32xf32> to vector<32x32xf32>
    %20 = arith.mulf %18, %19 : vector<32x32xf32>
    %21 = vector.broadcast %2 : vector<1x32xf32> to vector<32x32xf32>
    %22 = arith.addf %20, %21 : vector<32x32xf32>
    %c0_9 = arith.constant 0 : index
    %c0_10 = arith.constant 0 : index
    %23 = vector.load %arg4[%c0_9, %c0_10] : memref<32x48xf32, #tpu.memory_space<vmem>>, vector<32x48xf32>
    %cst_11 = arith.constant dense<0.000000e+00> : vector<32x48xf32>
    %24 = tpu.matmul %22, %23, %cst_11 {dimension_numbers = #tpu.dot_dimension_numbers<[1], [0], [0], [1], [0, 0, 1, 1], [], []>} : vector<32x32xf32>, vector<32x48xf32>, vector<32x48xf32> -> vector<32x48xf32>
    %c0_12 = arith.constant 0 : index
    %c0_13 = arith.constant 0 : index
    %25 = vector.load %arg5[%c0_12, %c0_13] : memref<1x48xf32, #tpu.memory_space<vmem>>, vector<1x48xf32>
    %26 = vector.broadcast %25 : vector<1x48xf32> to vector<32x48xf32>
    %27 = arith.addf %24, %26 : vector<32x48xf32>
    %c0_14 = arith.constant 0 : index
    %c0_15 = arith.constant 0 : index
    %28 = vector.load %arg6[%c0_14, %c0_15] : memref<32x48xf32, #tpu.memory_space<vmem>>, vector<32x48xf32>
    tpu.vector_store %arg6[%c0_14, %c0_15], %27 {strides = array<i32>} : memref<32x48xf32, #tpu.memory_space<vmem>>, vector<32x48xf32>,
    return
  }
  func.func @transform_0(%arg0: i32) -> (i32, i32) {
    %c0_i32 = arith.constant 0 : i32
    %c0_i32_0 = arith.constant 0 : i32
    return %arg0, %c0_i32 : i32, i32
  }
  func.func @transform_1(%arg0: i32) -> (i32, i32) {
    %c0_i32 = arith.constant 0 : i32
    %c0_i32_0 = arith.constant 0 : i32
    %c0_i32_1 = arith.constant 0 : i32
    return %c0_i32, %c0_i32_0 : i32, i32
  }
  func.func @transform_2(%arg0: i32) -> (i32, i32) {
    %c0_i32 = arith.constant 0 : i32
    %c0_i32_0 = arith.constant 0 : i32
    %c0_i32_1 = arith.constant 0 : i32
    return %c0_i32, %c0_i32_0 : i32, i32
  }
  func.func @transform_3(%arg0: i32) -> (i32, i32) {
    %c0_i32 = arith.constant 0 : i32
    %c0_i32_0 = arith.constant 0 : i32
    %c0_i32_1 = arith.constant 0 : i32
    return %c0_i32, %c0_i32_0 : i32, i32
  }
  func.func @transform_4(%arg0: i32) -> (i32, i32) {
    %c0_i32 = arith.constant 0 : i32
    %c0_i32_0 = arith.constant 0 : i32
    %c0_i32_1 = arith.constant 0 : i32
    return %c0_i32, %c0_i32_0 : i32, i32
  }
  func.func @transform_5(%arg0: i32) -> (i32, i32) {
    %c0_i32 = arith.constant 0 : i32
    %c0_i32_0 = arith.constant 0 : i32
    return %arg0, %c0_i32 : i32, i32
  }
}

module attributes {stable_mosaic.version = 11 : i64} {
  func.func @_decoder_layer_kernel(%arg0: i32, %arg1: memref<1x16x32xf32, #tpu.memory_space<vmem>>, %arg2: memref<1x8x32xf32, #tpu.memory_space<vmem>>, %arg3: memref<1x32xf32, #tpu.memory_space<vmem>>, %arg4: memref<1x32xf32, #tpu.memory_space<vmem>>, %arg5: memref<1x32xf32, #tpu.memory_space<vmem>>, %arg6: memref<1x32xf32, #tpu.memory_space<vmem>>, %arg7: memref<1x32xf32, #tpu.memory_space<vmem>>, %arg8: memref<1x32xf32, #tpu.memory_space<vmem>>, %arg9: memref<4x32x8xf32, #tpu.memory_space<vmem>>, %arg10: memref<4x32x8xf32, #tpu.memory_space<vmem>>, %arg11: memref<4x32x8xf32, #tpu.memory_space<vmem>>, %arg12: memref<4x8x32xf32, #tpu.memory_space<vmem>>, %arg13: memref<1x32xf32, #tpu.memory_space<vmem>>, %arg14: memref<4x32x8xf32, #tpu.memory_space<vmem>>, %arg15: memref<4x32x8xf32, #tpu.memory_space<vmem>>, %arg16: memref<4x32x8xf32, #tpu.memory_space<vmem>>, %arg17: memref<4x8x32xf32, #tpu.memory_space<vmem>>, %arg18: memref<1x32xf32, #tpu.memory_space<vmem>>, %arg19: memref<32x128xf32, #tpu.memory_space<vmem>>, %arg20: memref<1x128xf32, #tpu.memory_space<vmem>>, %arg21: memref<128x32xf32, #tpu.memory_space<vmem>>, %arg22: memref<1x32xf32, #tpu.memory_space<vmem>>, %arg23: memref<1x16x32xf32, #tpu.memory_space<vmem>>) attributes {dimension_semantics = [#tpu.dimension_semantics<parallel>], iteration_bounds = array<i64: 2>, scalar_prefetch = 0 : i64, scratch_operands = 0 : i64, tpu.core_type = #tpu.core_type<tc>, window_params = [{transform_indices = @transform_0, window_bounds = array<i64: 1, 16, 32>}, {transform_indices = @transform_1, window_bounds = array<i64: 1, 8, 32>}, {pipeline_mode = #tpu.pipeline_mode<synchronous>, transform_indices = @transform_2, window_bounds = array<i64: 1, 32>}, {pipeline_mode = #tpu.pipeline_mode<synchronous>, transform_indices = @transform_3, window_bounds = array<i64: 1, 32>}, {pipeline_mode = #tpu.pipeline_mode<synchronous>, transform_indices = @transform_4, window_bounds = array<i64: 1, 32>}, {pipeline_mode = #tpu.pipeline_mode<synchronous>, transform_indices = @transform_5, window_bounds = array<i64: 1, 32>}, {pipeline_mode = #tpu.pipeline_mode<synchronous>, transform_indices = @transform_6, window_bounds = array<i64: 1, 32>}, {pipeline_mode = #tpu.pipeline_mode<synchronous>, transform_indices = @transform_7, window_bounds = array<i64: 1, 32>}, {pipeline_mode = #tpu.pipeline_mode<synchronous>, transform_indices = @transform_8, window_bounds = array<i64: 4, 32, 8>}, {pipeline_mode = #tpu.pipeline_mode<synchronous>, transform_indices = @transform_9, window_bounds = array<i64: 4, 32, 8>}, {pipeline_mode = #tpu.pipeline_mode<synchronous>, transform_indices = @transform_10, window_bounds = array<i64: 4, 32, 8>}, {pipeline_mode = #tpu.pipeline_mode<synchronous>, transform_indices = @transform_11, window_bounds = array<i64: 4, 8, 32>}, {pipeline_mode = #tpu.pipeline_mode<synchronous>, transform_indices = @transform_12, window_bounds = array<i64: 1, 32>}, {pipeline_mode = #tpu.pipeline_mode<synchronous>, transform_indices = @transform_13, window_bounds = array<i64: 4, 32, 8>}, {pipeline_mode = #tpu.pipeline_mode<synchronous>, transform_indices = @transform_14, window_bounds = array<i64: 4, 32, 8>}, {pipeline_mode = #tpu.pipeline_mode<synchronous>, transform_indices = @transform_15, window_bounds = array<i64: 4, 32, 8>}, {pipeline_mode = #tpu.pipeline_mode<synchronous>, transform_indices = @transform_16, window_bounds = array<i64: 4, 8, 32>}, {pipeline_mode = #tpu.pipeline_mode<synchronous>, transform_indices = @transform_17, window_bounds = array<i64: 1, 32>}, {pipeline_mode = #tpu.pipeline_mode<synchronous>, transform_indices = @transform_18, window_bounds = array<i64: 32, 128>}, {pipeline_mode = #tpu.pipeline_mode<synchronous>, transform_indices = @transform_19, window_bounds = array<i64: 1, 128>}, {pipeline_mode = #tpu.pipeline_mode<synchronous>, transform_indices = @transform_20, window_bounds = array<i64: 128, 32>}, {pipeline_mode = #tpu.pipeline_mode<synchronous>, transform_indices = @transform_21, window_bounds = array<i64: 1, 32>}, {transform_indices = @transform_22, window_bounds = array<i64: 1, 16, 32>}]} {
    %c0 = arith.constant 0 : index
    %c0_0 = arith.constant 0 : index
    %c0_1 = arith.constant 0 : index
    %0 = vector.load %arg1[%c0, %c0_0, %c0_1] : memref<1x16x32xf32, #tpu.memory_space<vmem>>, vector<1x16x32xf32>
    %1 = vector.shape_cast %0 : vector<1x16x32xf32> to vector<16x32xf32>
    %c0_2 = arith.constant 0 : index
    %c0_3 = arith.constant 0 : index
    %c0_4 = arith.constant 0 : index
    %2 = vector.load %arg2[%c0_2, %c0_3, %c0_4] : memref<1x8x32xf32, #tpu.memory_space<vmem>>, vector<1x8x32xf32>
    %3 = vector.shape_cast %2 : vector<1x8x32xf32> to vector<8x32xf32>
    %c0_5 = arith.constant 0 : index
    %c0_6 = arith.constant 0 : index
    %4 = vector.load %arg3[%c0_5, %c0_6] : memref<1x32xf32, #tpu.memory_space<vmem>>, vector<1x32xf32>
    %c0_7 = arith.constant 0 : index
    %c0_8 = arith.constant 0 : index
    %5 = vector.load %arg4[%c0_7, %c0_8] : memref<1x32xf32, #tpu.memory_space<vmem>>, vector<1x32xf32>
    %cst = arith.constant dense<0.000000e+00> : vector<16xf32>
    %6 = vector.multi_reduction <add>, %1, %cst [1] : vector<16x32xf32> to vector<16xf32>
    %7 = vector.shape_cast %6 : vector<16xf32> to vector<16x1xf32>
    %cst_9 = arith.constant 3.200000e+01 : f32
    %8 = vector.broadcast %cst_9 : f32 to vector<16x1xf32>
    %9 = arith.divf %7, %8 : vector<16x1xf32>
    %10 = vector.broadcast %9 : vector<16x1xf32> to vector<16x32xf32>
    %11 = arith.subf %1, %10 : vector<16x32xf32>
    %12 = arith.mulf %11, %11 : vector<16x32xf32>
    %cst_10 = arith.constant dense<0.000000e+00> : vector<16xf32>
    %13 = vector.multi_reduction <add>, %12, %cst_10 [1] : vector<16x32xf32> to vector<16xf32>
    %14 = vector.shape_cast %13 : vector<16xf32> to vector<16x1xf32>
    %cst_11 = arith.constant 3.200000e+01 : f32
    %15 = vector.broadcast %cst_11 : f32 to vector<16x1xf32>
    %16 = arith.divf %14, %15 : vector<16x1xf32>
    %cst_12 = arith.constant 9.99999974E-6 : f32
    %17 = vector.broadcast %cst_12 : f32 to vector<16x1xf32>
    %18 = arith.addf %16, %17 : vector<16x1xf32>
    %19 = math.rsqrt %18 : vector<16x1xf32>
    %20 = vector.broadcast %19 : vector<16x1xf32> to vector<16x32xf32>
    %21 = arith.mulf %11, %20 : vector<16x32xf32>
    %22 = vector.broadcast %4 : vector<1x32xf32> to vector<16x32xf32>
    %23 = arith.mulf %21, %22 : vector<16x32xf32>
    %24 = vector.broadcast %5 : vector<1x32xf32> to vector<16x32xf32>
    %25 = arith.addf %23, %24 : vector<16x32xf32>
    %c0_13 = arith.constant 0 : index
    %c0_14 = arith.constant 0 : index
    %c0_15 = arith.constant 0 : index
    %26 = vector.load %arg9[%c0_13, %c0_14, %c0_15] : memref<4x32x8xf32, #tpu.memory_space<vmem>>, vector<1x32x8xf32>
    %27 = vector.shape_cast %26 : vector<1x32x8xf32> to vector<32x8xf32>
    %cst_16 = arith.constant dense<0.000000e+00> : vector<16x8xf32>
    %28 = tpu.matmul %25, %27, %cst_16 {dimension_numbers = #tpu.dot_dimension_numbers<[1], [0], [0], [1], [0, 0, 1, 1], [], []>} : vector<16x32xf32>, vector<32x8xf32>, vector<16x8xf32> -> vector<16x8xf32>
    %c0_17 = arith.constant 0 : index
    %c0_18 = arith.constant 0 : index
    %c0_19 = arith.constant 0 : index
    %29 = vector.load %arg10[%c0_17, %c0_18, %c0_19] : memref<4x32x8xf32, #tpu.memory_space<vmem>>, vector<1x32x8xf32>
    %30 = vector.shape_cast %29 : vector<1x32x8xf32> to vector<32x8xf32>
    %cst_20 = arith.constant dense<0.000000e+00> : vector<8x8xf32>
    %31 = tpu.matmul %3, %30, %cst_20 {dimension_numbers = #tpu.dot_dimension_numbers<[1], [0], [0], [1], [0, 0, 1, 1], [], []>} : vector<8x32xf32>, vector<32x8xf32>, vector<8x8xf32> -> vector<8x8xf32>
    %c0_21 = arith.constant 0 : index
    %c0_22 = arith.constant 0 : index
    %c0_23 = arith.constant 0 : index
    %32 = vector.load %arg11[%c0_21, %c0_22, %c0_23] : memref<4x32x8xf32, #tpu.memory_space<vmem>>, vector<1x32x8xf32>
    %33 = vector.shape_cast %32 : vector<1x32x8xf32> to vector<32x8xf32>
    %cst_24 = arith.constant dense<0.000000e+00> : vector<8x8xf32>
    %34 = tpu.matmul %3, %33, %cst_24 {dimension_numbers = #tpu.dot_dimension_numbers<[1], [0], [0], [1], [0, 0, 1, 1], [], []>} : vector<8x32xf32>, vector<32x8xf32>, vector<8x8xf32> -> vector<8x8xf32>
    "tpu.trace_start"() <{level = 10 : i32, message = "nd,md->nm"}> : () -> ()
    %cst_25 = arith.constant dense<0.000000e+00> : vector<16x8xf32>
    %35 = tpu.matmul %28, %31, %cst_25 {dimension_numbers = #tpu.dot_dimension_numbers<[1], [1], [0], [0], [0, 0, 1, 0], [], []>} : vector<16x8xf32>, vector<8x8xf32>, vector<16x8xf32> -> vector<16x8xf32>
    "tpu.trace_stop"() : () -> ()
    %cst_26 = arith.constant 0.353553385 : f32
    %36 = vector.broadcast %cst_26 : f32 to vector<16x8xf32>
    %37 = arith.mulf %35, %36 : vector<16x8xf32>
    %cst_27 = arith.constant dense<0xFF800000> : vector<16xf32>
    %38 = vector.multi_reduction <maximumf>, %37, %cst_27 [1] : vector<16x8xf32> to vector<16xf32>
    %39 = vector.shape_cast %38 : vector<16xf32> to vector<16x1xf32>
    %40 = vector.broadcast %39 : vector<16x1xf32> to vector<16x8xf32>
    %41 = arith.subf %37, %40 : vector<16x8xf32>
    %42 = math.exp %41 : vector<16x8xf32>
    %cst_28 = arith.constant dense<0.000000e+00> : vector<16xf32>
    %43 = vector.multi_reduction <add>, %42, %cst_28 [1] : vector<16x8xf32> to vector<16xf32>
    %44 = vector.shape_cast %43 : vector<16xf32> to vector<16x1xf32>
    %45 = tpu.reciprocal %44 {approx = true} : vector<16x1xf32> -> vector<16x1xf32>
    %46 = vector.broadcast %45 : vector<16x1xf32> to vector<16x8xf32>
    %47 = arith.mulf %42, %46 : vector<16x8xf32>
    %cst_29 = arith.constant dense<0.000000e+00> : vector<16x8xf32>
    %48 = tpu.matmul %47, %34, %cst_29 {dimension_numbers = #tpu.dot_dimension_numbers<[1], [0], [0], [1], [0, 0, 1, 1], [], []>} : vector<16x8xf32>, vector<8x8xf32>, vector<16x8xf32> -> vector<16x8xf32>
    %c0_30 = arith.constant 0 : index
    %c0_31 = arith.constant 0 : index
    %c0_32 = arith.constant 0 : index
    %49 = vector.load %arg12[%c0_30, %c0_31, %c0_32] : memref<4x8x32xf32, #tpu.memory_space<vmem>>, vector<1x8x32xf32>
    %50 = vector.shape_cast %49 : vector<1x8x32xf32> to vector<8x32xf32>
    %cst_33 = arith.constant dense<0.000000e+00> : vector<16x32xf32>
    %51 = tpu.matmul %48, %50, %cst_33 {dimension_numbers = #tpu.dot_dimension_numbers<[1], [0], [0], [1], [0, 0, 1, 1], [], []>} : vector<16x8xf32>, vector<8x32xf32>, vector<16x32xf32> -> vector<16x32xf32>
    %c1 = arith.constant 1 : index
    %c0_34 = arith.constant 0 : index
    %c0_35 = arith.constant 0 : index
    %52 = vector.load %arg9[%c1, %c0_34, %c0_35] : memref<4x32x8xf32, #tpu.memory_space<vmem>>, vector<1x32x8xf32>
    %53 = vector.shape_cast %52 : vector<1x32x8xf32> to vector<32x8xf32>
    %cst_36 = arith.constant dense<0.000000e+00> : vector<16x8xf32>
    %54 = tpu.matmul %25, %53, %cst_36 {dimension_numbers = #tpu.dot_dimension_numbers<[1], [0], [0], [1], [0, 0, 1, 1], [], []>} : vector<16x32xf32>, vector<32x8xf32>, vector<16x8xf32> -> vector<16x8xf32>
    %c1_37 = arith.constant 1 : index
    %c0_38 = arith.constant 0 : index
    %c0_39 = arith.constant 0 : index
    %55 = vector.load %arg10[%c1_37, %c0_38, %c0_39] : memref<4x32x8xf32, #tpu.memory_space<vmem>>, vector<1x32x8xf32>
    %56 = vector.shape_cast %55 : vector<1x32x8xf32> to vector<32x8xf32>
    %cst_40 = arith.constant dense<0.000000e+00> : vector<8x8xf32>
    %57 = tpu.matmul %3, %56, %cst_40 {dimension_numbers = #tpu.dot_dimension_numbers<[1], [0], [0], [1], [0, 0, 1, 1], [], []>} : vector<8x32xf32>, vector<32x8xf32>, vector<8x8xf32> -> vector<8x8xf32>
    %c1_41 = arith.constant 1 : index
    %c0_42 = arith.constant 0 : index
    %c0_43 = arith.constant 0 : index
    %58 = vector.load %arg11[%c1_41, %c0_42, %c0_43] : memref<4x32x8xf32, #tpu.memory_space<vmem>>, vector<1x32x8xf32>
    %59 = vector.shape_cast %58 : vector<1x32x8xf32> to vector<32x8xf32>
    %cst_44 = arith.constant dense<0.000000e+00> : vector<8x8xf32>
    %60 = tpu.matmul %3, %59, %cst_44 {dimension_numbers = #tpu.dot_dimension_numbers<[1], [0], [0], [1], [0, 0, 1, 1], [], []>} : vector<8x32xf32>, vector<32x8xf32>, vector<8x8xf32> -> vector<8x8xf32>
    "tpu.trace_start"() <{level = 10 : i32, message = "nd,md->nm"}> : () -> ()
    %cst_45 = arith.constant dense<0.000000e+00> : vector<16x8xf32>
    %61 = tpu.matmul %54, %57, %cst_45 {dimension_numbers = #tpu.dot_dimension_numbers<[1], [1], [0], [0], [0, 0, 1, 0], [], []>} : vector<16x8xf32>, vector<8x8xf32>, vector<16x8xf32> -> vector<16x8xf32>
    "tpu.trace_stop"() : () -> ()
    %cst_46 = arith.constant 0.353553385 : f32
    %62 = vector.broadcast %cst_46 : f32 to vector<16x8xf32>
    %63 = arith.mulf %61, %62 : vector<16x8xf32>
    %cst_47 = arith.constant dense<0xFF800000> : vector<16xf32>
    %64 = vector.multi_reduction <maximumf>, %63, %cst_47 [1] : vector<16x8xf32> to vector<16xf32>
    %65 = vector.shape_cast %64 : vector<16xf32> to vector<16x1xf32>
    %66 = vector.broadcast %65 : vector<16x1xf32> to vector<16x8xf32>
    %67 = arith.subf %63, %66 : vector<16x8xf32>
    %68 = math.exp %67 : vector<16x8xf32>
    %cst_48 = arith.constant dense<0.000000e+00> : vector<16xf32>
    %69 = vector.multi_reduction <add>, %68, %cst_48 [1] : vector<16x8xf32> to vector<16xf32>
    %70 = vector.shape_cast %69 : vector<16xf32> to vector<16x1xf32>
    %71 = tpu.reciprocal %70 {approx = true} : vector<16x1xf32> -> vector<16x1xf32>
    %72 = vector.broadcast %71 : vector<16x1xf32> to vector<16x8xf32>
    %73 = arith.mulf %68, %72 : vector<16x8xf32>
    %cst_49 = arith.constant dense<0.000000e+00> : vector<16x8xf32>
    %74 = tpu.matmul %73, %60, %cst_49 {dimension_numbers = #tpu.dot_dimension_numbers<[1], [0], [0], [1], [0, 0, 1, 1], [], []>} : vector<16x8xf32>, vector<8x8xf32>, vector<16x8xf32> -> vector<16x8xf32>
    %c1_50 = arith.constant 1 : index
    %c0_51 = arith.constant 0 : index
    %c0_52 = arith.constant 0 : index
    %75 = vector.load %arg12[%c1_50, %c0_51, %c0_52] : memref<4x8x32xf32, #tpu.memory_space<vmem>>, vector<1x8x32xf32>
    %76 = vector.shape_cast %75 : vector<1x8x32xf32> to vector<8x32xf32>
    %cst_53 = arith.constant dense<0.000000e+00> : vector<16x32xf32>
    %77 = tpu.matmul %74, %76, %cst_53 {dimension_numbers = #tpu.dot_dimension_numbers<[1], [0], [0], [1], [0, 0, 1, 1], [], []>} : vector<16x8xf32>, vector<8x32xf32>, vector<16x32xf32> -> vector<16x32xf32>
    %78 = arith.addf %51, %77 : vector<16x32xf32>
    %c2 = arith.constant 2 : index
    %c0_54 = arith.constant 0 : index
    %c0_55 = arith.constant 0 : index
    %79 = vector.load %arg9[%c2, %c0_54, %c0_55] : memref<4x32x8xf32, #tpu.memory_space<vmem>>, vector<1x32x8xf32>
    %80 = vector.shape_cast %79 : vector<1x32x8xf32> to vector<32x8xf32>
    %cst_56 = arith.constant dense<0.000000e+00> : vector<16x8xf32>
    %81 = tpu.matmul %25, %80, %cst_56 {dimension_numbers = #tpu.dot_dimension_numbers<[1], [0], [0], [1], [0, 0, 1, 1], [], []>} : vector<16x32xf32>, vector<32x8xf32>, vector<16x8xf32> -> vector<16x8xf32>
    %c2_57 = arith.constant 2 : index
    %c0_58 = arith.constant 0 : index
    %c0_59 = arith.constant 0 : index
    %82 = vector.load %arg10[%c2_57, %c0_58, %c0_59] : memref<4x32x8xf32, #tpu.memory_space<vmem>>, vector<1x32x8xf32>
    %83 = vector.shape_cast %82 : vector<1x32x8xf32> to vector<32x8xf32>
    %cst_60 = arith.constant dense<0.000000e+00> : vector<8x8xf32>
    %84 = tpu.matmul %3, %83, %cst_60 {dimension_numbers = #tpu.dot_dimension_numbers<[1], [0], [0], [1], [0, 0, 1, 1], [], []>} : vector<8x32xf32>, vector<32x8xf32>, vector<8x8xf32> -> vector<8x8xf32>
    %c2_61 = arith.constant 2 : index
    %c0_62 = arith.constant 0 : index
    %c0_63 = arith.constant 0 : index
    %85 = vector.load %arg11[%c2_61, %c0_62, %c0_63] : memref<4x32x8xf32, #tpu.memory_space<vmem>>, vector<1x32x8xf32>
    %86 = vector.shape_cast %85 : vector<1x32x8xf32> to vector<32x8xf32>
    %cst_64 = arith.constant dense<0.000000e+00> : vector<8x8xf32>
    %87 = tpu.matmul %3, %86, %cst_64 {dimension_numbers = #tpu.dot_dimension_numbers<[1], [0], [0], [1], [0, 0, 1, 1], [], []>} : vector<8x32xf32>, vector<32x8xf32>, vector<8x8xf32> -> vector<8x8xf32>
    "tpu.trace_start"() <{level = 10 : i32, message = "nd,md->nm"}> : () -> ()
    %cst_65 = arith.constant dense<0.000000e+00> : vector<16x8xf32>
    %88 = tpu.matmul %81, %84, %cst_65 {dimension_numbers = #tpu.dot_dimension_numbers<[1], [1], [0], [0], [0, 0, 1, 0], [], []>} : vector<16x8xf32>, vector<8x8xf32>, vector<16x8xf32> -> vector<16x8xf32>
    "tpu.trace_stop"() : () -> ()
    %cst_66 = arith.constant 0.353553385 : f32
    %89 = vector.broadcast %cst_66 : f32 to vector<16x8xf32>
    %90 = arith.mulf %88, %89 : vector<16x8xf32>
    %cst_67 = arith.constant dense<0xFF800000> : vector<16xf32>
    %91 = vector.multi_reduction <maximumf>, %90, %cst_67 [1] : vector<16x8xf32> to vector<16xf32>
    %92 = vector.shape_cast %91 : vector<16xf32> to vector<16x1xf32>
    %93 = vector.broadcast %92 : vector<16x1xf32> to vector<16x8xf32>
    %94 = arith.subf %90, %93 : vector<16x8xf32>
    %95 = math.exp %94 : vector<16x8xf32>
    %cst_68 = arith.constant dense<0.000000e+00> : vector<16xf32>
    %96 = vector.multi_reduction <add>, %95, %cst_68 [1] : vector<16x8xf32> to vector<16xf32>
    %97 = vector.shape_cast %96 : vector<16xf32> to vector<16x1xf32>
    %98 = tpu.reciprocal %97 {approx = true} : vector<16x1xf32> -> vector<16x1xf32>
    %99 = vector.broadcast %98 : vector<16x1xf32> to vector<16x8xf32>
    %100 = arith.mulf %95, %99 : vector<16x8xf32>
    %cst_69 = arith.constant dense<0.000000e+00> : vector<16x8xf32>
    %101 = tpu.matmul %100, %87, %cst_69 {dimension_numbers = #tpu.dot_dimension_numbers<[1], [0], [0], [1], [0, 0, 1, 1], [], []>} : vector<16x8xf32>, vector<8x8xf32>, vector<16x8xf32> -> vector<16x8xf32>
    %c2_70 = arith.constant 2 : index
    %c0_71 = arith.constant 0 : index
    %c0_72 = arith.constant 0 : index
    %102 = vector.load %arg12[%c2_70, %c0_71, %c0_72] : memref<4x8x32xf32, #tpu.memory_space<vmem>>, vector<1x8x32xf32>
    %103 = vector.shape_cast %102 : vector<1x8x32xf32> to vector<8x32xf32>
    %cst_73 = arith.constant dense<0.000000e+00> : vector<16x32xf32>
    %104 = tpu.matmul %101, %103, %cst_73 {dimension_numbers = #tpu.dot_dimension_numbers<[1], [0], [0], [1], [0, 0, 1, 1], [], []>} : vector<16x8xf32>, vector<8x32xf32>, vector<16x32xf32> -> vector<16x32xf32>
    %105 = arith.addf %78, %104 : vector<16x32xf32>
    %c3 = arith.constant 3 : index
    %c0_74 = arith.constant 0 : index
    %c0_75 = arith.constant 0 : index
    %106 = vector.load %arg9[%c3, %c0_74, %c0_75] : memref<4x32x8xf32, #tpu.memory_space<vmem>>, vector<1x32x8xf32>
    %107 = vector.shape_cast %106 : vector<1x32x8xf32> to vector<32x8xf32>
    %cst_76 = arith.constant dense<0.000000e+00> : vector<16x8xf32>
    %108 = tpu.matmul %25, %107, %cst_76 {dimension_numbers = #tpu.dot_dimension_numbers<[1], [0], [0], [1], [0, 0, 1, 1], [], []>} : vector<16x32xf32>, vector<32x8xf32>, vector<16x8xf32> -> vector<16x8xf32>
    %c3_77 = arith.constant 3 : index
    %c0_78 = arith.constant 0 : index
    %c0_79 = arith.constant 0 : index
    %109 = vector.load %arg10[%c3_77, %c0_78, %c0_79] : memref<4x32x8xf32, #tpu.memory_space<vmem>>, vector<1x32x8xf32>
    %110 = vector.shape_cast %109 : vector<1x32x8xf32> to vector<32x8xf32>
    %cst_80 = arith.constant dense<0.000000e+00> : vector<8x8xf32>
    %111 = tpu.matmul %3, %110, %cst_80 {dimension_numbers = #tpu.dot_dimension_numbers<[1], [0], [0], [1], [0, 0, 1, 1], [], []>} : vector<8x32xf32>, vector<32x8xf32>, vector<8x8xf32> -> vector<8x8xf32>
    %c3_81 = arith.constant 3 : index
    %c0_82 = arith.constant 0 : index
    %c0_83 = arith.constant 0 : index
    %112 = vector.load %arg11[%c3_81, %c0_82, %c0_83] : memref<4x32x8xf32, #tpu.memory_space<vmem>>, vector<1x32x8xf32>
    %113 = vector.shape_cast %112 : vector<1x32x8xf32> to vector<32x8xf32>
    %cst_84 = arith.constant dense<0.000000e+00> : vector<8x8xf32>
    %114 = tpu.matmul %3, %113, %cst_84 {dimension_numbers = #tpu.dot_dimension_numbers<[1], [0], [0], [1], [0, 0, 1, 1], [], []>} : vector<8x32xf32>, vector<32x8xf32>, vector<8x8xf32> -> vector<8x8xf32>
    "tpu.trace_start"() <{level = 10 : i32, message = "nd,md->nm"}> : () -> ()
    %cst_85 = arith.constant dense<0.000000e+00> : vector<16x8xf32>
    %115 = tpu.matmul %108, %111, %cst_85 {dimension_numbers = #tpu.dot_dimension_numbers<[1], [1], [0], [0], [0, 0, 1, 0], [], []>} : vector<16x8xf32>, vector<8x8xf32>, vector<16x8xf32> -> vector<16x8xf32>
    "tpu.trace_stop"() : () -> ()
    %cst_86 = arith.constant 0.353553385 : f32
    %116 = vector.broadcast %cst_86 : f32 to vector<16x8xf32>
    %117 = arith.mulf %115, %116 : vector<16x8xf32>
    %cst_87 = arith.constant dense<0xFF800000> : vector<16xf32>
    %118 = vector.multi_reduction <maximumf>, %117, %cst_87 [1] : vector<16x8xf32> to vector<16xf32>
    %119 = vector.shape_cast %118 : vector<16xf32> to vector<16x1xf32>
    %120 = vector.broadcast %119 : vector<16x1xf32> to vector<16x8xf32>
    %121 = arith.subf %117, %120 : vector<16x8xf32>
    %122 = math.exp %121 : vector<16x8xf32>
    %cst_88 = arith.constant dense<0.000000e+00> : vector<16xf32>
    %123 = vector.multi_reduction <add>, %122, %cst_88 [1] : vector<16x8xf32> to vector<16xf32>
    %124 = vector.shape_cast %123 : vector<16xf32> to vector<16x1xf32>
    %125 = tpu.reciprocal %124 {approx = true} : vector<16x1xf32> -> vector<16x1xf32>
    %126 = vector.broadcast %125 : vector<16x1xf32> to vector<16x8xf32>
    %127 = arith.mulf %122, %126 : vector<16x8xf32>
    %cst_89 = arith.constant dense<0.000000e+00> : vector<16x8xf32>
    %128 = tpu.matmul %127, %114, %cst_89 {dimension_numbers = #tpu.dot_dimension_numbers<[1], [0], [0], [1], [0, 0, 1, 1], [], []>} : vector<16x8xf32>, vector<8x8xf32>, vector<16x8xf32> -> vector<16x8xf32>
    %c3_90 = arith.constant 3 : index
    %c0_91 = arith.constant 0 : index
    %c0_92 = arith.constant 0 : index
    %129 = vector.load %arg12[%c3_90, %c0_91, %c0_92] : memref<4x8x32xf32, #tpu.memory_space<vmem>>, vector<1x8x32xf32>
    %130 = vector.shape_cast %129 : vector<1x8x32xf32> to vector<8x32xf32>
    %cst_93 = arith.constant dense<0.000000e+00> : vector<16x32xf32>
    %131 = tpu.matmul %128, %130, %cst_93 {dimension_numbers = #tpu.dot_dimension_numbers<[1], [0], [0], [1], [0, 0, 1, 1], [], []>} : vector<16x8xf32>, vector<8x32xf32>, vector<16x32xf32> -> vector<16x32xf32>
    %132 = arith.addf %105, %131 : vector<16x32xf32>
    %c0_94 = arith.constant 0 : index
    %c0_95 = arith.constant 0 : index
    %133 = vector.load %arg13[%c0_94, %c0_95] : memref<1x32xf32, #tpu.memory_space<vmem>>, vector<1x32xf32>
    %134 = vector.broadcast %133 : vector<1x32xf32> to vector<16x32xf32>
    %135 = arith.addf %132, %134 : vector<16x32xf32>
    %136 = arith.addf %1, %135 : vector<16x32xf32>
    %c0_96 = arith.constant 0 : index
    %c0_97 = arith.constant 0 : index
    %137 = vector.load %arg5[%c0_96, %c0_97] : memref<1x32xf32, #tpu.memory_space<vmem>>, vector<1x32xf32>
    %c0_98 = arith.constant 0 : index
    %c0_99 = arith.constant 0 : index
    %138 = vector.load %arg6[%c0_98, %c0_99] : memref<1x32xf32, #tpu.memory_space<vmem>>, vector<1x32xf32>
    %cst_100 = arith.constant dense<0.000000e+00> : vector<16xf32>
    %139 = vector.multi_reduction <add>, %136, %cst_100 [1] : vector<16x32xf32> to vector<16xf32>
    %140 = vector.shape_cast %139 : vector<16xf32> to vector<16x1xf32>
    %cst_101 = arith.constant 3.200000e+01 : f32
    %141 = vector.broadcast %cst_101 : f32 to vector<16x1xf32>
    %142 = arith.divf %140, %141 : vector<16x1xf32>
    %143 = vector.broadcast %142 : vector<16x1xf32> to vector<16x32xf32>
    %144 = arith.subf %136, %143 : vector<16x32xf32>
    %145 = arith.mulf %144, %144 : vector<16x32xf32>
    %cst_102 = arith.constant dense<0.000000e+00> : vector<16xf32>
    %146 = vector.multi_reduction <add>, %145, %cst_102 [1] : vector<16x32xf32> to vector<16xf32>
    %147 = vector.shape_cast %146 : vector<16xf32> to vector<16x1xf32>
    %cst_103 = arith.constant 3.200000e+01 : f32
    %148 = vector.broadcast %cst_103 : f32 to vector<16x1xf32>
    %149 = arith.divf %147, %148 : vector<16x1xf32>
    %cst_104 = arith.constant 9.99999974E-6 : f32
    %150 = vector.broadcast %cst_104 : f32 to vector<16x1xf32>
    %151 = arith.addf %149, %150 : vector<16x1xf32>
    %152 = math.rsqrt %151 : vector<16x1xf32>
    %153 = vector.broadcast %152 : vector<16x1xf32> to vector<16x32xf32>
    %154 = arith.mulf %144, %153 : vector<16x32xf32>
    %155 = vector.broadcast %137 : vector<1x32xf32> to vector<16x32xf32>
    %156 = arith.mulf %154, %155 : vector<16x32xf32>
    %157 = vector.broadcast %138 : vector<1x32xf32> to vector<16x32xf32>
    %158 = arith.addf %156, %157 : vector<16x32xf32>
    %c0_105 = arith.constant 0 : index
    %c0_106 = arith.constant 0 : index
    %c0_107 = arith.constant 0 : index
    %159 = vector.load %arg14[%c0_105, %c0_106, %c0_107] : memref<4x32x8xf32, #tpu.memory_space<vmem>>, vector<1x32x8xf32>
    %160 = vector.shape_cast %159 : vector<1x32x8xf32> to vector<32x8xf32>
    %cst_108 = arith.constant dense<0.000000e+00> : vector<16x8xf32>
    %161 = tpu.matmul %158, %160, %cst_108 {dimension_numbers = #tpu.dot_dimension_numbers<[1], [0], [0], [1], [0, 0, 1, 1], [], []>} : vector<16x32xf32>, vector<32x8xf32>, vector<16x8xf32> -> vector<16x8xf32>
    %c0_109 = arith.constant 0 : index
    %c0_110 = arith.constant 0 : index
    %c0_111 = arith.constant 0 : index
    %162 = vector.load %arg15[%c0_109, %c0_110, %c0_111] : memref<4x32x8xf32, #tpu.memory_space<vmem>>, vector<1x32x8xf32>
    %163 = vector.shape_cast %162 : vector<1x32x8xf32> to vector<32x8xf32>
    %cst_112 = arith.constant dense<0.000000e+00> : vector<16x8xf32>
    %164 = tpu.matmul %158, %163, %cst_112 {dimension_numbers = #tpu.dot_dimension_numbers<[1], [0], [0], [1], [0, 0, 1, 1], [], []>} : vector<16x32xf32>, vector<32x8xf32>, vector<16x8xf32> -> vector<16x8xf32>
    %c0_113 = arith.constant 0 : index
    %c0_114 = arith.constant 0 : index
    %c0_115 = arith.constant 0 : index
    %165 = vector.load %arg16[%c0_113, %c0_114, %c0_115] : memref<4x32x8xf32, #tpu.memory_space<vmem>>, vector<1x32x8xf32>
    %166 = vector.shape_cast %165 : vector<1x32x8xf32> to vector<32x8xf32>
    %cst_116 = arith.constant dense<0.000000e+00> : vector<16x8xf32>
    %167 = tpu.matmul %158, %166, %cst_116 {dimension_numbers = #tpu.dot_dimension_numbers<[1], [0], [0], [1], [0, 0, 1, 1], [], []>} : vector<16x32xf32>, vector<32x8xf32>, vector<16x8xf32> -> vector<16x8xf32>
    "tpu.trace_start"() <{level = 10 : i32, message = "nd,md->nm"}> : () -> ()
    %cst_117 = arith.constant dense<0.000000e+00> : vector<16x16xf32>
    %168 = tpu.matmul %161, %164, %cst_117 {dimension_numbers = #tpu.dot_dimension_numbers<[1], [1], [0], [0], [0, 0, 1, 0], [], []>} : vector<16x8xf32>, vector<16x8xf32>, vector<16x16xf32> -> vector<16x16xf32>
    "tpu.trace_stop"() : () -> ()
    %cst_118 = arith.constant 0.353553385 : f32
    %169 = vector.broadcast %cst_118 : f32 to vector<16x16xf32>
    %170 = arith.mulf %168, %169 : vector<16x16xf32>
    %cst_119 = arith.constant dense<0xFF800000> : vector<16xf32>
    %171 = vector.multi_reduction <maximumf>, %170, %cst_119 [1] : vector<16x16xf32> to vector<16xf32>
    %172 = vector.shape_cast %171 : vector<16xf32> to vector<16x1xf32>
    %173 = vector.broadcast %172 : vector<16x1xf32> to vector<16x16xf32>
    %174 = arith.subf %170, %173 : vector<16x16xf32>
    %175 = math.exp %174 : vector<16x16xf32>
    %cst_120 = arith.constant dense<0.000000e+00> : vector<16xf32>
    %176 = vector.multi_reduction <add>, %175, %cst_120 [1] : vector<16x16xf32> to vector<16xf32>
    %177 = vector.shape_cast %176 : vector<16xf32> to vector<16x1xf32>
    %178 = tpu.reciprocal %177 {approx = true} : vector<16x1xf32> -> vector<16x1xf32>
    %179 = vector.broadcast %178 : vector<16x1xf32> to vector<16x16xf32>
    %180 = arith.mulf %175, %179 : vector<16x16xf32>
    %cst_121 = arith.constant dense<0.000000e+00> : vector<16x8xf32>
    %181 = tpu.matmul %180, %167, %cst_121 {dimension_numbers = #tpu.dot_dimension_numbers<[1], [0], [0], [1], [0, 0, 1, 1], [], []>} : vector<16x16xf32>, vector<16x8xf32>, vector<16x8xf32> -> vector<16x8xf32>
    %c0_122 = arith.constant 0 : index
    %c0_123 = arith.constant 0 : index
    %c0_124 = arith.constant 0 : index
    %182 = vector.load %arg17[%c0_122, %c0_123, %c0_124] : memref<4x8x32xf32, #tpu.memory_space<vmem>>, vector<1x8x32xf32>
    %183 = vector.shape_cast %182 : vector<1x8x32xf32> to vector<8x32xf32>
    %cst_125 = arith.constant dense<0.000000e+00> : vector<16x32xf32>
    %184 = tpu.matmul %181, %183, %cst_125 {dimension_numbers = #tpu.dot_dimension_numbers<[1], [0], [0], [1], [0, 0, 1, 1], [], []>} : vector<16x8xf32>, vector<8x32xf32>, vector<16x32xf32> -> vector<16x32xf32>
    %c1_126 = arith.constant 1 : index
    %c0_127 = arith.constant 0 : index
    %c0_128 = arith.constant 0 : index
    %185 = vector.load %arg14[%c1_126, %c0_127, %c0_128] : memref<4x32x8xf32, #tpu.memory_space<vmem>>, vector<1x32x8xf32>
    %186 = vector.shape_cast %185 : vector<1x32x8xf32> to vector<32x8xf32>
    %cst_129 = arith.constant dense<0.000000e+00> : vector<16x8xf32>
    %187 = tpu.matmul %158, %186, %cst_129 {dimension_numbers = #tpu.dot_dimension_numbers<[1], [0], [0], [1], [0, 0, 1, 1], [], []>} : vector<16x32xf32>, vector<32x8xf32>, vector<16x8xf32> -> vector<16x8xf32>
    %c1_130 = arith.constant 1 : index
    %c0_131 = arith.constant 0 : index
    %c0_132 = arith.constant 0 : index
    %188 = vector.load %arg15[%c1_130, %c0_131, %c0_132] : memref<4x32x8xf32, #tpu.memory_space<vmem>>, vector<1x32x8xf32>
    %189 = vector.shape_cast %188 : vector<1x32x8xf32> to vector<32x8xf32>
    %cst_133 = arith.constant dense<0.000000e+00> : vector<16x8xf32>
    %190 = tpu.matmul %158, %189, %cst_133 {dimension_numbers = #tpu.dot_dimension_numbers<[1], [0], [0], [1], [0, 0, 1, 1], [], []>} : vector<16x32xf32>, vector<32x8xf32>, vector<16x8xf32> -> vector<16x8xf32>
    %c1_134 = arith.constant 1 : index
    %c0_135 = arith.constant 0 : index
    %c0_136 = arith.constant 0 : index
    %191 = vector.load %arg16[%c1_134, %c0_135, %c0_136] : memref<4x32x8xf32, #tpu.memory_space<vmem>>, vector<1x32x8xf32>
    %192 = vector.shape_cast %191 : vector<1x32x8xf32> to vector<32x8xf32>
    %cst_137 = arith.constant dense<0.000000e+00> : vector<16x8xf32>
    %193 = tpu.matmul %158, %192, %cst_137 {dimension_numbers = #tpu.dot_dimension_numbers<[1], [0], [0], [1], [0, 0, 1, 1], [], []>} : vector<16x32xf32>, vector<32x8xf32>, vector<16x8xf32> -> vector<16x8xf32>
    "tpu.trace_start"() <{level = 10 : i32, message = "nd,md->nm"}> : () -> ()
    %cst_138 = arith.constant dense<0.000000e+00> : vector<16x16xf32>
    %194 = tpu.matmul %187, %190, %cst_138 {dimension_numbers = #tpu.dot_dimension_numbers<[1], [1], [0], [0], [0, 0, 1, 0], [], []>} : vector<16x8xf32>, vector<16x8xf32>, vector<16x16xf32> -> vector<16x16xf32>
    "tpu.trace_stop"() : () -> ()
    %cst_139 = arith.constant 0.353553385 : f32
    %195 = vector.broadcast %cst_139 : f32 to vector<16x16xf32>
    %196 = arith.mulf %194, %195 : vector<16x16xf32>
    %cst_140 = arith.constant dense<0xFF800000> : vector<16xf32>
    %197 = vector.multi_reduction <maximumf>, %196, %cst_140 [1] : vector<16x16xf32> to vector<16xf32>
    %198 = vector.shape_cast %197 : vector<16xf32> to vector<16x1xf32>
    %199 = vector.broadcast %198 : vector<16x1xf32> to vector<16x16xf32>
    %200 = arith.subf %196, %199 : vector<16x16xf32>
    %201 = math.exp %200 : vector<16x16xf32>
    %cst_141 = arith.constant dense<0.000000e+00> : vector<16xf32>
    %202 = vector.multi_reduction <add>, %201, %cst_141 [1] : vector<16x16xf32> to vector<16xf32>
    %203 = vector.shape_cast %202 : vector<16xf32> to vector<16x1xf32>
    %204 = tpu.reciprocal %203 {approx = true} : vector<16x1xf32> -> vector<16x1xf32>
    %205 = vector.broadcast %204 : vector<16x1xf32> to vector<16x16xf32>
    %206 = arith.mulf %201, %205 : vector<16x16xf32>
    %cst_142 = arith.constant dense<0.000000e+00> : vector<16x8xf32>
    %207 = tpu.matmul %206, %193, %cst_142 {dimension_numbers = #tpu.dot_dimension_numbers<[1], [0], [0], [1], [0, 0, 1, 1], [], []>} : vector<16x16xf32>, vector<16x8xf32>, vector<16x8xf32> -> vector<16x8xf32>
    %c1_143 = arith.constant 1 : index
    %c0_144 = arith.constant 0 : index
    %c0_145 = arith.constant 0 : index
    %208 = vector.load %arg17[%c1_143, %c0_144, %c0_145] : memref<4x8x32xf32, #tpu.memory_space<vmem>>, vector<1x8x32xf32>
    %209 = vector.shape_cast %208 : vector<1x8x32xf32> to vector<8x32xf32>
    %cst_146 = arith.constant dense<0.000000e+00> : vector<16x32xf32>
    %210 = tpu.matmul %207, %209, %cst_146 {dimension_numbers = #tpu.dot_dimension_numbers<[1], [0], [0], [1], [0, 0, 1, 1], [], []>} : vector<16x8xf32>, vector<8x32xf32>, vector<16x32xf32> -> vector<16x32xf32>
    %211 = arith.addf %184, %210 : vector<16x32xf32>
    %c2_147 = arith.constant 2 : index
    %c0_148 = arith.constant 0 : index
    %c0_149 = arith.constant 0 : index
    %212 = vector.load %arg14[%c2_147, %c0_148, %c0_149] : memref<4x32x8xf32, #tpu.memory_space<vmem>>, vector<1x32x8xf32>
    %213 = vector.shape_cast %212 : vector<1x32x8xf32> to vector<32x8xf32>
    %cst_150 = arith.constant dense<0.000000e+00> : vector<16x8xf32>
    %214 = tpu.matmul %158, %213, %cst_150 {dimension_numbers = #tpu.dot_dimension_numbers<[1], [0], [0], [1], [0, 0, 1, 1], [], []>} : vector<16x32xf32>, vector<32x8xf32>, vector<16x8xf32> -> vector<16x8xf32>
    %c2_151 = arith.constant 2 : index
    %c0_152 = arith.constant 0 : index
    %c0_153 = arith.constant 0 : index
    %215 = vector.load %arg15[%c2_151, %c0_152, %c0_153] : memref<4x32x8xf32, #tpu.memory_space<vmem>>, vector<1x32x8xf32>
    %216 = vector.shape_cast %215 : vector<1x32x8xf32> to vector<32x8xf32>
    %cst_154 = arith.constant dense<0.000000e+00> : vector<16x8xf32>
    %217 = tpu.matmul %158, %216, %cst_154 {dimension_numbers = #tpu.dot_dimension_numbers<[1], [0], [0], [1], [0, 0, 1, 1], [], []>} : vector<16x32xf32>, vector<32x8xf32>, vector<16x8xf32> -> vector<16x8xf32>
    %c2_155 = arith.constant 2 : index
    %c0_156 = arith.constant 0 : index
    %c0_157 = arith.constant 0 : index
    %218 = vector.load %arg16[%c2_155, %c0_156, %c0_157] : memref<4x32x8xf32, #tpu.memory_space<vmem>>, vector<1x32x8xf32>
    %219 = vector.shape_cast %218 : vector<1x32x8xf32> to vector<32x8xf32>
    %cst_158 = arith.constant dense<0.000000e+00> : vector<16x8xf32>
    %220 = tpu.matmul %158, %219, %cst_158 {dimension_numbers = #tpu.dot_dimension_numbers<[1], [0], [0], [1], [0, 0, 1, 1], [], []>} : vector<16x32xf32>, vector<32x8xf32>, vector<16x8xf32> -> vector<16x8xf32>
    "tpu.trace_start"() <{level = 10 : i32, message = "nd,md->nm"}> : () -> ()
    %cst_159 = arith.constant dense<0.000000e+00> : vector<16x16xf32>
    %221 = tpu.matmul %214, %217, %cst_159 {dimension_numbers = #tpu.dot_dimension_numbers<[1], [1], [0], [0], [0, 0, 1, 0], [], []>} : vector<16x8xf32>, vector<16x8xf32>, vector<16x16xf32> -> vector<16x16xf32>
    "tpu.trace_stop"() : () -> ()
    %cst_160 = arith.constant 0.353553385 : f32
    %222 = vector.broadcast %cst_160 : f32 to vector<16x16xf32>
    %223 = arith.mulf %221, %222 : vector<16x16xf32>
    %cst_161 = arith.constant dense<0xFF800000> : vector<16xf32>
    %224 = vector.multi_reduction <maximumf>, %223, %cst_161 [1] : vector<16x16xf32> to vector<16xf32>
    %225 = vector.shape_cast %224 : vector<16xf32> to vector<16x1xf32>
    %226 = vector.broadcast %225 : vector<16x1xf32> to vector<16x16xf32>
    %227 = arith.subf %223, %226 : vector<16x16xf32>
    %228 = math.exp %227 : vector<16x16xf32>
    %cst_162 = arith.constant dense<0.000000e+00> : vector<16xf32>
    %229 = vector.multi_reduction <add>, %228, %cst_162 [1] : vector<16x16xf32> to vector<16xf32>
    %230 = vector.shape_cast %229 : vector<16xf32> to vector<16x1xf32>
    %231 = tpu.reciprocal %230 {approx = true} : vector<16x1xf32> -> vector<16x1xf32>
    %232 = vector.broadcast %231 : vector<16x1xf32> to vector<16x16xf32>
    %233 = arith.mulf %228, %232 : vector<16x16xf32>
    %cst_163 = arith.constant dense<0.000000e+00> : vector<16x8xf32>
    %234 = tpu.matmul %233, %220, %cst_163 {dimension_numbers = #tpu.dot_dimension_numbers<[1], [0], [0], [1], [0, 0, 1, 1], [], []>} : vector<16x16xf32>, vector<16x8xf32>, vector<16x8xf32> -> vector<16x8xf32>
    %c2_164 = arith.constant 2 : index
    %c0_165 = arith.constant 0 : index
    %c0_166 = arith.constant 0 : index
    %235 = vector.load %arg17[%c2_164, %c0_165, %c0_166] : memref<4x8x32xf32, #tpu.memory_space<vmem>>, vector<1x8x32xf32>
    %236 = vector.shape_cast %235 : vector<1x8x32xf32> to vector<8x32xf32>
    %cst_167 = arith.constant dense<0.000000e+00> : vector<16x32xf32>
    %237 = tpu.matmul %234, %236, %cst_167 {dimension_numbers = #tpu.dot_dimension_numbers<[1], [0], [0], [1], [0, 0, 1, 1], [], []>} : vector<16x8xf32>, vector<8x32xf32>, vector<16x32xf32> -> vector<16x32xf32>
    %238 = arith.addf %211, %237 : vector<16x32xf32>
    %c3_168 = arith.constant 3 : index
    %c0_169 = arith.constant 0 : index
    %c0_170 = arith.constant 0 : index
    %239 = vector.load %arg14[%c3_168, %c0_169, %c0_170] : memref<4x32x8xf32, #tpu.memory_space<vmem>>, vector<1x32x8xf32>
    %240 = vector.shape_cast %239 : vector<1x32x8xf32> to vector<32x8xf32>
    %cst_171 = arith.constant dense<0.000000e+00> : vector<16x8xf32>
    %241 = tpu.matmul %158, %240, %cst_171 {dimension_numbers = #tpu.dot_dimension_numbers<[1], [0], [0], [1], [0, 0, 1, 1], [], []>} : vector<16x32xf32>, vector<32x8xf32>, vector<16x8xf32> -> vector<16x8xf32>
    %c3_172 = arith.constant 3 : index
    %c0_173 = arith.constant 0 : index
    %c0_174 = arith.constant 0 : index
    %242 = vector.load %arg15[%c3_172, %c0_173, %c0_174] : memref<4x32x8xf32, #tpu.memory_space<vmem>>, vector<1x32x8xf32>
    %243 = vector.shape_cast %242 : vector<1x32x8xf32> to vector<32x8xf32>
    %cst_175 = arith.constant dense<0.000000e+00> : vector<16x8xf32>
    %244 = tpu.matmul %158, %243, %cst_175 {dimension_numbers = #tpu.dot_dimension_numbers<[1], [0], [0], [1], [0, 0, 1, 1], [], []>} : vector<16x32xf32>, vector<32x8xf32>, vector<16x8xf32> -> vector<16x8xf32>
    %c3_176 = arith.constant 3 : index
    %c0_177 = arith.constant 0 : index
    %c0_178 = arith.constant 0 : index
    %245 = vector.load %arg16[%c3_176, %c0_177, %c0_178] : memref<4x32x8xf32, #tpu.memory_space<vmem>>, vector<1x32x8xf32>
    %246 = vector.shape_cast %245 : vector<1x32x8xf32> to vector<32x8xf32>
    %cst_179 = arith.constant dense<0.000000e+00> : vector<16x8xf32>
    %247 = tpu.matmul %158, %246, %cst_179 {dimension_numbers = #tpu.dot_dimension_numbers<[1], [0], [0], [1], [0, 0, 1, 1], [], []>} : vector<16x32xf32>, vector<32x8xf32>, vector<16x8xf32> -> vector<16x8xf32>
    "tpu.trace_start"() <{level = 10 : i32, message = "nd,md->nm"}> : () -> ()
    %cst_180 = arith.constant dense<0.000000e+00> : vector<16x16xf32>
    %248 = tpu.matmul %241, %244, %cst_180 {dimension_numbers = #tpu.dot_dimension_numbers<[1], [1], [0], [0], [0, 0, 1, 0], [], []>} : vector<16x8xf32>, vector<16x8xf32>, vector<16x16xf32> -> vector<16x16xf32>
    "tpu.trace_stop"() : () -> ()
    %cst_181 = arith.constant 0.353553385 : f32
    %249 = vector.broadcast %cst_181 : f32 to vector<16x16xf32>
    %250 = arith.mulf %248, %249 : vector<16x16xf32>
    %cst_182 = arith.constant dense<0xFF800000> : vector<16xf32>
    %251 = vector.multi_reduction <maximumf>, %250, %cst_182 [1] : vector<16x16xf32> to vector<16xf32>
    %252 = vector.shape_cast %251 : vector<16xf32> to vector<16x1xf32>
    %253 = vector.broadcast %252 : vector<16x1xf32> to vector<16x16xf32>
    %254 = arith.subf %250, %253 : vector<16x16xf32>
    %255 = math.exp %254 : vector<16x16xf32>
    %cst_183 = arith.constant dense<0.000000e+00> : vector<16xf32>
    %256 = vector.multi_reduction <add>, %255, %cst_183 [1] : vector<16x16xf32> to vector<16xf32>
    %257 = vector.shape_cast %256 : vector<16xf32> to vector<16x1xf32>
    %258 = tpu.reciprocal %257 {approx = true} : vector<16x1xf32> -> vector<16x1xf32>
    %259 = vector.broadcast %258 : vector<16x1xf32> to vector<16x16xf32>
    %260 = arith.mulf %255, %259 : vector<16x16xf32>
    %cst_184 = arith.constant dense<0.000000e+00> : vector<16x8xf32>
    %261 = tpu.matmul %260, %247, %cst_184 {dimension_numbers = #tpu.dot_dimension_numbers<[1], [0], [0], [1], [0, 0, 1, 1], [], []>} : vector<16x16xf32>, vector<16x8xf32>, vector<16x8xf32> -> vector<16x8xf32>
    %c3_185 = arith.constant 3 : index
    %c0_186 = arith.constant 0 : index
    %c0_187 = arith.constant 0 : index
    %262 = vector.load %arg17[%c3_185, %c0_186, %c0_187] : memref<4x8x32xf32, #tpu.memory_space<vmem>>, vector<1x8x32xf32>
    %263 = vector.shape_cast %262 : vector<1x8x32xf32> to vector<8x32xf32>
    %cst_188 = arith.constant dense<0.000000e+00> : vector<16x32xf32>
    %264 = tpu.matmul %261, %263, %cst_188 {dimension_numbers = #tpu.dot_dimension_numbers<[1], [0], [0], [1], [0, 0, 1, 1], [], []>} : vector<16x8xf32>, vector<8x32xf32>, vector<16x32xf32> -> vector<16x32xf32>
    %265 = arith.addf %238, %264 : vector<16x32xf32>
    %c0_189 = arith.constant 0 : index
    %c0_190 = arith.constant 0 : index
    %266 = vector.load %arg18[%c0_189, %c0_190] : memref<1x32xf32, #tpu.memory_space<vmem>>, vector<1x32xf32>
    %267 = vector.broadcast %266 : vector<1x32xf32> to vector<16x32xf32>
    %268 = arith.addf %265, %267 : vector<16x32xf32>
    %269 = arith.addf %136, %268 : vector<16x32xf32>
    %c0_191 = arith.constant 0 : index
    %c0_192 = arith.constant 0 : index
    %270 = vector.load %arg7[%c0_191, %c0_192] : memref<1x32xf32, #tpu.memory_space<vmem>>, vector<1x32xf32>
    %c0_193 = arith.constant 0 : index
    %c0_194 = arith.constant 0 : index
    %271 = vector.load %arg8[%c0_193, %c0_194] : memref<1x32xf32, #tpu.memory_space<vmem>>, vector<1x32xf32>
    %cst_195 = arith.constant dense<0.000000e+00> : vector<16xf32>
    %272 = vector.multi_reduction <add>, %269, %cst_195 [1] : vector<16x32xf32> to vector<16xf32>
    %273 = vector.shape_cast %272 : vector<16xf32> to vector<16x1xf32>
    %cst_196 = arith.constant 3.200000e+01 : f32
    %274 = vector.broadcast %cst_196 : f32 to vector<16x1xf32>
    %275 = arith.divf %273, %274 : vector<16x1xf32>
    %276 = vector.broadcast %275 : vector<16x1xf32> to vector<16x32xf32>
    %277 = arith.subf %269, %276 : vector<16x32xf32>
    %278 = arith.mulf %277, %277 : vector<16x32xf32>
    %cst_197 = arith.constant dense<0.000000e+00> : vector<16xf32>
    %279 = vector.multi_reduction <add>, %278, %cst_197 [1] : vector<16x32xf32> to vector<16xf32>
    %280 = vector.shape_cast %279 : vector<16xf32> to vector<16x1xf32>
    %cst_198 = arith.constant 3.200000e+01 : f32
    %281 = vector.broadcast %cst_198 : f32 to vector<16x1xf32>
    %282 = arith.divf %280, %281 : vector<16x1xf32>
    %cst_199 = arith.constant 9.99999974E-6 : f32
    %283 = vector.broadcast %cst_199 : f32 to vector<16x1xf32>
    %284 = arith.addf %282, %283 : vector<16x1xf32>
    %285 = math.rsqrt %284 : vector<16x1xf32>
    %286 = vector.broadcast %285 : vector<16x1xf32> to vector<16x32xf32>
    %287 = arith.mulf %277, %286 : vector<16x32xf32>
    %288 = vector.broadcast %270 : vector<1x32xf32> to vector<16x32xf32>
    %289 = arith.mulf %287, %288 : vector<16x32xf32>
    %290 = vector.broadcast %271 : vector<1x32xf32> to vector<16x32xf32>
    %291 = arith.addf %289, %290 : vector<16x32xf32>
    %c0_200 = arith.constant 0 : index
    %c0_201 = arith.constant 0 : index
    %292 = vector.load %arg19[%c0_200, %c0_201] : memref<32x128xf32, #tpu.memory_space<vmem>>, vector<32x128xf32>
    %cst_202 = arith.constant dense<0.000000e+00> : vector<16x128xf32>
    %293 = tpu.matmul %291, %292, %cst_202 {dimension_numbers = #tpu.dot_dimension_numbers<[1], [0], [0], [1], [0, 0, 1, 1], [], []>} : vector<16x32xf32>, vector<32x128xf32>, vector<16x128xf32> -> vector<16x128xf32>
    %c0_203 = arith.constant 0 : index
    %c0_204 = arith.constant 0 : index
    %294 = vector.load %arg20[%c0_203, %c0_204] : memref<1x128xf32, #tpu.memory_space<vmem>>, vector<1x128xf32>
    %295 = vector.broadcast %294 : vector<1x128xf32> to vector<16x128xf32>
    %296 = arith.addf %293, %295 : vector<16x128xf32>
    %cst_205 = arith.constant 5.000000e-01 : f32
    %297 = vector.broadcast %cst_205 : f32 to vector<16x128xf32>
    %298 = arith.mulf %297, %296 : vector<16x128xf32>
    %cst_206 = arith.constant 0.707106769 : f32
    %299 = vector.broadcast %cst_206 : f32 to vector<16x128xf32>
    %300 = arith.mulf %296, %299 : vector<16x128xf32>
    %301 = math.erf %300 : vector<16x128xf32>
    %cst_207 = arith.constant 1.000000e+00 : f32
    %302 = vector.broadcast %cst_207 : f32 to vector<16x128xf32>
    %303 = arith.addf %302, %301 : vector<16x128xf32>
    %304 = arith.mulf %298, %303 : vector<16x128xf32>
    %c0_208 = arith.constant 0 : index
    %c0_209 = arith.constant 0 : index
    %305 = vector.load %arg21[%c0_208, %c0_209] : memref<128x32xf32, #tpu.memory_space<vmem>>, vector<128x32xf32>
    %cst_210 = arith.constant dense<0.000000e+00> : vector<16x32xf32>
    %306 = tpu.matmul %304, %305, %cst_210 {dimension_numbers = #tpu.dot_dimension_numbers<[1], [0], [0], [1], [0, 0, 1, 1], [], []>} : vector<16x128xf32>, vector<128x32xf32>, vector<16x32xf32> -> vector<16x32xf32>
    %c0_211 = arith.constant 0 : index
    %c0_212 = arith.constant 0 : index
    %307 = vector.load %arg22[%c0_211, %c0_212] : memref<1x32xf32, #tpu.memory_space<vmem>>, vector<1x32xf32>
    %308 = vector.broadcast %307 : vector<1x32xf32> to vector<16x32xf32>
    %309 = arith.addf %306, %308 : vector<16x32xf32>
    %310 = arith.addf %269, %309 : vector<16x32xf32>
    %c0_213 = arith.constant 0 : index
    %c0_214 = arith.constant 0 : index
    %c0_215 = arith.constant 0 : index
    %311 = vector.load %arg23[%c0_213, %c0_214, %c0_215] : memref<1x16x32xf32, #tpu.memory_space<vmem>>, vector<1x16x32xf32>
    %312 = vector.shape_cast %311 : vector<1x16x32xf32> to vector<16x32xf32>
    %313 = vector.shape_cast %310 : vector<16x32xf32> to vector<1x16x32xf32>
    tpu.vector_store %arg23[%c0_213, %c0_214, %c0_215], %313 {strides = array<i32>} : memref<1x16x32xf32, #tpu.memory_space<vmem>>, vector<1x16x32xf32>,
    return
  }
  func.func @transform_0(%arg0: i32) -> (i32, i32, i32) {
    %c0_i32 = arith.constant 0 : i32
    %c0_i32_0 = arith.constant 0 : i32
    %c0_i32_1 = arith.constant 0 : i32
    return %arg0, %c0_i32, %c0_i32_0 : i32, i32, i32
  }
  func.func @transform_1(%arg0: i32) -> (i32, i32, i32) {
    %c0_i32 = arith.constant 0 : i32
    %c0_i32_0 = arith.constant 0 : i32
    %c0_i32_1 = arith.constant 0 : i32
    return %arg0, %c0_i32, %c0_i32_0 : i32, i32, i32
  }
  func.func @transform_2(%arg0: i32) -> (i32, i32) {
    %c0_i32 = arith.constant 0 : i32
    %c0_i32_0 = arith.constant 0 : i32
    %c0_i32_1 = arith.constant 0 : i32
    return %c0_i32, %c0_i32_0 : i32, i32
  }
  func.func @transform_3(%arg0: i32) -> (i32, i32) {
    %c0_i32 = arith.constant 0 : i32
    %c0_i32_0 = arith.constant 0 : i32
    %c0_i32_1 = arith.constant 0 : i32
    return %c0_i32, %c0_i32_0 : i32, i32
  }
  func.func @transform_4(%arg0: i32) -> (i32, i32) {
    %c0_i32 = arith.constant 0 : i32
    %c0_i32_0 = arith.constant 0 : i32
    %c0_i32_1 = arith.constant 0 : i32
    return %c0_i32, %c0_i32_0 : i32, i32
  }
  func.func @transform_5(%arg0: i32) -> (i32, i32) {
    %c0_i32 = arith.constant 0 : i32
    %c0_i32_0 = arith.constant 0 : i32
    %c0_i32_1 = arith.constant 0 : i32
    return %c0_i32, %c0_i32_0 : i32, i32
  }
  func.func @transform_6(%arg0: i32) -> (i32, i32) {
    %c0_i32 = arith.constant 0 : i32
    %c0_i32_0 = arith.constant 0 : i32
    %c0_i32_1 = arith.constant 0 : i32
    return %c0_i32, %c0_i32_0 : i32, i32
  }
  func.func @transform_7(%arg0: i32) -> (i32, i32) {
    %c0_i32 = arith.constant 0 : i32
    %c0_i32_0 = arith.constant 0 : i32
    %c0_i32_1 = arith.constant 0 : i32
    return %c0_i32, %c0_i32_0 : i32, i32
  }
  func.func @transform_8(%arg0: i32) -> (i32, i32, i32) {
    %c0_i32 = arith.constant 0 : i32
    %c0_i32_0 = arith.constant 0 : i32
    %c0_i32_1 = arith.constant 0 : i32
    %c0_i32_2 = arith.constant 0 : i32
    return %c0_i32, %c0_i32_0, %c0_i32_1 : i32, i32, i32
  }
  func.func @transform_9(%arg0: i32) -> (i32, i32, i32) {
    %c0_i32 = arith.constant 0 : i32
    %c0_i32_0 = arith.constant 0 : i32
    %c0_i32_1 = arith.constant 0 : i32
    %c0_i32_2 = arith.constant 0 : i32
    return %c0_i32, %c0_i32_0, %c0_i32_1 : i32, i32, i32
  }
  func.func @transform_10(%arg0: i32) -> (i32, i32, i32) {
    %c0_i32 = arith.constant 0 : i32
    %c0_i32_0 = arith.constant 0 : i32
    %c0_i32_1 = arith.constant 0 : i32
    %c0_i32_2 = arith.constant 0 : i32
    return %c0_i32, %c0_i32_0, %c0_i32_1 : i32, i32, i32
  }
  func.func @transform_11(%arg0: i32) -> (i32, i32, i32) {
    %c0_i32 = arith.constant 0 : i32
    %c0_i32_0 = arith.constant 0 : i32
    %c0_i32_1 = arith.constant 0 : i32
    %c0_i32_2 = arith.constant 0 : i32
    return %c0_i32, %c0_i32_0, %c0_i32_1 : i32, i32, i32
  }
  func.func @transform_12(%arg0: i32) -> (i32, i32) {
    %c0_i32 = arith.constant 0 : i32
    %c0_i32_0 = arith.constant 0 : i32
    %c0_i32_1 = arith.constant 0 : i32
    return %c0_i32, %c0_i32_0 : i32, i32
  }
  func.func @transform_13(%arg0: i32) -> (i32, i32, i32) {
    %c0_i32 = arith.constant 0 : i32
    %c0_i32_0 = arith.constant 0 : i32
    %c0_i32_1 = arith.constant 0 : i32
    %c0_i32_2 = arith.constant 0 : i32
    return %c0_i32, %c0_i32_0, %c0_i32_1 : i32, i32, i32
  }
  func.func @transform_14(%arg0: i32) -> (i32, i32, i32) {
    %c0_i32 = arith.constant 0 : i32
    %c0_i32_0 = arith.constant 0 : i32
    %c0_i32_1 = arith.constant 0 : i32
    %c0_i32_2 = arith.constant 0 : i32
    return %c0_i32, %c0_i32_0, %c0_i32_1 : i32, i32, i32
  }
  func.func @transform_15(%arg0: i32) -> (i32, i32, i32) {
    %c0_i32 = arith.constant 0 : i32
    %c0_i32_0 = arith.constant 0 : i32
    %c0_i32_1 = arith.constant 0 : i32
    %c0_i32_2 = arith.constant 0 : i32
    return %c0_i32, %c0_i32_0, %c0_i32_1 : i32, i32, i32
  }
  func.func @transform_16(%arg0: i32) -> (i32, i32, i32) {
    %c0_i32 = arith.constant 0 : i32
    %c0_i32_0 = arith.constant 0 : i32
    %c0_i32_1 = arith.constant 0 : i32
    %c0_i32_2 = arith.constant 0 : i32
    return %c0_i32, %c0_i32_0, %c0_i32_1 : i32, i32, i32
  }
  func.func @transform_17(%arg0: i32) -> (i32, i32) {
    %c0_i32 = arith.constant 0 : i32
    %c0_i32_0 = arith.constant 0 : i32
    %c0_i32_1 = arith.constant 0 : i32
    return %c0_i32, %c0_i32_0 : i32, i32
  }
  func.func @transform_18(%arg0: i32) -> (i32, i32) {
    %c0_i32 = arith.constant 0 : i32
    %c0_i32_0 = arith.constant 0 : i32
    %c0_i32_1 = arith.constant 0 : i32
    return %c0_i32, %c0_i32_0 : i32, i32
  }
  func.func @transform_19(%arg0: i32) -> (i32, i32) {
    %c0_i32 = arith.constant 0 : i32
    %c0_i32_0 = arith.constant 0 : i32
    %c0_i32_1 = arith.constant 0 : i32
    return %c0_i32, %c0_i32_0 : i32, i32
  }
  func.func @transform_20(%arg0: i32) -> (i32, i32) {
    %c0_i32 = arith.constant 0 : i32
    %c0_i32_0 = arith.constant 0 : i32
    %c0_i32_1 = arith.constant 0 : i32
    return %c0_i32, %c0_i32_0 : i32, i32
  }
  func.func @transform_21(%arg0: i32) -> (i32, i32) {
    %c0_i32 = arith.constant 0 : i32
    %c0_i32_0 = arith.constant 0 : i32
    %c0_i32_1 = arith.constant 0 : i32
    return %c0_i32, %c0_i32_0 : i32, i32
  }
  func.func @transform_22(%arg0: i32) -> (i32, i32, i32) {
    %c0_i32 = arith.constant 0 : i32
    %c0_i32_0 = arith.constant 0 : i32
    %c0_i32_1 = arith.constant 0 : i32
    return %arg0, %c0_i32, %c0_i32_0 : i32, i32, i32
  }
}

module attributes {stable_mosaic.version = 11 : i64} {
  func.func @_ln_linear_kernel(%arg0: i32, %arg1: memref<16x32xf32, #tpu.memory_space<vmem>>, %arg2: memref<1x32xf32, #tpu.memory_space<vmem>>, %arg3: memref<1x32xf32, #tpu.memory_space<vmem>>, %arg4: memref<32x48xf32, #tpu.memory_space<vmem>>, %arg5: memref<1x48xf32, #tpu.memory_space<vmem>>, %arg6: memref<16x48xf32, #tpu.memory_space<vmem>>) attributes {dimension_semantics = [#tpu.dimension_semantics<parallel>], iteration_bounds = array<i64: 1>, scalar_prefetch = 0 : i64, scratch_operands = 0 : i64, tpu.core_type = #tpu.core_type<tc>, window_params = [{transform_indices = @transform_0, window_bounds = array<i64: 16, 32>}, {pipeline_mode = #tpu.pipeline_mode<synchronous>, transform_indices = @transform_1, window_bounds = array<i64: 1, 32>}, {pipeline_mode = #tpu.pipeline_mode<synchronous>, transform_indices = @transform_2, window_bounds = array<i64: 1, 32>}, {pipeline_mode = #tpu.pipeline_mode<synchronous>, transform_indices = @transform_3, window_bounds = array<i64: 32, 48>}, {pipeline_mode = #tpu.pipeline_mode<synchronous>, transform_indices = @transform_4, window_bounds = array<i64: 1, 48>}, {transform_indices = @transform_5, window_bounds = array<i64: 16, 48>}]} {
    %c0 = arith.constant 0 : index
    %c0_0 = arith.constant 0 : index
    %0 = vector.load %arg1[%c0, %c0_0] : memref<16x32xf32, #tpu.memory_space<vmem>>, vector<16x32xf32>
    %c0_1 = arith.constant 0 : index
    %c0_2 = arith.constant 0 : index
    %1 = vector.load %arg2[%c0_1, %c0_2] : memref<1x32xf32, #tpu.memory_space<vmem>>, vector<1x32xf32>
    %c0_3 = arith.constant 0 : index
    %c0_4 = arith.constant 0 : index
    %2 = vector.load %arg3[%c0_3, %c0_4] : memref<1x32xf32, #tpu.memory_space<vmem>>, vector<1x32xf32>
    %cst = arith.constant dense<0.000000e+00> : vector<16xf32>
    %3 = vector.multi_reduction <add>, %0, %cst [1] : vector<16x32xf32> to vector<16xf32>
    %4 = vector.shape_cast %3 : vector<16xf32> to vector<16x1xf32>
    %cst_5 = arith.constant 3.200000e+01 : f32
    %5 = vector.broadcast %cst_5 : f32 to vector<16x1xf32>
    %6 = arith.divf %4, %5 : vector<16x1xf32>
    %7 = vector.broadcast %6 : vector<16x1xf32> to vector<16x32xf32>
    %8 = arith.subf %0, %7 : vector<16x32xf32>
    %9 = arith.mulf %8, %8 : vector<16x32xf32>
    %cst_6 = arith.constant dense<0.000000e+00> : vector<16xf32>
    %10 = vector.multi_reduction <add>, %9, %cst_6 [1] : vector<16x32xf32> to vector<16xf32>
    %11 = vector.shape_cast %10 : vector<16xf32> to vector<16x1xf32>
    %cst_7 = arith.constant 3.200000e+01 : f32
    %12 = vector.broadcast %cst_7 : f32 to vector<16x1xf32>
    %13 = arith.divf %11, %12 : vector<16x1xf32>
    %cst_8 = arith.constant 9.99999974E-6 : f32
    %14 = vector.broadcast %cst_8 : f32 to vector<16x1xf32>
    %15 = arith.addf %13, %14 : vector<16x1xf32>
    %16 = math.rsqrt %15 : vector<16x1xf32>
    %17 = vector.broadcast %16 : vector<16x1xf32> to vector<16x32xf32>
    %18 = arith.mulf %8, %17 : vector<16x32xf32>
    %19 = vector.broadcast %1 : vector<1x32xf32> to vector<16x32xf32>
    %20 = arith.mulf %18, %19 : vector<16x32xf32>
    %21 = vector.broadcast %2 : vector<1x32xf32> to vector<16x32xf32>
    %22 = arith.addf %20, %21 : vector<16x32xf32>
    %c0_9 = arith.constant 0 : index
    %c0_10 = arith.constant 0 : index
    %23 = vector.load %arg4[%c0_9, %c0_10] : memref<32x48xf32, #tpu.memory_space<vmem>>, vector<32x48xf32>
    %cst_11 = arith.constant dense<0.000000e+00> : vector<16x48xf32>
    %24 = tpu.matmul %22, %23, %cst_11 {dimension_numbers = #tpu.dot_dimension_numbers<[1], [0], [0], [1], [0, 0, 1, 1], [], []>} : vector<16x32xf32>, vector<32x48xf32>, vector<16x48xf32> -> vector<16x48xf32>
    %c0_12 = arith.constant 0 : index
    %c0_13 = arith.constant 0 : index
    %25 = vector.load %arg5[%c0_12, %c0_13] : memref<1x48xf32, #tpu.memory_space<vmem>>, vector<1x48xf32>
    %26 = vector.broadcast %25 : vector<1x48xf32> to vector<16x48xf32>
    %27 = arith.addf %24, %26 : vector<16x48xf32>
    %c0_14 = arith.constant 0 : index
    %c0_15 = arith.constant 0 : index
    %28 = vector.load %arg6[%c0_14, %c0_15] : memref<16x48xf32, #tpu.memory_space<vmem>>, vector<16x48xf32>
    tpu.vector_store %arg6[%c0_14, %c0_15], %27 {strides = array<i32>} : memref<16x48xf32, #tpu.memory_space<vmem>>, vector<16x48xf32>,
    return
  }
  func.func @transform_0(%arg0: i32) -> (i32, i32) {
    %c0_i32 = arith.constant 0 : i32
    %c0_i32_0 = arith.constant 0 : i32
    return %arg0, %c0_i32 : i32, i32
  }
  func.func @transform_1(%arg0: i32) -> (i32, i32) {
    %c0_i32 = arith.constant 0 : i32
    %c0_i32_0 = arith.constant 0 : i32
    %c0_i32_1 = arith.constant 0 : i32
    return %c0_i32, %c0_i32_0 : i32, i32
  }
  func.func @transform_2(%arg0: i32) -> (i32, i32) {
    %c0_i32 = arith.constant 0 : i32
    %c0_i32_0 = arith.constant 0 : i32
    %c0_i32_1 = arith.constant 0 : i32
    return %c0_i32, %c0_i32_0 : i32, i32
  }
  func.func @transform_3(%arg0: i32) -> (i32, i32) {
    %c0_i32 = arith.constant 0 : i32
    %c0_i32_0 = arith.constant 0 : i32
    %c0_i32_1 = arith.constant 0 : i32
    return %c0_i32, %c0_i32_0 : i32, i32
  }
  func.func @transform_4(%arg0: i32) -> (i32, i32) {
    %c0_i32 = arith.constant 0 : i32
    %c0_i32_0 = arith.constant 0 : i32
    %c0_i32_1 = arith.constant 0 : i32
    return %c0_i32, %c0_i32_0 : i32, i32
  }
  func.func @transform_5(%arg0: i32) -> (i32, i32) {
    %c0_i32 = arith.constant 0 : i32
    %c0_i32_0 = arith.constant 0 : i32
    return %arg0, %c0_i32 : i32, i32
  }
}

module attributes {stable_mosaic.version = 11 : i64} {
  func.func @_ln_linear_kernel(%arg0: i32, %arg1: memref<8x32xf32, #tpu.memory_space<vmem>>, %arg2: memref<1x32xf32, #tpu.memory_space<vmem>>, %arg3: memref<1x32xf32, #tpu.memory_space<vmem>>, %arg4: memref<32x48xf32, #tpu.memory_space<vmem>>, %arg5: memref<1x48xf32, #tpu.memory_space<vmem>>, %arg6: memref<8x48xf32, #tpu.memory_space<vmem>>) attributes {dimension_semantics = [#tpu.dimension_semantics<parallel>], iteration_bounds = array<i64: 1>, scalar_prefetch = 0 : i64, scratch_operands = 0 : i64, tpu.core_type = #tpu.core_type<tc>, window_params = [{transform_indices = @transform_0, window_bounds = array<i64: 8, 32>}, {pipeline_mode = #tpu.pipeline_mode<synchronous>, transform_indices = @transform_1, window_bounds = array<i64: 1, 32>}, {pipeline_mode = #tpu.pipeline_mode<synchronous>, transform_indices = @transform_2, window_bounds = array<i64: 1, 32>}, {pipeline_mode = #tpu.pipeline_mode<synchronous>, transform_indices = @transform_3, window_bounds = array<i64: 32, 48>}, {pipeline_mode = #tpu.pipeline_mode<synchronous>, transform_indices = @transform_4, window_bounds = array<i64: 1, 48>}, {transform_indices = @transform_5, window_bounds = array<i64: 8, 48>}]} {
    %c0 = arith.constant 0 : index
    %c0_0 = arith.constant 0 : index
    %0 = vector.load %arg1[%c0, %c0_0] : memref<8x32xf32, #tpu.memory_space<vmem>>, vector<8x32xf32>
    %c0_1 = arith.constant 0 : index
    %c0_2 = arith.constant 0 : index
    %1 = vector.load %arg2[%c0_1, %c0_2] : memref<1x32xf32, #tpu.memory_space<vmem>>, vector<1x32xf32>
    %c0_3 = arith.constant 0 : index
    %c0_4 = arith.constant 0 : index
    %2 = vector.load %arg3[%c0_3, %c0_4] : memref<1x32xf32, #tpu.memory_space<vmem>>, vector<1x32xf32>
    %cst = arith.constant dense<0.000000e+00> : vector<8xf32>
    %3 = vector.multi_reduction <add>, %0, %cst [1] : vector<8x32xf32> to vector<8xf32>
    %4 = vector.shape_cast %3 : vector<8xf32> to vector<8x1xf32>
    %cst_5 = arith.constant 3.200000e+01 : f32
    %5 = vector.broadcast %cst_5 : f32 to vector<8x1xf32>
    %6 = arith.divf %4, %5 : vector<8x1xf32>
    %7 = vector.broadcast %6 : vector<8x1xf32> to vector<8x32xf32>
    %8 = arith.subf %0, %7 : vector<8x32xf32>
    %9 = arith.mulf %8, %8 : vector<8x32xf32>
    %cst_6 = arith.constant dense<0.000000e+00> : vector<8xf32>
    %10 = vector.multi_reduction <add>, %9, %cst_6 [1] : vector<8x32xf32> to vector<8xf32>
    %11 = vector.shape_cast %10 : vector<8xf32> to vector<8x1xf32>
    %cst_7 = arith.constant 3.200000e+01 : f32
    %12 = vector.broadcast %cst_7 : f32 to vector<8x1xf32>
    %13 = arith.divf %11, %12 : vector<8x1xf32>
    %cst_8 = arith.constant 9.99999974E-6 : f32
    %14 = vector.broadcast %cst_8 : f32 to vector<8x1xf32>
    %15 = arith.addf %13, %14 : vector<8x1xf32>
    %16 = math.rsqrt %15 : vector<8x1xf32>
    %17 = vector.broadcast %16 : vector<8x1xf32> to vector<8x32xf32>
    %18 = arith.mulf %8, %17 : vector<8x32xf32>
    %19 = vector.broadcast %1 : vector<1x32xf32> to vector<8x32xf32>
    %20 = arith.mulf %18, %19 : vector<8x32xf32>
    %21 = vector.broadcast %2 : vector<1x32xf32> to vector<8x32xf32>
    %22 = arith.addf %20, %21 : vector<8x32xf32>
    %c0_9 = arith.constant 0 : index
    %c0_10 = arith.constant 0 : index
    %23 = vector.load %arg4[%c0_9, %c0_10] : memref<32x48xf32, #tpu.memory_space<vmem>>, vector<32x48xf32>
    %cst_11 = arith.constant dense<0.000000e+00> : vector<8x48xf32>
    %24 = tpu.matmul %22, %23, %cst_11 {dimension_numbers = #tpu.dot_dimension_numbers<[1], [0], [0], [1], [0, 0, 1, 1], [], []>} : vector<8x32xf32>, vector<32x48xf32>, vector<8x48xf32> -> vector<8x48xf32>
    %c0_12 = arith.constant 0 : index
    %c0_13 = arith.constant 0 : index
    %25 = vector.load %arg5[%c0_12, %c0_13] : memref<1x48xf32, #tpu.memory_space<vmem>>, vector<1x48xf32>
    %26 = vector.broadcast %25 : vector<1x48xf32> to vector<8x48xf32>
    %27 = arith.addf %24, %26 : vector<8x48xf32>
    %c0_14 = arith.constant 0 : index
    %c0_15 = arith.constant 0 : index
    %28 = vector.load %arg6[%c0_14, %c0_15] : memref<8x48xf32, #tpu.memory_space<vmem>>, vector<8x48xf32>
    tpu.vector_store %arg6[%c0_14, %c0_15], %27 {strides = array<i32>} : memref<8x48xf32, #tpu.memory_space<vmem>>, vector<8x48xf32>,
    return
  }
  func.func @transform_0(%arg0: i32) -> (i32, i32) {
    %c0_i32 = arith.constant 0 : i32
    %c0_i32_0 = arith.constant 0 : i32
    return %arg0, %c0_i32 : i32, i32
  }
  func.func @transform_1(%arg0: i32) -> (i32, i32) {
    %c0_i32 = arith.constant 0 : i32
    %c0_i32_0 = arith.constant 0 : i32
    %c0_i32_1 = arith.constant 0 : i32
    return %c0_i32, %c0_i32_0 : i32, i32
  }
  func.func @transform_2(%arg0: i32) -> (i32, i32) {
    %c0_i32 = arith.constant 0 : i32
    %c0_i32_0 = arith.constant 0 : i32
    %c0_i32_1 = arith.constant 0 : i32
    return %c0_i32, %c0_i32_0 : i32, i32
  }
  func.func @transform_3(%arg0: i32) -> (i32, i32) {
    %c0_i32 = arith.constant 0 : i32
    %c0_i32_0 = arith.constant 0 : i32
    %c0_i32_1 = arith.constant 0 : i32
    return %c0_i32, %c0_i32_0 : i32, i32
  }
  func.func @transform_4(%arg0: i32) -> (i32, i32) {
    %c0_i32 = arith.constant 0 : i32
    %c0_i32_0 = arith.constant 0 : i32
    %c0_i32_1 = arith.constant 0 : i32
    return %c0_i32, %c0_i32_0 : i32, i32
  }
  func.func @transform_5(%arg0: i32) -> (i32, i32) {
    %c0_i32 = arith.constant 0 : i32
    %c0_i32_0 = arith.constant 0 : i32
    return %arg0, %c0_i32 : i32, i32
  }
}

module attributes {stable_mosaic.version = 11 : i64} {
  func.func @_ln_linear_kernel(%arg0: i32, %arg1: memref<4x32xf32, #tpu.memory_space<vmem>>, %arg2: memref<1x32xf32, #tpu.memory_space<vmem>>, %arg3: memref<1x32xf32, #tpu.memory_space<vmem>>, %arg4: memref<32x48xf32, #tpu.memory_space<vmem>>, %arg5: memref<1x48xf32, #tpu.memory_space<vmem>>, %arg6: memref<4x48xf32, #tpu.memory_space<vmem>>) attributes {dimension_semantics = [#tpu.dimension_semantics<parallel>], iteration_bounds = array<i64: 1>, scalar_prefetch = 0 : i64, scratch_operands = 0 : i64, tpu.core_type = #tpu.core_type<tc>, window_params = [{transform_indices = @transform_0, window_bounds = array<i64: 4, 32>}, {pipeline_mode = #tpu.pipeline_mode<synchronous>, transform_indices = @transform_1, window_bounds = array<i64: 1, 32>}, {pipeline_mode = #tpu.pipeline_mode<synchronous>, transform_indices = @transform_2, window_bounds = array<i64: 1, 32>}, {pipeline_mode = #tpu.pipeline_mode<synchronous>, transform_indices = @transform_3, window_bounds = array<i64: 32, 48>}, {pipeline_mode = #tpu.pipeline_mode<synchronous>, transform_indices = @transform_4, window_bounds = array<i64: 1, 48>}, {transform_indices = @transform_5, window_bounds = array<i64: 4, 48>}]} {
    %c0 = arith.constant 0 : index
    %c0_0 = arith.constant 0 : index
    %0 = vector.load %arg1[%c0, %c0_0] : memref<4x32xf32, #tpu.memory_space<vmem>>, vector<4x32xf32>
    %c0_1 = arith.constant 0 : index
    %c0_2 = arith.constant 0 : index
    %1 = vector.load %arg2[%c0_1, %c0_2] : memref<1x32xf32, #tpu.memory_space<vmem>>, vector<1x32xf32>
    %c0_3 = arith.constant 0 : index
    %c0_4 = arith.constant 0 : index
    %2 = vector.load %arg3[%c0_3, %c0_4] : memref<1x32xf32, #tpu.memory_space<vmem>>, vector<1x32xf32>
    %cst = arith.constant dense<0.000000e+00> : vector<4xf32>
    %3 = vector.multi_reduction <add>, %0, %cst [1] : vector<4x32xf32> to vector<4xf32>
    %4 = vector.shape_cast %3 : vector<4xf32> to vector<4x1xf32>
    %cst_5 = arith.constant 3.200000e+01 : f32
    %5 = vector.broadcast %cst_5 : f32 to vector<4x1xf32>
    %6 = arith.divf %4, %5 : vector<4x1xf32>
    %7 = vector.broadcast %6 : vector<4x1xf32> to vector<4x32xf32>
    %8 = arith.subf %0, %7 : vector<4x32xf32>
    %9 = arith.mulf %8, %8 : vector<4x32xf32>
    %cst_6 = arith.constant dense<0.000000e+00> : vector<4xf32>
    %10 = vector.multi_reduction <add>, %9, %cst_6 [1] : vector<4x32xf32> to vector<4xf32>
    %11 = vector.shape_cast %10 : vector<4xf32> to vector<4x1xf32>
    %cst_7 = arith.constant 3.200000e+01 : f32
    %12 = vector.broadcast %cst_7 : f32 to vector<4x1xf32>
    %13 = arith.divf %11, %12 : vector<4x1xf32>
    %cst_8 = arith.constant 9.99999974E-6 : f32
    %14 = vector.broadcast %cst_8 : f32 to vector<4x1xf32>
    %15 = arith.addf %13, %14 : vector<4x1xf32>
    %16 = math.rsqrt %15 : vector<4x1xf32>
    %17 = vector.broadcast %16 : vector<4x1xf32> to vector<4x32xf32>
    %18 = arith.mulf %8, %17 : vector<4x32xf32>
    %19 = vector.broadcast %1 : vector<1x32xf32> to vector<4x32xf32>
    %20 = arith.mulf %18, %19 : vector<4x32xf32>
    %21 = vector.broadcast %2 : vector<1x32xf32> to vector<4x32xf32>
    %22 = arith.addf %20, %21 : vector<4x32xf32>
    %c0_9 = arith.constant 0 : index
    %c0_10 = arith.constant 0 : index
    %23 = vector.load %arg4[%c0_9, %c0_10] : memref<32x48xf32, #tpu.memory_space<vmem>>, vector<32x48xf32>
    %cst_11 = arith.constant dense<0.000000e+00> : vector<4x48xf32>
    %24 = tpu.matmul %22, %23, %cst_11 {dimension_numbers = #tpu.dot_dimension_numbers<[1], [0], [0], [1], [0, 0, 1, 1], [], []>} : vector<4x32xf32>, vector<32x48xf32>, vector<4x48xf32> -> vector<4x48xf32>
    %c0_12 = arith.constant 0 : index
    %c0_13 = arith.constant 0 : index
    %25 = vector.load %arg5[%c0_12, %c0_13] : memref<1x48xf32, #tpu.memory_space<vmem>>, vector<1x48xf32>
    %26 = vector.broadcast %25 : vector<1x48xf32> to vector<4x48xf32>
    %27 = arith.addf %24, %26 : vector<4x48xf32>
    %c0_14 = arith.constant 0 : index
    %c0_15 = arith.constant 0 : index
    %28 = vector.load %arg6[%c0_14, %c0_15] : memref<4x48xf32, #tpu.memory_space<vmem>>, vector<4x48xf32>
    tpu.vector_store %arg6[%c0_14, %c0_15], %27 {strides = array<i32>} : memref<4x48xf32, #tpu.memory_space<vmem>>, vector<4x48xf32>,
    return
  }
  func.func @transform_0(%arg0: i32) -> (i32, i32) {
    %c0_i32 = arith.constant 0 : i32
    %c0_i32_0 = arith.constant 0 : i32
    return %arg0, %c0_i32 : i32, i32
  }
  func.func @transform_1(%arg0: i32) -> (i32, i32) {
    %c0_i32 = arith.constant 0 : i32
    %c0_i32_0 = arith.constant 0 : i32
    %c0_i32_1 = arith.constant 0 : i32
    return %c0_i32, %c0_i32_0 : i32, i32
  }
  func.func @transform_2(%arg0: i32) -> (i32, i32) {
    %c0_i32 = arith.constant 0 : i32
    %c0_i32_0 = arith.constant 0 : i32
    %c0_i32_1 = arith.constant 0 : i32
    return %c0_i32, %c0_i32_0 : i32, i32
  }
  func.func @transform_3(%arg0: i32) -> (i32, i32) {
    %c0_i32 = arith.constant 0 : i32
    %c0_i32_0 = arith.constant 0 : i32
    %c0_i32_1 = arith.constant 0 : i32
    return %c0_i32, %c0_i32_0 : i32, i32
  }
  func.func @transform_4(%arg0: i32) -> (i32, i32) {
    %c0_i32 = arith.constant 0 : i32
    %c0_i32_0 = arith.constant 0 : i32
    %c0_i32_1 = arith.constant 0 : i32
    return %c0_i32, %c0_i32_0 : i32, i32
  }
  func.func @transform_5(%arg0: i32) -> (i32, i32) {
    %c0_i32 = arith.constant 0 : i32
    %c0_i32_0 = arith.constant 0 : i32
    return %arg0, %c0_i32 : i32, i32
  }
}

</mosaic_0001>

<bundles_post_ra>
// kernel: _lambda_.10
= control target key start
LH: loop header
LB: loop body
LE: loop exit
PB: predicated region body
PF: predicated region fallthrough
CT: control target
= control target key end

     0   :  { %vm30_vm0 = vcmask 392192   ;;  %vm170_vm1 = vcmask 261120   ;;  %s355_s0 = inlined_call_operand.vmem [shape: f32[16,48], index: 0, kind: input, shape index: {}]   ;;  %s356_s3 = inlined_call_operand.vmem [shape: f32[48,32], index: 3, kind: input, shape index: {}]   ;;  %s357_s1 = inlined_call_operand.vmem [shape: f32[1,48], index: 1, kind: input, shape index: {}]   ;;  %s358_s2 = inlined_call_operand.vmem [shape: f32[1,48], index: 2, kind: input, shape index: {}]   ;;  %s359_s4 = inlined_call_operand.vmem [shape: f32[1,32], index: 4, kind: input, shape index: {}]   ;;  %s360_s5 = inlined_call_operand.vmem [shape: f32[1,32], index: 5, kind: input, shape index: {}]   ;;  %s361_s6 = inlined_call_operand.vmem [shape: f32[1,32], index: 6, kind: input, shape index: {}]   ;;  %s362_s7 = inlined_call_operand.vmem [shape: f32[16,32], index: 7, kind: output, shape index: {}]  }
   0x1   :  { %v26_v0 = vld [vmem:[%s355_s0] sm:$0xff]  ;;  %v27_v1 = vld [vmem:[%s355_s0 + $0x8] sm:$0xff]  ;;  %v77_v16 = vld [vmem:[%s356_s3 + $0x18] sm:$0xff] }
   0x2   :  { %v31_v2 = vsel %vm30_vm0, %v26_v0, 0.0  ;;  %v34_v3 = vsel %vm30_vm0, %v27_v1, 0.0  ;;  %v79_v14 = vld [vmem:[%s356_s3 + $0x28] sm:$0xff]  ;;  %v78_v15 = vld [vmem:[%s356_s3 + $0x20] sm:$0xff]  ;;  %v76_v17 = vld [vmem:[%s356_s3 + $0x10] sm:$0xff] }
   0x3   :  { %32 = vadd.xlane.f32.xlu0 %v31_v2  ;;  %235 = vmatprep.subr.mxu0 %v79_v14  ;;  %v75_v18 = vld [vmem:[%s356_s3 + $0x8] sm:$0xff]  ;;  %v74_v19 = vld [vmem:[%s356_s3] sm:$0xff] }
   0x4   :  { %236 = vmatpush3.msra.mxu0 %v79_v14  ;;  %v220_v27 = vld [vmem:[%s357_s1] ss:$0 sm:$0xff] }
   0x5   :  { %237 = vmatprep.subr.mxu0 %v78_v15  ;;  %v221_v29 = vld [vmem:[%s358_s2] ss:$0 sm:$0xff] }
   0x6   :  { %238 = vmatpush3.msra.mxu0 %v78_v15  ;;  %v222_v36 = vld [vmem:[%s359_s4] ss:$0 sm:$0xff] }
   0x7   :  { %35 = vadd.xlane.f32.xlu0 %v34_v3  ;;  %239 = vmatprep.subr.mxu0 %v77_v16  ;;  %v225_v60 = vld [vmem:[%s360_s5] ss:$0 sm:$0xff] }
   0x8   :  { %240 = vmatpush3.msra.mxu0 %v77_v16  ;;  %v226_v63 = vld [vmem:[%s361_s6] ss:$0 sm:$0xff] }
   0x9   :  { %241 = vmatprep.subr.mxu0 %v76_v17 }
   0xa   :  { %242 = vmatpush3.msra.mxu0 %v76_v17 }
   0xb   :  { %243 = vmatprep.subr.mxu0 %v75_v18 }
   0xc   :  { %244 = vmatpush3.msra.mxu0 %v75_v18 }
   0xd   :  { %245 = vmatprep.subr.mxu0 %v74_v19 }
   0xe   :  { %246 = vmatpush3.msra.mxu0 %v74_v19 }
  0x8c   :  { %v33_v4 = vpop.xlane.xlu0 %32 }
  0x8d   :  { %v38_v5 = vmul.f32 0.020833334, %v33_v4 }
  0x8f   :  { %v40_v6 = vsub.f32 %v26_v0, %v38_v5 }
  0x90   :  { %v36_v7 = vpop.xlane.xlu0 %35 }
  0x91   :  { %v39_v8 = vmul.f32 0.020833334, %v36_v7  ;;  %v42_v9 = vmul.f32 %v40_v6, %v40_v6 }
  0x93   :  { %v41_v10 = vsub.f32 %v27_v1, %v39_v8  ;;  %v44_v11 = vsel %vm30_vm0, %v42_v9, 0.0 }
  0x94   :  { %45 = vadd.xlane.f32.xlu1 %v44_v11 }
  0x95   :  { %v43_v12 = vmul.f32 %v41_v10, %v41_v10 }
  0x97   :  { %v47_v13 = vsel %vm30_vm0, %v43_v12, 0.0 }
  0x98   :  { %48 = vadd.xlane.f32.xlu1 %v47_v13 }
 0x11d   :  { %v46_v20 = vpop.xlane.xlu1 %45 }
 0x11e   :  { %v50_v21 = vmul.f32 0.020833334, %v46_v20 }
 0x120   :  { %v52_v22 = vadd.f32 1e-05, %v50_v21 }
 0x121   :  { %v49_v23 = vpop.xlane.xlu1 %48 }
 0x122   :  { %250 = vrsqrt.f32 %v52_v22  ;;  %v51_v24 = vmul.f32 0.020833334, %v49_v23 }
 0x124   :  { %v53_v25 = vadd.f32 1e-05, %v51_v24 }
 0x126   :  { %252 = vrsqrt.f32 %v53_v25 }
 0x12f   :  { %v251_v26 = vpop.eup %250 }
 0x130   :  { %v56_v28 = vmul.f32 %v251_v26, %v40_v6 }
 0x132   :  { %v64_v30 = vmul.f32 %v220_v27, %v56_v28 }
 0x133   :  { %v253_v31 = vpop.eup %252 }
 0x134   :  { %v57_v32 = vmul.f32 %v253_v31, %v41_v10  ;;  %v72_v33 = vadd.f32 %v221_v29, %v64_v30 }
 0x136   :  { %v65_v34 = vmul.f32 %v220_v27, %v57_v32  ;;  %247 = vmatprep.mubr.msk.f32.mxu0 %vm30_vm0, %v72_v33 }
 0x138   :  { %v73_v35 = vadd.f32 %v221_v29, %v65_v34 }
 0x13a   :  { %248 = vmatmul.mubr.msk.f32.vlgmr.msra.gmra.mxu0 %vm30_vm0, %v73_v35 }
 0x1fa   :  { %v249_v37 = vpop.f32.mrf.mxu0 }
 0x1fb   :  { %v165_v38 = vadd.f32 %v249_v37, %v222_v36 }
 0x1fc   :  { %v159_v39 = vpop.f32.mrf.mxu0 }
 0x1fd   :  { %v160_v40 = vadd.f32 %v222_v36, %v159_v39  ;;  %v174_v41 = vsel %vm170_vm1, %v165_v38, 0.0 }
 0x1fe   :  { %175 = vadd.xlane.f32.xlu1 %v174_v41 }
 0x1ff   :  { %v171_v42 = vsel %vm170_vm1, %v160_v40, 0.0 }
 0x200   :  { %172 = vadd.xlane.f32.xlu0 %v171_v42 }
 0x287   :  { %v176_v43 = vpop.xlane.xlu1 %175 }
 0x288   :  { %v179_v44 = vmul.f32 0.03125, %v176_v43 }
 0x289   :  { %v173_v45 = vpop.xlane.xlu0 %172 }
 0x28a   :  { %v181_v46 = vsub.f32 %v165_v38, %v179_v44  ;;  %v178_v47 = vmul.f32 0.03125, %v173_v45 }
 0x28c   :  { %v180_v48 = vsub.f32 %v160_v40, %v178_v47  ;;  %v183_v49 = vmul.f32 %v181_v46, %v181_v46 }
 0x28e   :  { %v187_v50 = vsel %vm170_vm1, %v183_v49, 0.0  ;;  %v182_v51 = vmul.f32 %v180_v48, %v180_v48 }
 0x28f   :  { %188 = vadd.xlane.f32.xlu1 %v187_v50 }
 0x290   :  { %v184_v52 = vsel %vm170_vm1, %v182_v51, 0.0 }
 0x291   :  { %185 = vadd.xlane.f32.xlu0 %v184_v52 }
 0x318   :  { %v189_v53 = vpop.xlane.xlu1 %188 }
 0x319   :  { %v191_v54 = vmul.f32 0.03125, %v189_v53 }
 0x31a   :  { %v186_v55 = vpop.xlane.xlu0 %185 }
 0x31b   :  { %v193_v56 = vadd.f32 1e-05, %v191_v54  ;;  %v190_v57 = vmul.f32 0.03125, %v186_v55 }
 0x31d   :  { %254 = vrsqrt.f32 %v193_v56  ;;  %v192_v58 = vadd.f32 1e-05, %v190_v57 }
 0x31f   :  { %256 = vrsqrt.f32 %v192_v58 }
 0x32a   :  { %v255_v59 = vpop.eup %254 }
 0x32b   :  { %v197_v61 = vmul.f32 %v255_v59, %v181_v46 }
 0x32c   :  { %v257_v62 = vpop.eup %256 }
 0x32d   :  { %v205_v0 = vmul.f32 %v225_v60, %v197_v61  ;;  %v196_v1 = vmul.f32 %v257_v62, %v180_v48 }
 0x32f   :  { %v213_v2 = vadd.f32 %v226_v63, %v205_v0  ;;  %v204_v3 = vmul.f32 %v225_v60, %v196_v1 }
 0x331   :  { %215 = vst.msk [vmem:[%s362_s7 + $0x8] sm:$0xff] %vm170_vm1, %v213_v2  ;;  %v212_v4 = vadd.f32 %v226_v63, %v204_v3 }
 0x333   :  { %214 = vst.msk [vmem:[%s362_s7] sm:$0xff] %vm170_vm1, %v212_v4 }

// kernel: _lambda_.11
= control target key start
LH: loop header
LB: loop body
LE: loop exit
PB: predicated region body
PF: predicated region fallthrough
CT: control target
= control target key end

     0   :  { %vm26_vm0 = vcmask 392192   ;;  %vm210_vm1 = vcmask 261120   ;;  %s387_s0 = inlined_call_operand.vmem [shape: f32[32,48], index: 0, kind: input, shape index: {}]   ;;  %s388_s3 = inlined_call_operand.vmem [shape: f32[48,32], index: 3, kind: input, shape index: {}]   ;;  %s389_s1 = inlined_call_operand.vmem [shape: f32[1,48], index: 1, kind: input, shape index: {}]   ;;  %s390_s2 = inlined_call_operand.vmem [shape: f32[1,48], index: 2, kind: input, shape index: {}]   ;;  %s391_s4 = inlined_call_operand.vmem [shape: f32[1,32], index: 4, kind: input, shape index: {}]   ;;  %s392_s5 = inlined_call_operand.vmem [shape: f32[32,32], index: 5, kind: output, shape index: {}]  }
   0x1   :  { %v20_v0 = vld [vmem:[%s387_s0] sm:$0xff]  ;;  %v21_v1 = vld [vmem:[%s387_s0 + $0x8] sm:$0xff]  ;;  %v22_v2 = vld [vmem:[%s387_s0 + $0x10] sm:$0xff] }
   0x2   :  { %v27_v3 = vsel %vm26_vm0, %v20_v0, 0.0  ;;  %v30_v4 = vsel %vm26_vm0, %v21_v1, 0.0  ;;  %v23_v5 = vld [vmem:[%s387_s0 + $0x18] sm:$0xff]  ;;  %v33_v6 = vsel %vm26_vm0, %v22_v2, 0.0  ;;  %v105_v28 = vld [vmem:[%s388_s3 + $0x28] sm:$0xff]  ;;  %v104_v29 = vld [vmem:[%s388_s3 + $0x20] sm:$0xff] }
   0x3   :  { %28 = vadd.xlane.f32.xlu0 %v27_v3  ;;  %31 = vadd.xlane.f32.xlu1 %v30_v4  ;;  %v36_v7 = vsel %vm26_vm0, %v23_v5, 0.0  ;;  %v103_v30 = vld [vmem:[%s388_s3 + $0x18] sm:$0xff]  ;;  %v102_v31 = vld [vmem:[%s388_s3 + $0x10] sm:$0xff]  ;;  %v101_v32 = vld [vmem:[%s388_s3 + $0x8] sm:$0xff] }
   0x4   :  { %236 = vmatprep.subr.mxu0 %v105_v28  ;;  %254 = vmatprep.subr.mxu1 %v105_v28  ;;  %v100_v33 = vld [vmem:[%s388_s3] sm:$0xff] }
   0x5   :  { %237 = vmatpush3.msra.mxu0 %v105_v28  ;;  %260 = vmatpush3.msra.mxu1 %v105_v28  ;;  %v219_v47 = vld [vmem:[%s389_s1] ss:$0 sm:$0xff] }
   0x6   :  { %238 = vmatprep.subr.mxu0 %v104_v29  ;;  %255 = vmatprep.subr.mxu1 %v104_v29  ;;  %v220_v49 = vld [vmem:[%s390_s2] ss:$0 sm:$0xff] }
   0x7   :  { %34 = vadd.xlane.f32.xlu0 %v33_v6  ;;  %37 = vadd.xlane.f32.xlu1 %v36_v7 }
   0x8   :  { %239 = vmatpush3.msra.mxu0 %v104_v29  ;;  %261 = vmatpush3.msra.mxu1 %v104_v29 }
   0x9   :  { %240 = vmatprep.subr.mxu0 %v103_v30  ;;  %256 = vmatprep.subr.mxu1 %v103_v30 }
   0xa   :  { %241 = vmatpush3.msra.mxu0 %v103_v30  ;;  %262 = vmatpush3.msra.mxu1 %v103_v30 }
   0xb   :  { %242 = vmatprep.subr.mxu0 %v102_v31  ;;  %257 = vmatprep.subr.mxu1 %v102_v31 }
   0xc   :  { %243 = vmatpush3.msra.mxu0 %v102_v31  ;;  %263 = vmatpush3.msra.mxu1 %v102_v31 }
   0xd   :  { %244 = vmatprep.subr.mxu0 %v101_v32  ;;  %258 = vmatprep.subr.mxu1 %v101_v32 }
   0xe   :  { %245 = vmatpush3.msra.mxu0 %v101_v32  ;;  %264 = vmatpush3.msra.mxu1 %v101_v32 }
   0xf   :  { %246 = vmatprep.subr.mxu0 %v100_v33  ;;  %259 = vmatprep.subr.mxu1 %v100_v33 }
  0x10   :  { %247 = vmatpush3.msra.mxu0 %v100_v33  ;;  %265 = vmatpush3.msra.mxu1 %v100_v33 }
  0x8c   :  { %v29_v8 = vpop.xlane.xlu0 %28  ;;  %v32_v9 = vpop.xlane.xlu1 %31 }
  0x8d   :  { %v40_v10 = vmul.f32 0.020833334, %v29_v8  ;;  %v41_v11 = vmul.f32 0.020833334, %v32_v9 }
  0x8f   :  { %v320_v12 = vsub.f32 %v20_v0, %v40_v10  ;;  %v322_v13 = vsub.f32 %v21_v1, %v41_v11  ;;  %v221_v0 = vld [vmem:[%s391_s4] ss:$0 sm:$0xff] }
  0x90   :  { %v35_v14 = vpop.xlane.xlu0 %34  ;;  %v38_v15 = vpop.xlane.xlu1 %37 }
  0x91   :  { %v42_v16 = vmul.f32 0.020833334, %v35_v14  ;;  %v43_v17 = vmul.f32 0.020833334, %v38_v15  ;;  %v48_v18 = vmul.f32 %v320_v12, %v320_v12  ;;  %v49_v19 = vmul.f32 %v322_v13, %v322_v13 }
  0x93   :  { %v328_v20 = vsub.f32 %v22_v2, %v42_v16  ;;  %v330_v21 = vsub.f32 %v23_v5, %v43_v17  ;;  %v52_v22 = vsel %vm26_vm0, %v48_v18, 0.0  ;;  %v55_v23 = vsel %vm26_vm0, %v49_v19, 0.0 }
  0x94   :  { %53 = vadd.xlane.f32.xlu0 %v52_v22 }
  0x95   :  { %v50_v24 = vmul.f32 %v328_v20, %v328_v20  ;;  %v51_v25 = vmul.f32 %v330_v21, %v330_v21 }
  0x97   :  { %v58_v26 = vsel %vm26_vm0, %v50_v24, 0.0  ;;  %v61_v27 = vsel %vm26_vm0, %v51_v25, 0.0 }
  0x98   :  { %56 = vadd.xlane.f32.xlu0 %v55_v23  ;;  %59 = vadd.xlane.f32.xlu1 %v58_v26 }
  0x9c   :  { %62 = vadd.xlane.f32.xlu1 %v61_v27 }
 0x11d   :  { %v54_v34 = vpop.xlane.xlu0 %53 }
 0x11e   :  { %v64_v35 = vmul.f32 0.020833334, %v54_v34 }
 0x120   :  { %v68_v36 = vadd.f32 1e-05, %v64_v35 }
 0x121   :  { %v60_v37 = vpop.xlane.xlu1 %59  ;;  %v57_v38 = vpop.xlane.xlu0 %56 }
 0x122   :  { %266 = vrsqrt.f32 %v68_v36  ;;  %v66_v39 = vmul.f32 0.020833334, %v60_v37  ;;  %v65_v40 = vmul.f32 0.020833334, %v57_v38 }
 0x124   :  { %v70_v41 = vadd.f32 1e-05, %v66_v39  ;;  %v69_v42 = vadd.f32 1e-05, %v65_v40 }
 0x125   :  { %v63_v43 = vpop.xlane.xlu1 %62 }
 0x126   :  { %268 = vrsqrt.f32 %v70_v41  ;;  %v67_v44 = vmul.f32 0.020833334, %v63_v43 }
 0x127   :  { %270 = vrsqrt.f32 %v69_v42 }
 0x128   :  { %v71_v45 = vadd.f32 1e-05, %v67_v44 }
 0x12a   :  { %272 = vrsqrt.f32 %v71_v45 }
 0x12f   :  { %v267_v46 = vpop.eup %266 }
 0x130   :  { %v76_v48 = vmul.f32 %v267_v46, %v320_v12 }
 0x132   :  { %v86_v50 = vmul.f32 %v219_v47, %v76_v48 }
 0x133   :  { %v269_v51 = vpop.eup %268 }
 0x134   :  { %v271_v52 = vpop.eup %270  ;;  %v96_v53 = vadd.f32 %v220_v49, %v86_v50  ;;  %v78_v54 = vmul.f32 %v269_v51, %v328_v20 }
 0x135   :  { %v77_v55 = vmul.f32 %v271_v52, %v322_v13 }
 0x136   :  { %248 = vmatprep.mubr.msk.f32.mxu0 %vm26_vm0, %v96_v53  ;;  %v88_v56 = vmul.f32 %v219_v47, %v78_v54 }
 0x137   :  { %v273_v57 = vpop.eup %272  ;;  %v87_v58 = vmul.f32 %v219_v47, %v77_v55 }
 0x138   :  { %v98_v59 = vadd.f32 %v220_v49, %v88_v56  ;;  %v79_v60 = vmul.f32 %v273_v57, %v330_v21 }
 0x139   :  { %v97_v61 = vadd.f32 %v220_v49, %v87_v58 }
 0x13a   :  { %251 = vmatprep.mubr.msk.f32.mxu1 %vm26_vm0, %v98_v59  ;;  %v89_v62 = vmul.f32 %v219_v47, %v79_v60 }
 0x13b   :  { %249 = vmatmul.mubr.msk.f32.vlgmr.msra.gmra.mxu0 %vm26_vm0, %v97_v61 }
 0x13c   :  { %v99_v63 = vadd.f32 %v220_v49, %v89_v62 }
 0x13e   :  { %252 = vmatmul.mubr.msk.f32.vlgmr.msra.gmra.mxu1 %vm26_vm0, %v99_v63 }
 0x1fb   :  { %v250_v1 = vpop.f32.mrf.mxu0 }
 0x1fc   :  { %v197_v2 = vadd.f32 %v250_v1, %v221_v0 }
 0x1fd   :  { %v191_v3 = vpop.f32.mrf.mxu0 }
 0x1fe   :  { %212 = vst.msk [vmem:[%s392_s5 + $0x8] sm:$0xff] %vm210_vm1, %v197_v2  ;;  %v192_v4 = vadd.f32 %v221_v0, %v191_v3  ;;  %v253_v5 = vpop.f32.mrf.mxu1 }
 0x1ff   :  { %v207_v6 = vadd.f32 %v253_v5, %v221_v0 }
 0x200   :  { %211 = vst.msk [vmem:[%s392_s5] sm:$0xff] %vm210_vm1, %v192_v4  ;;  %v201_v7 = vpop.f32.mrf.mxu1 }
 0x201   :  { %214 = vst.msk [vmem:[%s392_s5 + $0x18] sm:$0xff] %vm210_vm1, %v207_v6  ;;  %v202_v8 = vadd.f32 %v221_v0, %v201_v7 }
 0x203   :  { %213 = vst.msk [vmem:[%s392_s5 + $0x10] sm:$0xff] %vm210_vm1, %v202_v8 }

// kernel: _lambda_.13
= control target key start
LH: loop header
LB: loop body
LE: loop exit
PB: predicated region body
PF: predicated region fallthrough
CT: control target
= control target key end

     0   :  { %vm26_vm0 = vcmask 261120   ;;  %vm208_vm1 = vcmask 392192   ;;  %s359_s0 = inlined_call_operand.vmem [shape: f32[32,32], index: 0, kind: input, shape index: {}]   ;;  %s360_s3 = inlined_call_operand.vmem [shape: f32[32,48], index: 3, kind: input, shape index: {}]   ;;  %s361_s1 = inlined_call_operand.vmem [shape: f32[1,32], index: 1, kind: input, shape index: {}]   ;;  %s362_s2 = inlined_call_operand.vmem [shape: f32[1,32], index: 2, kind: input, shape index: {}]   ;;  %s363_s4 = inlined_call_operand.vmem [shape: f32[1,48], index: 4, kind: input, shape index: {}]   ;;  %s364_s5 = inlined_call_operand.vmem [shape: f32[32,48], index: 5, kind: output, shape index: {}]  }
   0x1   :  { %v20_v0 = vld [vmem:[%s359_s0] sm:$0xff]  ;;  %v21_v1 = vld [vmem:[%s359_s0 + $0x8] sm:$0xff]  ;;  %v22_v2 = vld [vmem:[%s359_s0 + $0x10] sm:$0xff] }
   0x2   :  { %v27_v3 = vsel %vm26_vm0, %v20_v0, 0.0  ;;  %v30_v4 = vsel %vm26_vm0, %v21_v1, 0.0  ;;  %v23_v5 = vld [vmem:[%s359_s0 + $0x18] sm:$0xff]  ;;  %v33_v6 = vsel %vm26_vm0, %v22_v2, 0.0  ;;  %v102_v29 = vld [vmem:[%s360_s3 + $0x10] sm:$0xff]  ;;  %v101_v30 = vld [vmem:[%s360_s3 + $0x8] sm:$0xff] }
   0x3   :  { %28 = vadd.xlane.f32.xlu0 %v27_v3  ;;  %31 = vadd.xlane.f32.xlu1 %v30_v4  ;;  %v36_v7 = vsel %vm26_vm0, %v23_v5, 0.0  ;;  %v103_v28 = vld [vmem:[%s360_s3 + $0x18] sm:$0xff]  ;;  %v100_v31 = vld [vmem:[%s360_s3] sm:$0xff] }
   0x4   :  { %232 = vmatprep.subr.mxu0 %v103_v28  ;;  %246 = vmatprep.subr.mxu1 %v103_v28  ;;  %v217_v45 = vld [vmem:[%s361_s1] ss:$0 sm:$0xff] }
   0x5   :  { %233 = vmatpush3.msra.mxu0 %v103_v28  ;;  %250 = vmatpush3.msra.mxu1 %v103_v28  ;;  %v218_v47 = vld [vmem:[%s362_s2] ss:$0 sm:$0xff] }
   0x6   :  { %234 = vmatprep.subr.mxu0 %v102_v29  ;;  %247 = vmatprep.subr.mxu1 %v102_v29  ;;  %v219_v62 = vld [vmem:[%s363_s4] ss:$0 sm:$0xff] }
   0x7   :  { %34 = vadd.xlane.f32.xlu0 %v33_v6  ;;  %37 = vadd.xlane.f32.xlu1 %v36_v7 }
   0x8   :  { %235 = vmatpush3.msra.mxu0 %v102_v29  ;;  %251 = vmatpush3.msra.mxu1 %v102_v29 }
   0x9   :  { %236 = vmatprep.subr.mxu0 %v101_v30  ;;  %248 = vmatprep.subr.mxu1 %v101_v30 }
   0xa   :  { %237 = vmatpush3.msra.mxu0 %v101_v30  ;;  %252 = vmatpush3.msra.mxu1 %v101_v30 }
   0xb   :  { %238 = vmatprep.subr.mxu0 %v100_v31  ;;  %249 = vmatprep.subr.mxu1 %v100_v31 }
   0xc   :  { %239 = vmatpush3.msra.mxu0 %v100_v31  ;;  %253 = vmatpush3.msra.mxu1 %v100_v31 }
  0x8c   :  { %v29_v8 = vpop.xlane.xlu0 %28  ;;  %v32_v9 = vpop.xlane.xlu1 %31 }
  0x8d   :  { %v40_v10 = vmul.f32 0.03125, %v29_v8  ;;  %v41_v11 = vmul.f32 0.03125, %v32_v9 }
  0x8f   :  { %v44_v12 = vsub.f32 %v20_v0, %v40_v10  ;;  %v308_v13 = vsub.f32 %v21_v1, %v41_v11 }
  0x90   :  { %v35_v14 = vpop.xlane.xlu0 %34  ;;  %v38_v15 = vpop.xlane.xlu1 %37 }
  0x91   :  { %v42_v16 = vmul.f32 0.03125, %v35_v14  ;;  %v43_v17 = vmul.f32 0.03125, %v38_v15  ;;  %v48_v18 = vmul.f32 %v44_v12, %v44_v12  ;;  %v49_v19 = vmul.f32 %v308_v13, %v308_v13 }
  0x93   :  { %v46_v20 = vsub.f32 %v22_v2, %v42_v16  ;;  %v312_v21 = vsub.f32 %v23_v5, %v43_v17  ;;  %v52_v22 = vsel %vm26_vm0, %v48_v18, 0.0  ;;  %v55_v23 = vsel %vm26_vm0, %v49_v19, 0.0 }
  0x94   :  { %53 = vadd.xlane.f32.xlu0 %v52_v22 }
  0x95   :  { %v50_v24 = vmul.f32 %v46_v20, %v46_v20  ;;  %v51_v25 = vmul.f32 %v312_v21, %v312_v21 }
  0x97   :  { %v58_v26 = vsel %vm26_vm0, %v50_v24, 0.0  ;;  %v61_v27 = vsel %vm26_vm0, %v51_v25, 0.0 }
  0x98   :  { %56 = vadd.xlane.f32.xlu0 %v55_v23  ;;  %59 = vadd.xlane.f32.xlu1 %v58_v26 }
  0x9c   :  { %62 = vadd.xlane.f32.xlu1 %v61_v27 }
 0x11d   :  { %v54_v32 = vpop.xlane.xlu0 %53 }
 0x11e   :  { %v64_v33 = vmul.f32 0.03125, %v54_v32 }
 0x120   :  { %v68_v34 = vadd.f32 1e-05, %v64_v33 }
 0x121   :  { %v60_v35 = vpop.xlane.xlu1 %59  ;;  %v57_v36 = vpop.xlane.xlu0 %56 }
 0x122   :  { %254 = vrsqrt.f32 %v68_v34  ;;  %v66_v37 = vmul.f32 0.03125, %v60_v35  ;;  %v65_v38 = vmul.f32 0.03125, %v57_v36 }
 0x124   :  { %v70_v39 = vadd.f32 1e-05, %v66_v37  ;;  %v69_v40 = vadd.f32 1e-05, %v65_v38 }
 0x125   :  { %v63_v41 = vpop.xlane.xlu1 %62 }
 0x126   :  { %256 = vrsqrt.f32 %v70_v39  ;;  %v67_v42 = vmul.f32 0.03125, %v63_v41 }
 0x127   :  { %258 = vrsqrt.f32 %v69_v40 }
 0x128   :  { %v71_v43 = vadd.f32 1e-05, %v67_v42 }
 0x12a   :  { %260 = vrsqrt.f32 %v71_v43 }
 0x12f   :  { %v255_v44 = vpop.eup %254 }
 0x130   :  { %v76_v46 = vmul.f32 %v255_v44, %v44_v12 }
 0x132   :  { %v86_v48 = vmul.f32 %v217_v45, %v76_v46 }
 0x133   :  { %v257_v49 = vpop.eup %256 }
 0x134   :  { %v259_v50 = vpop.eup %258  ;;  %v96_v51 = vadd.f32 %v218_v47, %v86_v48  ;;  %v78_v52 = vmul.f32 %v257_v49, %v46_v20 }
 0x135   :  { %v77_v53 = vmul.f32 %v259_v50, %v308_v13 }
 0x136   :  { %240 = vmatprep.mubr.msk.f32.mxu0 %vm26_vm0, %v96_v51  ;;  %v88_v54 = vmul.f32 %v217_v45, %v78_v52 }
 0x137   :  { %v261_v55 = vpop.eup %260  ;;  %v87_v56 = vmul.f32 %v217_v45, %v77_v53 }
 0x138   :  { %v98_v57 = vadd.f32 %v218_v47, %v88_v54  ;;  %v79_v58 = vmul.f32 %v261_v55, %v312_v21 }
 0x139   :  { %v97_v59 = vadd.f32 %v218_v47, %v87_v56 }
 0x13a   :  { %243 = vmatprep.mubr.msk.f32.mxu1 %vm26_vm0, %v98_v57  ;;  %v89_v60 = vmul.f32 %v217_v45, %v79_v58 }
 0x13b   :  { %241 = vmatmul.mubr.msk.f32.vlgmr.msra.gmra.mxu0 %vm26_vm0, %v97_v59 }
 0x13c   :  { %v99_v61 = vadd.f32 %v218_v47, %v89_v60 }
 0x13e   :  { %244 = vmatmul.mubr.msk.f32.vlgmr.msra.gmra.mxu1 %vm26_vm0, %v99_v61 }
 0x1fb   :  { %v242_v63 = vpop.f32.mrf.mxu0 }
 0x1fc   :  { %v195_v0 = vadd.f32 %v242_v63, %v219_v62 }
 0x1fd   :  { %v189_v1 = vpop.f32.mrf.mxu0 }
 0x1fe   :  { %210 = vst.msk [vmem:[%s364_s5 + $0x8] sm:$0xff] %vm208_vm1, %v195_v0  ;;  %v190_v2 = vadd.f32 %v219_v62, %v189_v1  ;;  %v245_v3 = vpop.f32.mrf.mxu1 }
 0x1ff   :  { %v205_v4 = vadd.f32 %v245_v3, %v219_v62 }
 0x200   :  { %209 = vst.msk [vmem:[%s364_s5] sm:$0xff] %vm208_vm1, %v190_v2  ;;  %v199_v5 = vpop.f32.mrf.mxu1 }
 0x201   :  { %212 = vst.msk [vmem:[%s364_s5 + $0x18] sm:$0xff] %vm208_vm1, %v205_v4  ;;  %v200_v6 = vadd.f32 %v219_v62, %v199_v5 }
 0x203   :  { %211 = vst.msk [vmem:[%s364_s5 + $0x10] sm:$0xff] %vm208_vm1, %v200_v6 }

// kernel: _lambda_.15
= control target key start
LH: loop header
LB: loop body
LE: loop exit
PB: predicated region body
PF: predicated region fallthrough
CT: control target
= control target key end

     0   :  { %vm24_vm0 = vcmask 261120   ;;  %vm160_vm1 = vcmask 392192   ;;  %s262_s0 = inlined_call_operand.vmem [shape: f32[16,32], index: 0, kind: input, shape index: {}]   ;;  %s263_s3 = inlined_call_operand.vmem [shape: f32[32,48], index: 3, kind: input, shape index: {}]   ;;  %s264_s1 = inlined_call_operand.vmem [shape: f32[1,32], index: 1, kind: input, shape index: {}]   ;;  %s265_s2 = inlined_call_operand.vmem [shape: f32[1,32], index: 2, kind: input, shape index: {}]   ;;  %s266_s4 = inlined_call_operand.vmem [shape: f32[1,48], index: 4, kind: input, shape index: {}]   ;;  %s267_s5 = inlined_call_operand.vmem [shape: f32[16,48], index: 5, kind: output, shape index: {}]  }
   0x1   :  { %v20_v0 = vld [vmem:[%s262_s0] sm:$0xff]  ;;  %v21_v1 = vld [vmem:[%s262_s0 + $0x8] sm:$0xff]  ;;  %v71_v14 = vld [vmem:[%s263_s3 + $0x18] sm:$0xff] }
   0x2   :  { %v25_v2 = vsel %vm24_vm0, %v20_v0, 0.0  ;;  %v28_v3 = vsel %vm24_vm0, %v21_v1, 0.0  ;;  %v70_v15 = vld [vmem:[%s263_s3 + $0x10] sm:$0xff]  ;;  %178 = vmatprep.subr.mxu0 %v71_v14  ;;  %v69_v16 = vld [vmem:[%s263_s3 + $0x8] sm:$0xff]  ;;  %v68_v17 = vld [vmem:[%s263_s3] sm:$0xff] }
   0x3   :  { %26 = vadd.xlane.f32.xlu0 %v25_v2  ;;  %179 = vmatpush3.msra.mxu0 %v71_v14  ;;  %v167_v25 = vld [vmem:[%s264_s1] ss:$0 sm:$0xff] }
   0x4   :  { %180 = vmatprep.subr.mxu0 %v70_v15  ;;  %v168_v27 = vld [vmem:[%s265_s2] ss:$0 sm:$0xff] }
   0x5   :  { %181 = vmatpush3.msra.mxu0 %v70_v15  ;;  %v169_v34 = vld [vmem:[%s266_s4] ss:$0 sm:$0xff] }
   0x6   :  { %182 = vmatprep.subr.mxu0 %v69_v16 }
   0x7   :  { %29 = vadd.xlane.f32.xlu0 %v28_v3  ;;  %183 = vmatpush3.msra.mxu0 %v69_v16 }
   0x8   :  { %184 = vmatprep.subr.mxu0 %v68_v17 }
   0x9   :  { %185 = vmatpush3.msra.mxu0 %v68_v17 }
  0x8c   :  { %v27_v4 = vpop.xlane.xlu0 %26 }
  0x8d   :  { %v32_v5 = vmul.f32 0.03125, %v27_v4 }
  0x8f   :  { %v34_v6 = vsub.f32 %v20_v0, %v32_v5 }
  0x90   :  { %v30_v7 = vpop.xlane.xlu0 %29 }
  0x91   :  { %v33_v8 = vmul.f32 0.03125, %v30_v7  ;;  %v36_v9 = vmul.f32 %v34_v6, %v34_v6 }
  0x93   :  { %v35_v10 = vsub.f32 %v21_v1, %v33_v8  ;;  %v38_v11 = vsel %vm24_vm0, %v36_v9, 0.0 }
  0x94   :  { %39 = vadd.xlane.f32.xlu1 %v38_v11 }
  0x95   :  { %v37_v12 = vmul.f32 %v35_v10, %v35_v10 }
  0x97   :  { %v41_v13 = vsel %vm24_vm0, %v37_v12, 0.0 }
  0x98   :  { %42 = vadd.xlane.f32.xlu1 %v41_v13 }
 0x11d   :  { %v40_v18 = vpop.xlane.xlu1 %39 }
 0x11e   :  { %v44_v19 = vmul.f32 0.03125, %v40_v18 }
 0x120   :  { %v46_v20 = vadd.f32 1e-05, %v44_v19 }
 0x121   :  { %v43_v21 = vpop.xlane.xlu1 %42 }
 0x122   :  { %189 = vrsqrt.f32 %v46_v20  ;;  %v45_v22 = vmul.f32 0.03125, %v43_v21 }
 0x124   :  { %v47_v23 = vadd.f32 1e-05, %v45_v22 }
 0x126   :  { %191 = vrsqrt.f32 %v47_v23 }
 0x12f   :  { %v190_v24 = vpop.eup %189 }
 0x130   :  { %v50_v26 = vmul.f32 %v190_v24, %v34_v6 }
 0x132   :  { %v58_v28 = vmul.f32 %v167_v25, %v50_v26 }
 0x133   :  { %v192_v29 = vpop.eup %191 }
 0x134   :  { %v51_v30 = vmul.f32 %v192_v29, %v35_v10  ;;  %v66_v31 = vadd.f32 %v168_v27, %v58_v28 }
 0x136   :  { %v59_v32 = vmul.f32 %v167_v25, %v51_v30  ;;  %186 = vmatprep.mubr.msk.f32.mxu0 %vm24_vm0, %v66_v31 }
 0x138   :  { %v67_v33 = vadd.f32 %v168_v27, %v59_v32 }
 0x13a   :  { %187 = vmatmul.mubr.msk.f32.vlgmr.msra.gmra.mxu0 %vm24_vm0, %v67_v33 }
 0x1fa   :  { %v188_v35 = vpop.f32.mrf.mxu0 }
 0x1fb   :  { %v157_v36 = vadd.f32 %v188_v35, %v169_v34 }
 0x1fc   :  { %v151_v37 = vpop.f32.mrf.mxu0 }
 0x1fd   :  { %162 = vst.msk [vmem:[%s267_s5 + $0x8] sm:$0xff] %vm160_vm1, %v157_v36  ;;  %v152_v38 = vadd.f32 %v169_v34, %v151_v37 }
 0x1ff   :  { %161 = vst.msk [vmem:[%s267_s5] sm:$0xff] %vm160_vm1, %v152_v38 }

// kernel: _lambda_.17
= control target key start
LH: loop header
LB: loop body
LE: loop exit
PB: predicated region body
PF: predicated region fallthrough
CT: control target
= control target key end

     0   :  { %vm23_vm0 = vcmask 261120   ;;  %v166_v7 = vmov 0.0   ;;  %vm167_vm1 = vmmov 0   ;;  %vm136_vm2 = vcmask 392192   ;;  %s228_s0 = inlined_call_operand.vmem [shape: f32[8,32], index: 0, kind: input, shape index: {}]   ;;  %s229_s3 = inlined_call_operand.vmem [shape: f32[32,48], index: 3, kind: input, shape index: {}]   ;;  %s230_s1 = inlined_call_operand.vmem [shape: f32[1,32], index: 1, kind: input, shape index: {}]   ;;  %s231_s2 = inlined_call_operand.vmem [shape: f32[1,32], index: 2, kind: input, shape index: {}]   ;;  %s232_s4 = inlined_call_operand.vmem [shape: f32[1,48], index: 4, kind: input, shape index: {}]   ;;  %s233_s5 = inlined_call_operand.vmem [shape: f32[8,48], index: 5, kind: output, shape index: {}]  }
   0x1   :  { %v20_v0 = vld [vmem:[%s228_s0] sm:$0xff]  ;;  %151 = vmatprep.subr.mxu0 %v166_v7  ;;  %v55_v8 = vld [vmem:[%s229_s3 + $0x18] sm:$0xff]  ;;  %v54_v9 = vld [vmem:[%s229_s3 + $0x10] sm:$0xff]  ;;  %159 = vmatprep.mubr.msk.f32.mxu0 %vm167_vm1, %v166_v7 }
   0x2   :  { %v24_v1 = vsel %vm23_vm0, %v20_v0, 0.0  ;;  %152 = vmatpush3.msra.mxu0 %v55_v8  ;;  %v53_v10 = vld [vmem:[%s229_s3 + $0x8] sm:$0xff]  ;;  %v52_v11 = vld [vmem:[%s229_s3] sm:$0xff] }
   0x3   :  { %25 = vadd.xlane.f32.xlu0 %v24_v1  ;;  %153 = vmatprep.subr.mxu0 %v166_v7  ;;  %v142_v16 = vld [vmem:[%s230_s1] ss:$0 sm:$0xff] }
   0x4   :  { %154 = vmatpush3.msra.mxu0 %v54_v9  ;;  %v143_v18 = vld [vmem:[%s231_s2] ss:$0 sm:$0xff] }
   0x5   :  { %155 = vmatprep.subr.mxu0 %v166_v7  ;;  %v144_v21 = vld [vmem:[%s232_s4] ss:$0 sm:$0xff] }
   0x6   :  { %156 = vmatpush3.msra.mxu0 %v53_v10 }
   0x7   :  { %157 = vmatprep.subr.mxu0 %v166_v7 }
   0x8   :  { %158 = vmatpush3.msra.mxu0 %v52_v11 }
  0x8c   :  { %v26_v2 = vpop.xlane.xlu0 %25 }
  0x8d   :  { %v28_v3 = vmul.f32 0.03125, %v26_v2 }
  0x8f   :  { %v29_v4 = vsub.f32 %v20_v0, %v28_v3 }
  0x91   :  { %v30_v5 = vmul.f32 %v29_v4, %v29_v4 }
  0x93   :  { %v31_v6 = vsel %vm23_vm0, %v30_v5, 0.0 }
  0x94   :  { %32 = vadd.xlane.f32.xlu0 %v31_v6 }
 0x11d   :  { %v33_v12 = vpop.xlane.xlu0 %32 }
 0x11e   :  { %v34_v13 = vmul.f32 0.03125, %v33_v12 }
 0x120   :  { %v35_v14 = vadd.f32 1e-05, %v34_v13 }
 0x122   :  { %164 = vrsqrt.f32 %v35_v14 }
 0x12f   :  { %v165_v15 = vpop.eup %164 }
 0x130   :  { %v37_v17 = vmul.f32 %v165_v15, %v29_v4 }
 0x132   :  { %v44_v19 = vmul.f32 %v142_v16, %v37_v17 }
 0x134   :  { %v51_v20 = vadd.f32 %v143_v18, %v44_v19 }
 0x136   :  { %160 = vmatmul.mubr.msk.f32.vlgmr.msra.gmra.mxu0 %vm23_vm0, %v51_v20 }
 0x1f6   :  { %v132_v22 = vpop.f32.mrf.mxu0 }
 0x1f7   :  { %v133_v23 = vadd.f32 %v144_v21, %v132_v22 }
 0x1f8   :  { %v161_v24 = vpop.f32.mrf.mxu0 }
 0x1f9   :  { %137 = vst.msk [vmem:[%s233_s5] sm:$0xff] %vm136_vm2, %v133_v23 }

// kernel: _lambda_.19
= control target key start
LH: loop header
LB: loop body
LE: loop exit
PB: predicated region body
PF: predicated region fallthrough
CT: control target
= control target key end

     0   :  { %vm23_vm0 = vcmask 257024   ;;  %v167_v7 = vmov 0.0   ;;  %vm168_vm1 = vmmov 0   ;;  %vm63_vm2 = vcmask 261120   ;;  %s226_s0 = inlined_call_operand.vmem [shape: f32[4,32], index: 0, kind: input, shape index: {}]   ;;  %s227_s3 = inlined_call_operand.vmem [shape: f32[32,48], index: 3, kind: input, shape index: {}]   ;;  %s228_s1 = inlined_call_operand.vmem [shape: f32[1,32], index: 1, kind: input, shape index: {}]   ;;  %s229_s2 = inlined_call_operand.vmem [shape: f32[1,32], index: 2, kind: input, shape index: {}]   ;;  %s230_s4 = inlined_call_operand.vmem [shape: f32[1,48], index: 4, kind: input, shape index: {}]   ;;  %s231_s5 = inlined_call_operand.vmem [shape: f32[4,48], index: 5, kind: output, shape index: {}]  }
   0x1   :  { %v20_v0 = vld [vmem:[%s226_s0] sm:$0xf]  ;;  %152 = vmatprep.subr.mxu0 %v167_v7  ;;  %v55_v8 = vld [vmem:[%s227_s3 + $0x18] sm:$0xff]  ;;  %v54_v9 = vld [vmem:[%s227_s3 + $0x10] sm:$0xff]  ;;  %160 = vmatprep.mubr.msk.f32.mxu0 %vm168_vm1, %v167_v7  ;;  %vm137_vm3 = vcmask 388096  }
   0x2   :  { %v24_v1 = vsel %vm23_vm0, %v20_v0, 0.0  ;;  %153 = vmatpush3.msra.mxu0 %v55_v8  ;;  %v53_v10 = vld [vmem:[%s227_s3 + $0x8] sm:$0xff]  ;;  %v52_v11 = vld [vmem:[%s227_s3] sm:$0xff] }
   0x3   :  { %25 = vadd.xlane.f32.xlu0 %v24_v1  ;;  %154 = vmatprep.subr.mxu0 %v167_v7  ;;  %v143_v16 = vld [vmem:[%s228_s1] ss:$0 sm:$0xff] }
   0x4   :  { %155 = vmatpush3.msra.mxu0 %v54_v9  ;;  %v144_v18 = vld [vmem:[%s229_s2] ss:$0 sm:$0xff] }
   0x5   :  { %156 = vmatprep.subr.mxu0 %v167_v7  ;;  %v145_v21 = vld [vmem:[%s230_s4] ss:$0 sm:$0xff] }
   0x6   :  { %157 = vmatpush3.msra.mxu0 %v53_v10 }
   0x7   :  { %158 = vmatprep.subr.mxu0 %v167_v7 }
   0x8   :  { %159 = vmatpush3.msra.mxu0 %v52_v11 }
  0x8c   :  { %v26_v2 = vpop.xlane.xlu0 %25 }
  0x8d   :  { %v28_v3 = vmul.f32 0.03125, %v26_v2 }
  0x8f   :  { %v29_v4 = vsub.f32 %v20_v0, %v28_v3 }
  0x91   :  { %v30_v5 = vmul.f32 %v29_v4, %v29_v4 }
  0x93   :  { %v31_v6 = vsel %vm23_vm0, %v30_v5, 0.0 }
  0x94   :  { %32 = vadd.xlane.f32.xlu0 %v31_v6 }
 0x11d   :  { %v33_v12 = vpop.xlane.xlu0 %32 }
 0x11e   :  { %v34_v13 = vmul.f32 0.03125, %v33_v12 }
 0x120   :  { %v35_v14 = vadd.f32 1e-05, %v34_v13 }
 0x122   :  { %165 = vrsqrt.f32 %v35_v14 }
 0x12f   :  { %v166_v15 = vpop.eup %165 }
 0x130   :  { %v37_v17 = vmul.f32 %v166_v15, %v29_v4 }
 0x132   :  { %v44_v19 = vmul.f32 %v143_v16, %v37_v17 }
 0x134   :  { %v51_v20 = vadd.f32 %v144_v18, %v44_v19 }
 0x136   :  { %161 = vmatmul.mubr.msk.f32.vlgmr.msra.gmra.mxu0 %vm63_vm2, %v51_v20 }
 0x1f6   :  { %v133_v22 = vpop.f32.mrf.mxu0 }
 0x1f7   :  { %v134_v23 = vadd.f32 %v145_v21, %v133_v22 }
 0x1f8   :  { %v162_v24 = vpop.f32.mrf.mxu0 }
 0x1f9   :  { %138 = vst.msk [vmem:[%s231_s5] sm:$0xf] %vm137_vm3, %v134_v23 }

// kernel: _lambda_.12
= control target key start
LH: loop header
LB: loop body
LE: loop exit
PB: predicated region body
PF: predicated region fallthrough
CT: control target
= control target key end

     0   :  { %s7069_s0 = inlined_call_operand.vmem [shape: f32[2,16,32], index: 0, kind: input, shape index: {}]   ;;  %s7070_s1 = inlined_call_operand.vmem [shape: f32[2,8,32], index: 1, kind: input, shape index: {}]   ;;  %s7071_s2 = inlined_call_operand.vmem [shape: f32[1,32], index: 2, kind: input, shape index: {}]   ;;  %s7072_s3 = inlined_call_operand.vmem [shape: f32[1,32], index: 3, kind: input, shape index: {}]   ;;  %s7073_s4 = inlined_call_operand.vmem [shape: f32[1,32], index: 4, kind: input, shape index: {}]   ;;  %s7074_s5 = inlined_call_operand.vmem [shape: f32[1,32], index: 5, kind: input, shape index: {}]   ;;  %s7075_s6 = inlined_call_operand.vmem [shape: f32[1,32], index: 6, kind: input, shape index: {}]   ;;  %s7076_s7 = inlined_call_operand.vmem [shape: f32[1,32], index: 7, kind: input, shape index: {}]   ;;  %s7077_s8 = inlined_call_operand.vmem [shape: f32[4,32,8], index: 8, kind: input, shape index: {}]   ;;  %s7078_s9 = inlined_call_operand.vmem [shape: f32[4,32,8], index: 9, kind: input, shape index: {}]   ;;  %s7079_s10 = inlined_call_operand.vmem [shape: f32[4,32,8], index: 10, kind: input, shape index: {}]   ;;  %s7080_s11 = inlined_call_operand.vmem [shape: f32[4,8,32], index: 11, kind: input, shape index: {}]   ;;  %s7081_s12 = inlined_call_operand.vmem [shape: f32[1,32], index: 12, kind: input, shape index: {}]   ;;  %s7082_s13 = inlined_call_operand.vmem [shape: f32[4,32,8], index: 13, kind: input, shape index: {}]   ;;  %s7083_s14 = inlined_call_operand.vmem [shape: f32[4,32,8], index: 14, kind: input, shape index: {}]   ;;  %s7084_s15 = inlined_call_operand.vmem [shape: f32[4,32,8], index: 15, kind: input, shape index: {}]   ;;  %s7085_s16 = inlined_call_operand.vmem [shape: f32[4,8,32], index: 16, kind: input, shape index: {}]   ;;  %s7086_s17 = inlined_call_operand.vmem [shape: f32[1,32], index: 17, kind: input, shape index: {}]   ;;  %s7087_s18 = inlined_call_operand.vmem [shape: f32[32,128], index: 18, kind: input, shape index: {}]   ;;  %s7088_s19 = inlined_call_operand.vmem [shape: f32[1,128], index: 19, kind: input, shape index: {}]   ;;  %s7089_s20 = inlined_call_operand.vmem [shape: f32[128,32], index: 20, kind: input, shape index: {}]   ;;  %s7090_s21 = inlined_call_operand.vmem [shape: f32[1,32], index: 21, kind: input, shape index: {}]   ;;  %s7091_s22 = inlined_call_operand.vmem [shape: f32[2,16,32], index: 22, kind: output, shape index: {}]  }
   0x1   :  { %7092 = sst [smem:[#allocation2_spill]] %s7069_s0 }
   0x2   :  { %7093 = sst [smem:[#allocation3_spill]] %s7070_s1 }
   0x3   :  { %7094 = sst [smem:[#allocation4_spill]] %s7071_s2 }
   0x4   :  { %7095 = sst [smem:[#allocation5_spill]] %s7072_s3  ;;  %s6321_s3 = smov 0  }
   0x5   :  { %7096 = sst [smem:[#allocation6_spill]] %s7073_s4 }
   0x6   :  { %7097 = sst [smem:[#allocation7_spill]] %s7074_s5 }
   0x7   :  { %7098 = sst [smem:[#allocation8_spill]] %s7075_s6 }
   0x8 LB: > { %s5216_s28 = sadd.s32 4294967295, %s6202_s3   ;;  %p5220_p0 = scmp.ge.s32.totalorder %s6202_s3, 1  ;;  %s6202_s3 = sphi %s6321_s3, %s32_s3  }
   0x9   : > { %p621_p1 = scmp.lt.s32.totalorder %s6202_s3, 3 }
   0xb   : > { %p622_p2 = pnand %p5220_p0, %p621_p1 }
   0xc   : > { %p687_p3 = scmp.lt.s32.totalorder (!%p622_p2), %s5216_s28, 1  ;;  %s7099_s0 = sld [smem:[#allocation2_spill]] (!%p622_p2) }
   0xd   : > { %625 = sbr.rel (%p622_p2) target bundleno = 8670 (0x21de), region = 108  ;;  %s7101_s5 = sld [smem:[#allocation5_spill]] (!%p622_p2) }
   0xe   : > { %s7102_s4 = sld [smem:[#allocation3_spill]] (!%p622_p2) }
   0xf   : > { %s7103_s26 = sld [smem:[#allocation6_spill]] (!%p622_p2) }
  0x10   : > { %s7104_s30 = sld [smem:[#allocation7_spill]] (!%p622_p2) }
  0x12   : > { %s7107_s28 = smov (!%p687_p3, %s5216_s28), 1  ;;  %vm706_vm0 = vcmask 261120   ;;  %v753_v14 = vld [vmem:[%s7077_s8 + $0x18] sm:$0xff]  ;;  %v752_v15 = vld [vmem:[%s7077_s8 + $0x10] sm:$0xff]  ;;  %v751_v16 = vld [vmem:[%s7077_s8 + $0x8] sm:$0xff]  ;;  %v6204_v18 = vmov 0.0  }
  0x13   : > { %s5418_s29 = sshll.u32 %s7107_s28, 4  ;;  %5660 = vmatprep.subr.mxu0 %v753_v14  ;;  %v750_v17 = vld [vmem:[%s7077_s8] sm:$0xff]  ;;  %v838_v35 = vld [vmem:[%s7078_s9 + $0x18] sm:$0xff]  ;;  %s5223_s25 = sshll.u32 %s7107_s28, 3  ;;  %v837_v36 = vld [vmem:[%s7078_s9 + $0x10] sm:$0xff]  ;;  %vm6205_vm1 = vmmov 0  }
  0x14   : > { %s691_s23 = scalar_lea.vmem %s7099_s0, %s5418_s29  ;;  %5661 = vmatpush3.msra.mxu0 %v753_v14  ;;  %s7100_s0 = sld [smem:[#allocation4_spill]]  ;;  %v5227_v28 = vld [vmem:[%s7101_s5] ss:$0 sm:$0xff]  ;;  %v836_v37 = vld [vmem:[%s7078_s9 + $0x8] sm:$0xff]  ;;  %v915_v40 = vld [vmem:[%s7079_s10 + $0x18] sm:$0xff]  ;;  %vm986_vm2 = vcmask 64512  }
  0x15   : > { %v6337_v0 = vld [vmem:[%s691_s23] sm:$0xff]  ;;  %v6339_v1 = vld [vmem:[%s691_s23 + $0x8] sm:$0xff]  ;;  %5662 = vmatprep.subr.mxu0 %v752_v15  ;;  %v914_v41 = vld [vmem:[%s7079_s10 + $0x10] sm:$0xff]  ;;  %vm3155_vm3 = vcmask 130048  }
  0x16   : > { %v707_v2 = vsel %vm706_vm0, %v6337_v0, 0.0  ;;  %v710_v3 = vsel %vm706_vm0, %v6339_v1, 0.0  ;;  %5663 = vmatpush3.msra.mxu0 %v752_v15  ;;  %v835_v38 = vld [vmem:[%s7078_s9] sm:$0xff]  ;;  %v913_v42 = vld [vmem:[%s7079_s10 + $0x8] sm:$0xff]  ;;  %v5240_v47 = vld [vmem:[%s7077_s8 + $0x38] sm:$0xff] }
  0x17   : > { %708 = vadd.xlane.f32.xlu0 %v707_v2  ;;  %5664 = vmatprep.subr.mxu0 %v751_v16  ;;  %v912_v43 = vld [vmem:[%s7079_s10] sm:$0xff]  ;;  %v5239_v49 = vld [vmem:[%s7077_s8 + $0x30] sm:$0xff]  ;;  %v5238_v50 = vld [vmem:[%s7077_s8 + $0x28] sm:$0xff] }
  0x18   : > { %5665 = vmatpush3.msra.mxu0 %v751_v16  ;;  %v5237_v51 = vld [vmem:[%s7077_s8 + $0x20] sm:$0xff]  ;;  %v5246_v14 = vld [vmem:[%s7078_s9 + $0x38] sm:$0xff]  ;;  %v5245_v15 = vld [vmem:[%s7078_s9 + $0x30] sm:$0xff] }
  0x19   : > { %5666 = vmatprep.subr.mxu0 %v750_v17  ;;  %v5244_v16 = vld [vmem:[%s7078_s9 + $0x28] sm:$0xff] }
  0x1a   : > { %5667 = vmatpush3.msra.mxu0 %v750_v17  ;;  %v5226_v26 = vld [vmem:[%s7100_s0] ss:$0 sm:$0xff]  ;;  %s695_s0 = scalar_lea.vmem %s7102_s4, %s5223_s25  ;;  %s700_s25 = scalar_lea.vmem %s7091_s22, %s5418_s29 }
  0x1b   : > { %711 = vadd.xlane.f32.xlu0 %v710_v3  ;;  %5671 = vmatprep.subr.mxu0 %v6204_v18  ;;  %v6396_v39 = vld [vmem:[%s695_s0] sm:$0xff] }
  0xa0   : > { %v709_v4 = vpop.xlane.xlu0 %708 }
  0xa1   : > { %v714_v5 = vmul.f32 0.03125, %v709_v4 }
  0xa3   : > { %v716_v6 = vsub.f32 %v6337_v0, %v714_v5 }
  0xa4   : > { %v712_v7 = vpop.xlane.xlu0 %711 }
  0xa5   : > { %v715_v8 = vmul.f32 0.03125, %v712_v7  ;;  %v718_v9 = vmul.f32 %v716_v6, %v716_v6 }
  0xa7   : > { %v717_v10 = vsub.f32 %v6339_v1, %v715_v8  ;;  %v720_v11 = vsel %vm706_vm0, %v718_v9, 0.0 }
  0xa8   : > { %721 = vadd.xlane.f32.xlu1 %v720_v11 }
  0xa9   : > { %v719_v12 = vmul.f32 %v717_v10, %v717_v10 }
  0xab   : > { %v723_v13 = vsel %vm706_vm0, %v719_v12, 0.0 }
  0xac   : > { %724 = vadd.xlane.f32.xlu1 %v723_v13 }
 0x131   : > { %v722_v19 = vpop.xlane.xlu1 %721 }
 0x132   : > { %v726_v20 = vmul.f32 0.03125, %v722_v19  ;;  %v5243_v19 = vld [vmem:[%s7078_s9 + $0x20] sm:$0xff] }
 0x134   : > { %v728_v21 = vadd.f32 1e-05, %v726_v20 }
 0x135   : > { %v725_v22 = vpop.xlane.xlu1 %724 }
 0x136   : > { %6116 = vrsqrt.f32 %v728_v21  ;;  %v727_v23 = vmul.f32 0.03125, %v725_v22 }
 0x138   : > { %v729_v24 = vadd.f32 1e-05, %v727_v23 }
 0x13a   : > { %6118 = vrsqrt.f32 %v729_v24 }
 0x143   : > { %v6117_v25 = vpop.eup %6116 }
 0x144   : > { %v732_v27 = vmul.f32 %v6117_v25, %v716_v6  ;;  %v5251_v25 = vld [vmem:[%s7079_s10 + $0x38] sm:$0xff] }
 0x146   : > { %v740_v29 = vmul.f32 %v5226_v26, %v732_v27  ;;  %v5249_v27 = vld [vmem:[%s7079_s10 + $0x28] sm:$0xff] }
 0x147   : > { %v6119_v30 = vpop.eup %6118 }
 0x148   : > { %v6368_v31 = vadd.f32 %v5227_v28, %v740_v29  ;;  %v733_v32 = vmul.f32 %v6119_v30, %v717_v10 }
 0x14a   : > { %5668 = vmatprep.mubr.msk.f32.mxu0 %vm706_vm0, %v6368_v31  ;;  %v741_v33 = vmul.f32 %v5226_v26, %v733_v32  ;;  %v5250_v26 = vld [vmem:[%s7079_s10 + $0x30] sm:$0xff] }
 0x14c   : > { %v6372_v34 = vadd.f32 %v5227_v28, %v741_v33  ;;  %v5248_v28 = vld [vmem:[%s7079_s10 + $0x20] sm:$0xff] }
 0x14e   : > { %5669 = vmatmul.mubr.msk.f32.vlgmr.msra.gmra.mxu0 %vm706_vm0, %v6372_v34 }
 0x14f   : > { %5672 = vmatpush3.msra.mxu0 %v838_v35  ;;  %5679 = vmatprep.mubr.msk.f32.mxu0 %vm6205_vm1, %v6204_v18 }
 0x150   : > { %5673 = vmatprep.subr.mxu0 %v6204_v18 }
 0x151   : > { %5674 = vmatpush3.msra.mxu0 %v837_v36 }
 0x152   : > { %5675 = vmatprep.subr.mxu0 %v6204_v18 }
 0x153   : > { %5676 = vmatpush3.msra.mxu0 %v836_v37 }
 0x154   : > { %5677 = vmatprep.subr.mxu0 %v6204_v18 }
 0x155   : > { %5678 = vmatpush3.msra.mxu0 %v835_v38 }
 0x156   : > { %5680 = vmatmul.mubr.msk.f32.vlgmr.msra.gmra.mxu0 %vm706_vm0, %v6396_v39  ;;  %5682 = vmatprep.subr.mxu0 %v6204_v18 }
 0x157   : > { %5683 = vmatpush3.msra.mxu0 %v915_v40  ;;  %5690 = vmatprep.mubr.msk.f32.mxu0 %vm6205_vm1, %v6204_v18 }
 0x158   : > { %5684 = vmatprep.subr.mxu0 %v6204_v18 }
 0x159   : > { %5685 = vmatpush3.msra.mxu0 %v914_v41 }
 0x15a   : > { %5686 = vmatprep.subr.mxu0 %v6204_v18 }
 0x15b   : > { %5687 = vmatpush3.msra.mxu0 %v913_v42 }
 0x15c   : > { %5688 = vmatprep.subr.mxu0 %v6204_v18 }
 0x15d   : > { %5689 = vmatpush3.msra.mxu0 %v912_v43 }
 0x15e   : > { %5691 = vmatmul.mubr.msk.f32.vlgmr.msra.gmra.mxu0 %vm706_vm0, %v6396_v39 }
 0x20e   : > { %v5670_v44 = vpop.f32.mrf.mxu0 }
 0x210   : > { %v826_v45 = vpop.f32.mrf.mxu0 }
 0x211   : > { %5695 = vmatprep.mubr.msk.f32.mxu0 %vm986_vm2, %v826_v45 }
 0x216   : > { %v908_v46 = vpop.f32.mrf.mxu0 }
 0x217   : > { %5693 = vmatprep.subr.msk.mxu0 %vm986_vm2, %v908_v46 }
 0x218   : > { %v5681_v48 = vpop.f32.mrf.mxu0  ;;  %5694 = vmatpush3.xpose.msk.msra.mxu0 %vm986_vm2, %v908_v46 }
 0x219   : > { %5703 = vmatprep.subr.mxu0 %v5240_v47 }
 0x21b   : > { %5696 = vmatmul.mubr.msk.f32.vlgmr.msra.gmra.mxu0 %vm986_vm2, %v5670_v44 }
 0x21c   : > { %5704 = vmatpush3.msra.mxu0 %v5240_v47  ;;  %5711 = vmatprep.mubr.msk.f32.mxu0 %vm706_vm0, %v6368_v31 }
 0x21d   : > { %5705 = vmatprep.subr.mxu0 %v5239_v49 }
 0x21e   : > { %5706 = vmatpush3.msra.mxu0 %v5239_v49  ;;  %v982_v52 = vpop.f32.mrf.mxu0 }
 0x21f   : > { %5707 = vmatprep.subr.mxu0 %v5238_v50  ;;  %5698 = vmatprep.subr.mxu1 %v982_v52 }
 0x220   : > { %5708 = vmatpush3.msra.mxu0 %v5238_v50  ;;  %v5692_v53 = vpop.f32.mrf.mxu0  ;;  %5699 = vmatpush3.msra.mxu1 %v982_v52  ;;  %v1176_v50 = vld [vmem:[%s7080_s11] sm:$0xff] }
 0x221   : > { %5709 = vmatprep.subr.mxu0 %v5237_v51  ;;  %5714 = vmatprep.subr.mxu1 %v6204_v18 }
 0x222   : > { %5710 = vmatpush3.msra.mxu0 %v5237_v51 }
 0x223   : > { %5712 = vmatmul.mubr.msk.f32.vlgmr.msra.gmra.mxu0 %vm706_vm0, %v6372_v34  ;;  %5725 = vmatprep.subr.mxu0 %v6204_v18 }
 0x224   : > { %5733 = vmatprep.mubr.msk.f32.mxu0 %vm6205_vm1, %v6204_v18  ;;  %5726 = vmatpush3.msra.mxu0 %v5251_v25 }
 0x225   : > { %5727 = vmatprep.subr.mxu0 %v6204_v18 }
 0x226   : > { %5728 = vmatpush3.msra.mxu0 %v5250_v26 }
 0x227   : > { %5729 = vmatprep.subr.mxu0 %v6204_v18 }
 0x228   : > { %5730 = vmatpush3.msra.mxu0 %v5249_v27 }
 0x229   : > { %5731 = vmatprep.subr.mxu0 %v6204_v18 }
 0x22a   : > { %5732 = vmatpush3.msra.mxu0 %v5248_v28 }
 0x22b   : > { %5734 = vmatmul.mubr.msk.f32.vlgmr.msra.gmra.mxu0 %vm706_vm0, %v6396_v39 }
 0x2db   : > { %v5697_v54 = vpop.f32.mrf.mxu0 }
 0x2dc   : > { %v1072_v55 = vmul.f32 0.35355338, %v5697_v54 }
 0x2dd   : > { %v1062_v56 = vpop.f32.mrf.mxu0 }
 0x2de   : > { %v1071_v57 = vmul.f32 0.35355338, %v1062_v56  ;;  %v1076_v58 = vsel %vm986_vm2, %v1072_v55, -inf }
 0x2df   : > { %1077 = vmax.xlane.f32.xlu1 %v1076_v58  ;;  %v5272_v58 = vld [vmem:[%s7078_s9 + $0x58] sm:$0xff] }
 0x2e0   : > { %v1073_v59 = vsel %vm986_vm2, %v1071_v57, -inf }
 0x2e1   : > { %1074 = vmax.xlane.f32.xlu0 %v1073_v59  ;;  %v5266_v59 = vld [vmem:[%s7077_s8 + $0x58] sm:$0xff] }
 0x2e3   : > { %v5713_v17 = vpop.f32.mrf.mxu0 }
 0x2e5   : > { %v1248_v20 = vpop.f32.mrf.mxu0 }
 0x2eb   : > { %v1403_v48 = vpop.f32.mrf.mxu0 }
 0x2ed   : > { %v5735_v49 = vpop.f32.mrf.mxu0 }
 0x2ee   : > { %v5287_v49 = vld [vmem:[%s7077_s8 + $0x60] sm:$0xff] }
 0x368   : > { %v1078_v60 = vpop.xlane.xlu1 %1077 }
 0x369   : > { %v1080_v61 = vsub.f32 %v1072_v55, %v1078_v60  ;;  %v5271_v60 = vld [vmem:[%s7078_s9 + $0x50] sm:$0xff] }
 0x36a   : > { %v1075_v62 = vpop.xlane.xlu0 %1074 }
 0x36b   : > { %v1083_v63 = vmul.f32 1.442695, %v1080_v61  ;;  %v1079_v2 = vsub.f32 %v1071_v57, %v1075_v62  ;;  %v5258_v57 = vld [vmem:[%s7080_s11 + $0x8] sm:$0xff]  ;;  %v5269_v62 = vld [vmem:[%s7078_s9 + $0x40] sm:$0xff] }
 0x36c   : > { %5746 = vmatprep.subr.mxu0 %v5258_v57  ;;  %v5270_v61 = vld [vmem:[%s7078_s9 + $0x48] sm:$0xff] }
 0x36d   : > { %6120 = vpow2.f32 %v1083_v63  ;;  %v1081_v3 = vmul.f32 1.442695, %v1079_v2  ;;  %5747 = vmatpush3.msra.mxu0 %v5258_v57 }
 0x36e   : > { %5756 = vmatprep.subr.mxu0 %v5266_v59 }
 0x36f   : > { %6122 = vpow2.f32 %v1081_v3  ;;  %v5265_v3 = vld [vmem:[%s7077_s8 + $0x50] sm:$0xff] }
 0x37a   : > { %v6121_v4 = vpop.eup %6120 }
 0x37b   : > { %v1088_v5 = vsel %vm986_vm2, %v6121_v4, 0.0 }
 0x37c   : > { %v6123_v6 = vpop.eup %6122  ;;  %1089 = vadd.xlane.f32.xlu1 %v1088_v5  ;;  %v5263_v5 = vld [vmem:[%s7077_s8 + $0x40] sm:$0xff] }
 0x37d   : > { %v1085_v7 = vsel %vm986_vm2, %v6123_v6, 0.0 }
 0x37e   : > { %1086 = vadd.xlane.f32.xlu0 %v1085_v7 }
 0x405   : > { %v1090_v8 = vpop.xlane.xlu1 %1089 }
 0x406   : > { %6124 = vrcp.f32 %v1090_v8 }
 0x407   : > { %v1087_v9 = vpop.xlane.xlu0 %1086 }
 0x408   : > { %6126 = vrcp.f32 %v1087_v9 }
 0x413   : > { %v6125_v10 = vpop.eup %6124 }
 0x414   : > { %v1094_v13 = vmul.f32 %v6125_v10, %v6121_v4  ;;  %v5264_v4 = vld [vmem:[%s7077_s8 + $0x48] sm:$0xff] }
 0x415   : > { %v6127_v11 = vpop.eup %6126 }
 0x416   : > { %v1093_v12 = vmul.f32 %v6127_v11, %v6123_v6 }
 0x418   : > { %5700 = vmatprep.mubr.msk.f32.mxu1 %vm986_vm2, %v1093_v12 }
 0x419   : > { %5701 = vmatmul.mubr.msk.f32.vlgmr.msra.gmra.mxu1 %vm986_vm2, %v1094_v13 }
 0x41a   : > { %5715 = vmatpush3.msra.mxu1 %v5246_v14  ;;  %5722 = vmatprep.mubr.msk.f32.mxu1 %vm6205_vm1, %v6204_v18  ;;  %v5277_v14 = vld [vmem:[%s7079_s10 + $0x58] sm:$0xff] }
 0x41b   : > { %5716 = vmatprep.subr.mxu1 %v6204_v18 }
 0x41c   : > { %5717 = vmatpush3.msra.mxu1 %v5245_v15  ;;  %v5276_v15 = vld [vmem:[%s7079_s10 + $0x50] sm:$0xff] }
 0x41d   : > { %5718 = vmatprep.subr.mxu1 %v6204_v18 }
 0x41e   : > { %5719 = vmatpush3.msra.mxu1 %v5244_v16  ;;  %v5275_v16 = vld [vmem:[%s7079_s10 + $0x48] sm:$0xff] }
 0x41f   : > { %5720 = vmatprep.subr.mxu1 %v6204_v18 }
 0x420   : > { %5721 = vmatpush3.msra.mxu1 %v5243_v19 }
 0x421   : > { %5723 = vmatmul.mubr.msk.f32.vlgmr.msra.gmra.mxu1 %vm706_vm0, %v6396_v39 }
 0x422   : > { %5738 = vmatprep.mubr.msk.f32.mxu1 %vm986_vm2, %v1248_v20 }
 0x4d9   : > { %v5702_v21 = vpop.f32.mrf.mxu1 }
 0x4db   : > { %v1167_v22 = vpop.f32.mrf.mxu1 }
 0x4e1   : > { %v1328_v23 = vpop.f32.mrf.mxu1 }
 0x4e2   : > { %5736 = vmatprep.subr.msk.mxu1 %vm986_vm2, %v1328_v23 }
 0x4e3   : > { %v5724_v24 = vpop.f32.mrf.mxu1  ;;  %5737 = vmatpush3.xpose.msk.msra.mxu1 %vm986_vm2, %v1328_v23 }
 0x4e4   : > { %5741 = vmatprep.subr.mxu1 %v1403_v48 }
 0x4e6   : > { %5739 = vmatmul.mubr.msk.f32.vlgmr.msra.gmra.mxu1 %vm986_vm2, %v5713_v17  ;;  %v5274_v17 = vld [vmem:[%s7079_s10 + $0x40] sm:$0xff] }
 0x4e7   : > { %5742 = vmatpush3.msra.mxu1 %v1403_v48  ;;  %v5288_v48 = vld [vmem:[%s7077_s8 + $0x68] sm:$0xff] }
 0x4e8   : > { %5751 = vmatprep.subr.mxu1 %v1176_v50 }
 0x5a6   : > { %v5740_v29 = vpop.f32.mrf.mxu1 }
 0x5a7   : > { %v1492_v30 = vmul.f32 0.35355338, %v5740_v29 }
 0x5a8   : > { %v1482_v32 = vpop.f32.mrf.mxu1 }
 0x5a9   : > { %v1491_v33 = vmul.f32 0.35355338, %v1482_v32  ;;  %v1496_v35 = vsel %vm986_vm2, %v1492_v30, -inf }
 0x5aa   : > { %1497 = vmax.xlane.f32.xlu1 %v1496_v35 }
 0x5ab   : > { %v1493_v36 = vsel %vm986_vm2, %v1491_v33, -inf }
 0x5ac   : > { %1494 = vmax.xlane.f32.xlu0 %v1493_v36 }
 0x633   : > { %v1498_v37 = vpop.xlane.xlu1 %1497 }
 0x634   : > { %v1500_v38 = vsub.f32 %v1492_v30, %v1498_v37 }
 0x635   : > { %v1495_v40 = vpop.xlane.xlu0 %1494 }
 0x636   : > { %v1503_v41 = vmul.f32 1.442695, %v1500_v38  ;;  %v1499_v42 = vsub.f32 %v1491_v33, %v1495_v40  ;;  %v5290_v40 = vld [vmem:[%s7077_s8 + $0x78] sm:$0xff] }
 0x638   : > { %6128 = vpow2.f32 %v1503_v41  ;;  %v1501_v43 = vmul.f32 1.442695, %v1499_v42 }
 0x63a   : > { %6130 = vpow2.f32 %v1501_v43 }
 0x645   : > { %v6129_v44 = vpop.eup %6128 }
 0x646   : > { %v1508_v45 = vsel %vm986_vm2, %v6129_v44, 0.0 }
 0x647   : > { %v6131_v46 = vpop.eup %6130  ;;  %1509 = vadd.xlane.f32.xlu1 %v1508_v45 }
 0x648   : > { %v1505_v47 = vsel %vm986_vm2, %v6131_v46, 0.0 }
 0x649   : > { %1506 = vadd.xlane.f32.xlu0 %v1505_v47  ;;  %v5289_v47 = vld [vmem:[%s7077_s8 + $0x70] sm:$0xff] }
 0x6d0   : > { %v1510_v51 = vpop.xlane.xlu1 %1509 }
 0x6d1   : > { %6132 = vrcp.f32 %v1510_v51 }
 0x6d2   : > { %v1507_v52 = vpop.xlane.xlu0 %1506 }
 0x6d3   : > { %6134 = vrcp.f32 %v1507_v52  ;;  %v5296_v52 = vld [vmem:[%s7078_s9 + $0x78] sm:$0xff] }
 0x6de   : > { %v6133_v53 = vpop.eup %6132 }
 0x6df   : > { %v1514_v56 = vmul.f32 %v6133_v53, %v6129_v44  ;;  %v5294_v53 = vld [vmem:[%s7078_s9 + $0x68] sm:$0xff] }
 0x6e0   : > { %v6135_v54 = vpop.eup %6134 }
 0x6e1   : > { %v1513_v55 = vmul.f32 %v6135_v54, %v6131_v46 }
 0x6e3   : > { %5743 = vmatprep.mubr.msk.f32.mxu1 %vm986_vm2, %v1513_v55  ;;  %v5293_v55 = vld [vmem:[%s7078_s9 + $0x60] sm:$0xff] }
 0x6e4   : > { %5744 = vmatmul.mubr.msk.f32.vlgmr.msra.gmra.mxu1 %vm986_vm2, %v1514_v56 }
 0x6e5   : > { %5753 = vmatprep.mubr.msk.f32.mxu1 %vm986_vm2, %v1167_v22  ;;  %5752 = vmatpush3.msra.mxu1 %v1176_v50 }
 0x6e6   : > { %5767 = vmatprep.subr.mxu1 %v6204_v18 }
 0x6e8   : > { %5754 = vmatmul.mubr.msk.f32.vlgmr.msra.gmra.mxu1 %vm986_vm2, %v5702_v21 }
 0x6e9   : > { %5775 = vmatprep.mubr.msk.f32.mxu1 %vm6205_vm1, %v6204_v18  ;;  %5768 = vmatpush3.msra.mxu1 %v5272_v58 }
 0x6ea   : > { %5769 = vmatprep.subr.mxu1 %v6204_v18 }
 0x6eb   : > { %5770 = vmatpush3.msra.mxu1 %v5271_v60 }
 0x6ec   : > { %5771 = vmatprep.subr.mxu1 %v6204_v18 }
 0x6ed   : > { %5772 = vmatpush3.msra.mxu1 %v5270_v61 }
 0x6ee   : > { %5773 = vmatprep.subr.mxu1 %v6204_v18 }
 0x6ef   : > { %5774 = vmatpush3.msra.mxu1 %v5269_v62 }
 0x6f0   : > { %5776 = vmatmul.mubr.msk.f32.vlgmr.msra.gmra.mxu1 %vm706_vm0, %v6396_v39 }
 0x7a4   : > { %v5745_v63 = vpop.f32.mrf.mxu1 }
 0x7a6   : > { %v1587_v2 = vpop.f32.mrf.mxu1 }
 0x7a7   : > { %5748 = vmatprep.mubr.msk.f32.mxu0 %vm986_vm2, %v1587_v2 }
 0x7a8   : > { %5749 = vmatmul.mubr.msk.f32.vlgmr.msra.gmra.mxu0 %vm986_vm2, %v5745_v63  ;;  %v6546_v6 = vpop.f32.mrf.mxu1 }
 0x7a9   : > { %5757 = vmatpush3.msra.mxu0 %v5266_v59  ;;  %5764 = vmatprep.mubr.msk.f32.mxu0 %vm706_vm0, %v6368_v31 }
 0x7aa   : > { %5758 = vmatprep.subr.mxu0 %v5265_v3  ;;  %v6548_v7 = vpop.f32.mrf.mxu1 }
 0x7ab   : > { %5759 = vmatpush3.msra.mxu0 %v5265_v3  ;;  %v5301_v3 = vld [vmem:[%s7079_s10 + $0x78] sm:$0xff] }
 0x7ac   : > { %5760 = vmatprep.subr.mxu0 %v5264_v4 }
 0x7ad   : > { %5761 = vmatpush3.msra.mxu0 %v5264_v4  ;;  %v5300_v4 = vld [vmem:[%s7079_s10 + $0x70] sm:$0xff] }
 0x7ae   : > { %5762 = vmatprep.subr.mxu0 %v5263_v5 }
 0x7af   : > { %5763 = vmatpush3.msra.mxu0 %v5263_v5  ;;  %v5299_v5 = vld [vmem:[%s7079_s10 + $0x68] sm:$0xff] }
 0x7b0   : > { %5765 = vmatmul.mubr.msk.f32.vlgmr.msra.gmra.mxu0 %vm706_vm0, %v6372_v34  ;;  %5778 = vmatprep.subr.mxu0 %v6204_v18  ;;  %v1911_v8 = vpop.f32.mrf.mxu1 }
 0x7b1   : > { %5786 = vmatprep.mubr.msk.f32.mxu0 %vm6205_vm1, %v6204_v18  ;;  %5789 = vmatprep.subr.msk.mxu1 %vm986_vm2, %v1911_v8 }
 0x7b2   : > { %v5777_v9 = vpop.f32.mrf.mxu1  ;;  %5790 = vmatpush3.xpose.msk.msra.mxu1 %vm986_vm2, %v1911_v8  ;;  %5779 = vmatpush3.msra.mxu0 %v5277_v14 }
 0x7b3   : > { %5780 = vmatprep.subr.mxu0 %v6204_v18 }
 0x7b4   : > { %5781 = vmatpush3.msra.mxu0 %v5276_v15 }
 0x7b5   : > { %5782 = vmatprep.subr.mxu0 %v6204_v18 }
 0x7b6   : > { %5783 = vmatpush3.msra.mxu0 %v5275_v16 }
 0x7b7   : > { %5784 = vmatprep.subr.mxu0 %v6204_v18 }
 0x7b8   : > { %5785 = vmatpush3.msra.mxu0 %v5274_v17 }
 0x7b9   : > { %5787 = vmatmul.mubr.msk.f32.vlgmr.msra.gmra.mxu0 %vm706_vm0, %v6396_v39 }
 0x868   : > { %v6552_v10 = vpop.f32.mrf.mxu0 }
 0x869   : > { %v1757_v57 = vadd.f32 %v6546_v6, %v6552_v10  ;;  %v5298_v6 = vld [vmem:[%s7079_s10 + $0x60] sm:$0xff] }
 0x86a   : > { %v6554_v11 = vpop.f32.mrf.mxu0 }
 0x86b   : > { %v1752_v59 = vadd.f32 %v6548_v7, %v6554_v11 }
 0x870   : > { %v5766_v12 = vpop.f32.mrf.mxu0 }
 0x872   : > { %v1831_v13 = vpop.f32.mrf.mxu0 }
 0x873   : > { %5791 = vmatprep.mubr.msk.f32.mxu1 %vm986_vm2, %v1831_v13 }
 0x874   : > { %5792 = vmatmul.mubr.msk.f32.vlgmr.msra.gmra.mxu1 %vm986_vm2, %v5766_v12 }
 0x879   : > { %v1986_v37 = vpop.f32.mrf.mxu0 }
 0x87a   : > { %5794 = vmatprep.subr.mxu1 %v1986_v37 }
 0x87b   : > { %v5788_v38 = vpop.f32.mrf.mxu0  ;;  %5795 = vmatpush3.msra.mxu1 %v1986_v37 }
 0x87c   : > { %5804 = vmatprep.subr.mxu1 %v5290_v40 }
 0x934   : > { %v5793_v19 = vpop.f32.mrf.mxu1 }
 0x935   : > { %v2075_v20 = vmul.f32 0.35355338, %v5793_v19 }
 0x936   : > { %v2065_v21 = vpop.f32.mrf.mxu1 }
 0x937   : > { %v2074_v22 = vmul.f32 0.35355338, %v2065_v21  ;;  %v2079_v23 = vsel %vm986_vm2, %v2075_v20, -inf }
 0x938   : > { %2080 = vmax.xlane.f32.xlu1 %v2079_v23 }
 0x939   : > { %v2076_v24 = vsel %vm986_vm2, %v2074_v22, -inf }
 0x93a   : > { %2077 = vmax.xlane.f32.xlu0 %v2076_v24 }
 0x9c1   : > { %v2081_v25 = vpop.xlane.xlu1 %2080 }
 0x9c2   : > { %v2083_v26 = vsub.f32 %v2075_v20, %v2081_v25 }
 0x9c3   : > { %v2078_v27 = vpop.xlane.xlu0 %2077 }
 0x9c4   : > { %v2086_v28 = vmul.f32 1.442695, %v2083_v26  ;;  %v2082_v29 = vsub.f32 %v2074_v22, %v2078_v27 }
 0x9c6   : > { %6136 = vpow2.f32 %v2086_v28  ;;  %v2084_v30 = vmul.f32 1.442695, %v2082_v29 }
 0x9c8   : > { %6138 = vpow2.f32 %v2084_v30  ;;  %v5308_v30 = vld [vmem:[%s7080_s11 + $0x18] sm:$0xff] }
 0x9d3   : > { %v6137_v32 = vpop.eup %6136 }
 0x9d4   : > { %v2091_v33 = vsel %vm986_vm2, %v6137_v32, 0.0 }
 0x9d5   : > { %v6139_v35 = vpop.eup %6138  ;;  %2092 = vadd.xlane.f32.xlu1 %v2091_v33 }
 0x9d6   : > { %v2088_v36 = vsel %vm986_vm2, %v6139_v35, 0.0 }
 0x9d7   : > { %2089 = vadd.xlane.f32.xlu0 %v2088_v36  ;;  %v5311_v36 = vld [vmem:[%s7081_s12] ss:$0 sm:$0xff] }
 0xa5e   : > { %v2093_v41 = vpop.xlane.xlu1 %2092 }
 0xa5f   : > { %6140 = vrcp.f32 %v2093_v41 }
 0xa60   : > { %v2090_v42 = vpop.xlane.xlu0 %2089 }
 0xa61   : > { %6142 = vrcp.f32 %v2090_v42 }
 0xa6c   : > { %v6141_v43 = vpop.eup %6140 }
 0xa6d   : > { %v2097_v46 = vmul.f32 %v6141_v43, %v6137_v32 }
 0xa6e   : > { %v6143_v44 = vpop.eup %6142 }
 0xa6f   : > { %v2096_v45 = vmul.f32 %v6143_v44, %v6139_v35 }
 0xa71   : > { %5796 = vmatprep.mubr.msk.f32.mxu1 %vm986_vm2, %v2096_v45 }
 0xa72   : > { %5797 = vmatmul.mubr.msk.f32.vlgmr.msra.gmra.mxu1 %vm986_vm2, %v2097_v46 }
 0xa73   : > { %5805 = vmatpush3.msra.mxu1 %v5290_v40  ;;  %5812 = vmatprep.mubr.msk.f32.mxu1 %vm706_vm0, %v6368_v31  ;;  %v5284_v31 = vld [vmem:[%s7080_s11 + $0x10] sm:$0xff] }
 0xa74   : > { %5806 = vmatprep.subr.mxu1 %v5289_v47  ;;  %5799 = vmatprep.subr.mxu0 %v5284_v31 }
 0xa75   : > { %5807 = vmatpush3.msra.mxu1 %v5289_v47  ;;  %5800 = vmatpush3.msra.mxu0 %v5284_v31 }
 0xa76   : > { %5808 = vmatprep.subr.mxu1 %v5288_v48  ;;  %5815 = vmatprep.subr.mxu0 %v6204_v18 }
 0xa77   : > { %5809 = vmatpush3.msra.mxu1 %v5288_v48 }
 0xa78   : > { %5810 = vmatprep.subr.mxu1 %v5287_v49 }
 0xa79   : > { %5811 = vmatpush3.msra.mxu1 %v5287_v49 }
 0xa7a   : > { %5813 = vmatmul.mubr.msk.f32.vlgmr.msra.gmra.mxu1 %vm706_vm0, %v6372_v34  ;;  %5826 = vmatprep.subr.mxu1 %v6204_v18  ;;  %v5295_v34 = vld [vmem:[%s7078_s9 + $0x70] sm:$0xff] }
 0xa7b   : > { %5834 = vmatprep.mubr.msk.f32.mxu1 %vm6205_vm1, %v6204_v18  ;;  %5827 = vmatpush3.msra.mxu1 %v5301_v3 }
 0xa7c   : > { %5828 = vmatprep.subr.mxu1 %v6204_v18 }
 0xa7d   : > { %5829 = vmatpush3.msra.mxu1 %v5300_v4 }
 0xa7e   : > { %5830 = vmatprep.subr.mxu1 %v6204_v18 }
 0xa7f   : > { %5831 = vmatpush3.msra.mxu1 %v5299_v5 }
 0xa80   : > { %5832 = vmatprep.subr.mxu1 %v6204_v18 }
 0xa81   : > { %5833 = vmatpush3.msra.mxu1 %v5298_v6 }
 0xa82   : > { %5835 = vmatmul.mubr.msk.f32.vlgmr.msra.gmra.mxu1 %vm706_vm0, %v6396_v39  ;;  %5847 = vmatprep.subr.mxu1 %v5308_v30 }
 0xa83   : > { %5848 = vmatpush3.msra.mxu1 %v5308_v30  ;;  %v5339_v30 = vld [vmem:[%s7084_s15 + $0x28] sm:$0xff] }
 0xb32   : > { %v5798_v50 = vpop.f32.mrf.mxu1 }
 0xb34   : > { %v2170_v51 = vpop.f32.mrf.mxu1 }
 0xb35   : > { %5801 = vmatprep.mubr.msk.f32.mxu0 %vm986_vm2, %v2170_v51 }
 0xb36   : > { %5802 = vmatmul.mubr.msk.f32.vlgmr.msra.gmra.mxu0 %vm986_vm2, %v5798_v50 }
 0xb37   : > { %5816 = vmatpush3.msra.mxu0 %v5296_v52  ;;  %5823 = vmatprep.mubr.msk.f32.mxu0 %vm6205_vm1, %v6204_v18 }
 0xb38   : > { %5817 = vmatprep.subr.mxu0 %v6204_v18 }
 0xb39   : > { %5818 = vmatpush3.msra.mxu0 %v5295_v34 }
 0xb3a   : > { %v5814_v54 = vpop.f32.mrf.mxu1  ;;  %5819 = vmatprep.subr.mxu0 %v6204_v18 }
 0xb3b   : > { %5820 = vmatpush3.msra.mxu0 %v5294_v53  ;;  %v2826_v53 = vld [vmem:[%s7082_s13 + $0x18] sm:$0xff] }
 0xb3c   : > { %5821 = vmatprep.subr.mxu0 %v6204_v18  ;;  %v2335_v56 = vpop.f32.mrf.mxu1 }
 0xb3d   : > { %5822 = vmatpush3.msra.mxu0 %v5293_v55  ;;  %v2825_v55 = vld [vmem:[%s7082_s13 + $0x10] sm:$0xff] }
 0xb3e   : > { %5824 = vmatmul.mubr.msk.f32.vlgmr.msra.gmra.mxu0 %vm706_vm0, %v6396_v39 }
 0xb3f   : > { %5839 = vmatprep.mubr.msk.f32.mxu0 %vm986_vm2, %v2335_v56  ;;  %v2910_v56 = vld [vmem:[%s7083_s14 + $0x10] sm:$0xff] }
 0xb42   : > { %v2490_v22 = vpop.f32.mrf.mxu1 }
 0xb44   : > { %v5836_v23 = vpop.f32.mrf.mxu1 }
 0xbf6   : > { %v5803_v58 = vpop.f32.mrf.mxu0 }
 0xbf7   : > { %v6630_v60 = vadd.f32 %v5803_v58, %v1757_v57  ;;  %v2824_v57 = vld [vmem:[%s7082_s13 + $0x8] sm:$0xff] }
 0xbf8   : > { %v2253_v61 = vpop.f32.mrf.mxu0  ;;  %v2909_v58 = vld [vmem:[%s7083_s14 + $0x8] sm:$0xff] }
 0xbf9   : > { %v6632_v62 = vadd.f32 %v2253_v61, %v1752_v59  ;;  %v2823_v59 = vld [vmem:[%s7082_s13] sm:$0xff]  ;;  %v2990_v61 = vld [vmem:[%s7084_s15 + $0x18] sm:$0xff] }
 0xbfe   : > { %v2415_v63 = vpop.f32.mrf.mxu0 }
 0xbff   : > { %5837 = vmatprep.subr.msk.mxu0 %vm986_vm2, %v2415_v63 }
 0xc00   : > { %v5825_v2 = vpop.f32.mrf.mxu0  ;;  %5838 = vmatpush3.xpose.msk.msra.mxu0 %vm986_vm2, %v2415_v63 }
 0xc01   : > { %5842 = vmatprep.subr.mxu0 %v2490_v22 }
 0xc03   : > { %5840 = vmatmul.mubr.msk.f32.vlgmr.msra.gmra.mxu0 %vm986_vm2, %v5814_v54  ;;  %v2911_v54 = vld [vmem:[%s7083_s14 + $0x18] sm:$0xff] }
 0xc04   : > { %5843 = vmatpush3.msra.mxu0 %v2490_v22  ;;  %5863 = vmatprep.subr.mxu1 %v2911_v54  ;;  %v5329_v22 = vld [vmem:[%s7082_s13 + $0x38] sm:$0xff] }
 0xc05   : > { %5852 = vmatprep.subr.mxu0 %v2826_v53 }
 0xcc3   : > { %v5841_v7 = vpop.f32.mrf.mxu0 }
 0xcc4   : > { %v2579_v8 = vmul.f32 0.35355338, %v5841_v7  ;;  %v5312_v7 = vld [vmem:[%s7103_s26] ss:$0 sm:$0xff]  ;;  %s7105_s26 = sld [smem:[#allocation8_spill]] }
 0xcc5   : > { %v2569_v9 = vpop.f32.mrf.mxu0 }
 0xcc6   : > { %v2578_v10 = vmul.f32 0.35355338, %v2569_v9  ;;  %v2583_v11 = vsel %vm986_vm2, %v2579_v8, -inf }
 0xcc7   : > { %2584 = vmax.xlane.f32.xlu1 %v2583_v11 }
 0xcc8   : > { %v2580_v12 = vsel %vm986_vm2, %v2578_v10, -inf }
 0xcc9   : > { %2581 = vmax.xlane.f32.xlu0 %v2580_v12  ;;  %v5313_v12 = vld [vmem:[%s7104_s30] ss:$0 sm:$0xff] }
 0xd50   : > { %v2585_v13 = vpop.xlane.xlu1 %2584 }
 0xd51   : > { %v2587_v14 = vsub.f32 %v2579_v8, %v2585_v13 }
 0xd52   : > { %v2582_v15 = vpop.xlane.xlu0 %2581 }
 0xd53   : > { %v2590_v16 = vmul.f32 1.442695, %v2587_v14  ;;  %v2586_v17 = vsub.f32 %v2578_v10, %v2582_v15 }
 0xd55   : > { %6144 = vpow2.f32 %v2590_v16  ;;  %v2588_v18 = vmul.f32 1.442695, %v2586_v17  ;;  %v2989_v16 = vld [vmem:[%s7084_s15 + $0x10] sm:$0xff]  ;;  %v2988_v17 = vld [vmem:[%s7084_s15 + $0x8] sm:$0xff] }
 0xd57   : > { %6146 = vpow2.f32 %v2588_v18  ;;  %v2987_v18 = vld [vmem:[%s7084_s15] sm:$0xff] }
 0xd62   : > { %v6145_v19 = vpop.eup %6144 }
 0xd63   : > { %v2595_v39 = vsel %vm986_vm2, %v6145_v19, 0.0 }
 0xd64   : > { %v6147_v20 = vpop.eup %6146  ;;  %2596 = vadd.xlane.f32.xlu1 %v2595_v39 }
 0xd65   : > { %v2592_v21 = vsel %vm986_vm2, %v6147_v20, 0.0 }
 0xd66   : > { %2593 = vadd.xlane.f32.xlu0 %v2592_v21 }
 0xded   : > { %v2597_v24 = vpop.xlane.xlu1 %2596 }
 0xdee   : > { %6148 = vrcp.f32 %v2597_v24  ;;  %v5328_v24 = vld [vmem:[%s7082_s13 + $0x30] sm:$0xff] }
 0xdef   : > { %v2594_v25 = vpop.xlane.xlu0 %2593 }
 0xdf0   : > { %6150 = vrcp.f32 %v2594_v25 }
 0xdfb   : > { %v6149_v26 = vpop.eup %6148 }
 0xdfc   : > { %v2601_v29 = vmul.f32 %v6149_v26, %v6145_v19  ;;  %v5327_v26 = vld [vmem:[%s7082_s13 + $0x28] sm:$0xff] }
 0xdfd   : > { %v6151_v27 = vpop.eup %6150 }
 0xdfe   : > { %v2600_v28 = vmul.f32 %v6151_v27, %v6147_v20  ;;  %v5326_v27 = vld [vmem:[%s7082_s13 + $0x20] sm:$0xff] }
 0xe00   : > { %5844 = vmatprep.mubr.msk.f32.mxu0 %vm986_vm2, %v2600_v28  ;;  %v5341_v28 = vld [vmem:[%s7084_s15 + $0x38] sm:$0xff] }
 0xe01   : > { %5845 = vmatmul.mubr.msk.f32.vlgmr.msra.gmra.mxu0 %vm986_vm2, %v2601_v29  ;;  %v5340_v29 = vld [vmem:[%s7084_s15 + $0x30] sm:$0xff] }
 0xe02   : > { %5853 = vmatpush3.msra.mxu0 %v2826_v53  ;;  %v5335_v53 = vld [vmem:[%s7083_s14 + $0x38] sm:$0xff] }
 0xe03   : > { %5854 = vmatprep.subr.mxu0 %v2825_v55 }
 0xe04   : > { %5855 = vmatpush3.msra.mxu0 %v2825_v55 }
 0xe05   : > { %5856 = vmatprep.subr.mxu0 %v2824_v57 }
 0xe06   : > { %5857 = vmatpush3.msra.mxu0 %v2824_v57 }
 0xe07   : > { %5858 = vmatprep.subr.mxu0 %v2823_v59 }
 0xe08   : > { %5859 = vmatpush3.msra.mxu0 %v2823_v59 }
 0xe09   : > { %5874 = vmatprep.subr.mxu0 %v2990_v61 }
 0xec1   : > { %v5846_v32 = vpop.f32.mrf.mxu0 }
 0xec3   : > { %v2674_v33 = vpop.f32.mrf.mxu0 }
 0xec4   : > { %5849 = vmatprep.mubr.msk.f32.mxu1 %vm986_vm2, %v2674_v33 }
 0xec5   : > { %5850 = vmatmul.mubr.msk.f32.vlgmr.msra.gmra.mxu1 %vm986_vm2, %v5846_v32  ;;  %v5338_v32 = vld [vmem:[%s7084_s15 + $0x20] sm:$0xff] }
 0xec6   : > { %5864 = vmatpush3.msra.mxu1 %v2911_v54 }
 0xec7   : > { %5865 = vmatprep.subr.mxu1 %v2910_v56 }
 0xec8   : > { %5866 = vmatpush3.msra.mxu1 %v2910_v56 }
 0xec9   : > { %5867 = vmatprep.subr.mxu1 %v2909_v58 }
 0xeca   : > { %5868 = vmatpush3.msra.mxu1 %v2909_v58 }
 0xf85   : > { %v5851_v35 = vpop.f32.mrf.mxu1 }
 0xf86   : > { %v2767_v37 = vadd.f32 %v5851_v35, %v6630_v60  ;;  %v2908_v60 = vld [vmem:[%s7083_s14] sm:$0xff] }
 0xf87   : > { %v2757_v38 = vpop.f32.mrf.mxu1  ;;  %5869 = vmatprep.subr.mxu1 %v2908_v60 }
 0xf88   : > { %v2776_v40 = vadd.f32 %v5311_v36, %v2767_v37  ;;  %v2766_v41 = vadd.f32 %v2757_v38, %v6632_v62  ;;  %5870 = vmatpush3.msra.mxu1 %v2908_v60  ;;  %v5334_v60 = vld [vmem:[%s7083_s14 + $0x30] sm:$0xff] }
 0xf8a   : > { %v6671_v42 = vadd.f32 %v2776_v40, %v6339_v1  ;;  %v2775_v43 = vadd.f32 %v5311_v36, %v2766_v41 }
 0xf8c   : > { %v6674_v44 = vadd.f32 %v2775_v43, %v6337_v0  ;;  %v2784_v45 = vsel %vm706_vm0, %v6671_v42, 0.0 }
 0xf8d   : > { %2785 = vadd.xlane.f32.xlu1 %v2784_v45 }
 0xf8e   : > { %v2781_v46 = vsel %vm706_vm0, %v6674_v44, 0.0 }
 0xf8f   : > { %2782 = vadd.xlane.f32.xlu0 %v2781_v46 }
0x1016   : > { %v2786_v47 = vpop.xlane.xlu1 %2785 }
0x1017   : > { %v2788_v48 = vmul.f32 0.03125, %v2786_v47 }
0x1018   : > { %v2783_v49 = vpop.xlane.xlu0 %2782 }
0x1019   : > { %v2790_v31 = vsub.f32 %v6671_v42, %v2788_v48  ;;  %v2787_v50 = vmul.f32 0.03125, %v2783_v49 }
0x101b   : > { %v2789_v1 = vsub.f32 %v6674_v44, %v2787_v50  ;;  %v2792_v51 = vmul.f32 %v2790_v31, %v2790_v31 }
0x101d   : > { %v2796_v0 = vsel %vm706_vm0, %v2792_v51, 0.0  ;;  %v2791_v52 = vmul.f32 %v2789_v1, %v2789_v1 }
0x101e   : > { %2797 = vadd.xlane.f32.xlu1 %v2796_v0 }
0x101f   : > { %v2793_v34 = vsel %vm706_vm0, %v2791_v52, 0.0 }
0x1020   : > { %2794 = vadd.xlane.f32.xlu0 %v2793_v34 }
0x10a7   : > { %v2798_v62 = vpop.xlane.xlu1 %2797 }
0x10a8   : > { %v2800_v63 = vmul.f32 0.03125, %v2798_v62  ;;  %v5332_v62 = vld [vmem:[%s7083_s14 + $0x20] sm:$0xff] }
0x10a9   : > { %v2795_v2 = vpop.xlane.xlu0 %2794 }
0x10aa   : > { %v2802_v3 = vadd.f32 1e-05, %v2800_v63  ;;  %v2799_v4 = vmul.f32 0.03125, %v2795_v2 }
0x10ac   : > { %6152 = vrsqrt.f32 %v2802_v3  ;;  %v2801_v5 = vadd.f32 1e-05, %v2799_v4 }
0x10ae   : > { %6154 = vrsqrt.f32 %v2801_v5 }
0x10b9   : > { %v6153_v6 = vpop.eup %6152 }
0x10ba   : > { %v2806_v8 = vmul.f32 %v6153_v6, %v2790_v31 }
0x10bb   : > { %v6155_v9 = vpop.eup %6154 }
0x10bc   : > { %v2805_v10 = vmul.f32 %v6155_v9, %v2789_v1  ;;  %v2814_v11 = vmul.f32 %v5312_v7, %v2806_v8 }
0x10be   : > { %v2813_v13 = vmul.f32 %v5312_v7, %v2805_v10  ;;  %v6719_v15 = vadd.f32 %v5313_v12, %v2814_v11 }
0x10c0   : > { %v6717_v14 = vadd.f32 %v5313_v12, %v2813_v13 }
0x10c2   : > { %5860 = vmatprep.mubr.msk.f32.mxu0 %vm706_vm0, %v6717_v14  ;;  %5871 = vmatprep.mubr.msk.f32.mxu1 %vm706_vm0, %v6717_v14 }
0x10c3   : > { %5861 = vmatmul.mubr.msk.f32.vlgmr.msra.gmra.mxu0 %vm706_vm0, %v6719_v15  ;;  %5872 = vmatmul.mubr.msk.f32.vlgmr.msra.gmra.mxu1 %vm706_vm0, %v6719_v15 }
0x10c4   : > { %5875 = vmatpush3.msra.mxu0 %v2990_v61  ;;  %5882 = vmatprep.mubr.msk.f32.mxu0 %vm706_vm0, %v6717_v14  ;;  %v5333_v61 = vld [vmem:[%s7083_s14 + $0x28] sm:$0xff] }
0x10c5   : > { %5876 = vmatprep.subr.mxu0 %v2989_v16 }
0x10c6   : > { %5877 = vmatpush3.msra.mxu0 %v2989_v16 }
0x10c7   : > { %5878 = vmatprep.subr.mxu0 %v2988_v17 }
0x10c8   : > { %5879 = vmatpush3.msra.mxu0 %v2988_v17 }
0x10c9   : > { %5880 = vmatprep.subr.mxu0 %v2987_v18 }
0x10ca   : > { %5881 = vmatpush3.msra.mxu0 %v2987_v18 }
0x10cb   : > { %5883 = vmatmul.mubr.msk.f32.vlgmr.msra.gmra.mxu0 %vm706_vm0, %v6719_v15 }
0x1183   : > { %v5862_v19 = vpop.f32.mrf.mxu0  ;;  %v5873_v39 = vpop.f32.mrf.mxu1 }
0x1184   : > { %5885 = vmatprep.subr.msk.mxu1 %vm986_vm2, %v5873_v39 }
0x1185   : > { %v2899_v20 = vpop.f32.mrf.mxu0  ;;  %v2978_v21 = vpop.f32.mrf.mxu1  ;;  %5886 = vmatpush3.xpose.msk.msra.mxu1 %vm986_vm2, %v5873_v39 }
0x1186   : > { %5887 = vmatprep.subr.msk.mxu1 %vm986_vm2, %v2978_v21  ;;  %5889 = vmatprep.mubr.msk.f32.mxu1 %vm986_vm2, %v2899_v20 }
0x1189   : > { %5888 = vmatpush3.xpose.msk.msra.mxu1 %vm986_vm2, %v2978_v21 }
0x118a   : > { %5899 = vmatprep.subr.mxu1 %v5329_v22 }
0x118b   : > { %v5884_v23 = vpop.f32.mrf.mxu0 }
0x118c   : > { %5892 = vmatprep.subr.mxu0 %v5884_v23  ;;  %5890 = vmatmul.mubr.msk.f32.vlgmr.msra.gmra.mxu1 %vm986_vm2, %v5862_v19 }
0x118d   : > { %v3057_v25 = vpop.f32.mrf.mxu0  ;;  %5893 = vmatpush3.msra.mxu0 %v5884_v23  ;;  %5900 = vmatpush3.msra.mxu1 %v5329_v22  ;;  %v3259_v22 = vld [vmem:[%s7085_s16] sm:$0xff] }
0x118e   : > { %5894 = vmatprep.subr.mxu0 %v3057_v25  ;;  %5907 = vmatprep.mubr.msk.f32.mxu1 %vm706_vm0, %v6717_v14 }
0x118f   : > { %5895 = vmatpush3.msra.mxu0 %v3057_v25  ;;  %5901 = vmatprep.subr.mxu1 %v5328_v24 }
0x1190   : > { %5902 = vmatpush3.msra.mxu1 %v5328_v24  ;;  %5910 = vmatprep.subr.mxu0 %v5335_v53 }
0x1191   : > { %5903 = vmatprep.subr.mxu1 %v5327_v26 }
0x1192   : > { %5904 = vmatpush3.msra.mxu1 %v5327_v26 }
0x1193   : > { %5905 = vmatprep.subr.mxu1 %v5326_v27 }
0x1194   : > { %5906 = vmatpush3.msra.mxu1 %v5326_v27 }
0x1195   : > { %5908 = vmatmul.mubr.msk.f32.vlgmr.msra.gmra.mxu1 %vm706_vm0, %v6719_v15  ;;  %5921 = vmatprep.subr.mxu1 %v5341_v28 }
0x1196   : > { %5922 = vmatpush3.msra.mxu1 %v5341_v28  ;;  %5929 = vmatprep.mubr.msk.f32.mxu1 %vm706_vm0, %v6717_v14 }
0x1197   : > { %5923 = vmatprep.subr.mxu1 %v5340_v29 }
0x1198   : > { %5924 = vmatpush3.msra.mxu1 %v5340_v29  ;;  %v5364_v29 = vld [vmem:[%s7083_s14 + $0x58] sm:$0xff] }
0x1199   : > { %5925 = vmatprep.subr.mxu1 %v5339_v30 }
0x119a   : > { %5926 = vmatpush3.msra.mxu1 %v5339_v30  ;;  %v5363_v30 = vld [vmem:[%s7083_s14 + $0x50] sm:$0xff] }
0x119b   : > { %5927 = vmatprep.subr.mxu1 %v5338_v32 }
0x119c   : > { %5928 = vmatpush3.msra.mxu1 %v5338_v32  ;;  %v5362_v32 = vld [vmem:[%s7083_s14 + $0x48] sm:$0xff] }
0x119d   : > { %5930 = vmatmul.mubr.msk.f32.vlgmr.msra.gmra.mxu1 %vm706_vm0, %v6719_v15 }
0x124c   : > { %v5891_v33 = vpop.f32.mrf.mxu1 }
0x124d   : > { %v3154_v35 = vmul.f32 0.35355338, %v5891_v33  ;;  %v5361_v33 = vld [vmem:[%s7083_s14 + $0x40] sm:$0xff] }
0x124e   : > { %v3144_v36 = vpop.f32.mrf.mxu1 }
0x124f   : > { %v3153_v37 = vmul.f32 0.35355338, %v3144_v36  ;;  %v3159_v38 = vsel %vm3155_vm3, %v3154_v35, -inf  ;;  %v5358_v36 = vld [vmem:[%s7082_s13 + $0x58] sm:$0xff] }
0x1250   : > { %3160 = vmax.xlane.f32.xlu1 %v3159_v38 }
0x1251   : > { %v3156_v40 = vsel %vm3155_vm3, %v3153_v37, -inf }
0x1252   : > { %3157 = vmax.xlane.f32.xlu0 %v3156_v40  ;;  %v5357_v40 = vld [vmem:[%s7082_s13 + $0x50] sm:$0xff] }
0x1255   : > { %v5909_v41 = vpop.f32.mrf.mxu1 }
0x1257   : > { %v3331_v43 = vpop.f32.mrf.mxu1 }
0x125d   : > { %v5931_v45 = vpop.f32.mrf.mxu1 }
0x125e   : > { %5939 = vmatprep.subr.mxu1 %v5931_v45 }
0x125f   : > { %v3491_v46 = vpop.f32.mrf.mxu1  ;;  %5940 = vmatpush3.msra.mxu1 %v5931_v45  ;;  %v5355_v45 = vld [vmem:[%s7082_s13 + $0x40] sm:$0xff] }
0x1260   : > { %5941 = vmatprep.subr.mxu1 %v3491_v46 }
0x1261   : > { %5942 = vmatpush3.msra.mxu1 %v3491_v46  ;;  %v5370_v46 = vld [vmem:[%s7084_s15 + $0x58] sm:$0xff] }
0x1262   : > { %5951 = vmatprep.subr.mxu1 %v3259_v22 }
0x12d9   : > { %v3161_v47 = vpop.xlane.xlu1 %3160 }
0x12da   : > { %v3163_v48 = vsub.f32 %v3154_v35, %v3161_v47  ;;  %v5350_v35 = vld [vmem:[%s7085_s16 + $0x8] sm:$0xff] }
0x12db   : > { %v3158_v49 = vpop.xlane.xlu0 %3157 }
0x12dc   : > { %v3166_v31 = vmul.f32 1.442695, %v3163_v48  ;;  %v3162_v50 = vsub.f32 %v3153_v37, %v3158_v49  ;;  %v5369_v48 = vld [vmem:[%s7084_s15 + $0x50] sm:$0xff] }
0x12de   : > { %6156 = vpow2.f32 %v3166_v31  ;;  %v3164_v1 = vmul.f32 1.442695, %v3162_v50  ;;  %v5368_v31 = vld [vmem:[%s7084_s15 + $0x48] sm:$0xff] }
0x12e0   : > { %6158 = vpow2.f32 %v3164_v1  ;;  %v5367_v1 = vld [vmem:[%s7084_s15 + $0x40] sm:$0xff] }
0x12eb   : > { %v6157_v51 = vpop.eup %6156 }
0x12ec   : > { %v3171_v0 = vsel %vm3155_vm3, %v6157_v51, 0.0 }
0x12ed   : > { %v6159_v52 = vpop.eup %6158  ;;  %3172 = vadd.xlane.f32.xlu1 %v3171_v0 }
0x12ee   : > { %v3168_v34 = vsel %vm3155_vm3, %v6159_v52, 0.0 }
0x12ef   : > { %3169 = vadd.xlane.f32.xlu0 %v3168_v34 }
0x1376   : > { %v3173_v54 = vpop.xlane.xlu1 %3172 }
0x1377   : > { %6160 = vrcp.f32 %v3173_v54 }
0x1378   : > { %v3170_v55 = vpop.xlane.xlu0 %3169 }
0x1379   : > { %6162 = vrcp.f32 %v3170_v55 }
0x1384   : > { %v6161_v56 = vpop.eup %6160 }
0x1385   : > { %v3177_v59 = vmul.f32 %v6161_v56, %v6157_v51 }
0x1386   : > { %v6163_v57 = vpop.eup %6162 }
0x1387   : > { %v3176_v58 = vmul.f32 %v6163_v57, %v6159_v52 }
0x1389   : > { %5896 = vmatprep.mubr.msk.f32.mxu0 %vm3155_vm3, %v3176_v58 }
0x138a   : > { %5897 = vmatmul.mubr.msk.f32.vlgmr.msra.gmra.mxu0 %vm3155_vm3, %v3177_v59 }
0x138b   : > { %5911 = vmatpush3.msra.mxu0 %v5335_v53  ;;  %5918 = vmatprep.mubr.msk.f32.mxu0 %vm706_vm0, %v6717_v14 }
0x138c   : > { %5912 = vmatprep.subr.mxu0 %v5334_v60 }
0x138d   : > { %5913 = vmatpush3.msra.mxu0 %v5334_v60 }
0x138e   : > { %5914 = vmatprep.subr.mxu0 %v5333_v61 }
0x138f   : > { %5915 = vmatpush3.msra.mxu0 %v5333_v61 }
0x1390   : > { %5916 = vmatprep.subr.mxu0 %v5332_v62 }
0x1391   : > { %5917 = vmatpush3.msra.mxu0 %v5332_v62 }
0x1392   : > { %5919 = vmatmul.mubr.msk.f32.vlgmr.msra.gmra.mxu0 %vm706_vm0, %v6719_v15 }
0x1393   : > { %5936 = vmatprep.mubr.msk.f32.mxu0 %vm986_vm2, %v3331_v43 }
0x144a   : > { %v5898_v63 = vpop.f32.mrf.mxu0 }
0x144c   : > { %v3250_v2 = vpop.f32.mrf.mxu0 }
0x1452   : > { %v5920_v3 = vpop.f32.mrf.mxu0 }
0x1453   : > { %5932 = vmatprep.subr.msk.mxu0 %vm986_vm2, %v5920_v3 }
0x1454   : > { %v3411_v4 = vpop.f32.mrf.mxu0  ;;  %5933 = vmatpush3.xpose.msk.msra.mxu0 %vm986_vm2, %v5920_v3 }
0x1455   : > { %5934 = vmatprep.subr.msk.mxu0 %vm986_vm2, %v3411_v4 }
0x1458   : > { %5935 = vmatpush3.xpose.msk.msra.mxu0 %vm986_vm2, %v3411_v4 }
0x1459   : > { %5946 = vmatprep.subr.mxu0 %v5350_v35 }
0x145b   : > { %5937 = vmatmul.mubr.msk.f32.vlgmr.msra.gmra.mxu0 %vm986_vm2, %v5909_v41  ;;  %v5356_v41 = vld [vmem:[%s7082_s13 + $0x48] sm:$0xff] }
0x145c   : > { %5947 = vmatpush3.msra.mxu0 %v5350_v35 }
0x145d   : > { %5956 = vmatprep.subr.mxu0 %v5358_v36 }
0x151b   : > { %v5938_v5 = vpop.f32.mrf.mxu0 }
0x151c   : > { %v3588_v6 = vmul.f32 0.35355338, %v5938_v5 }
0x151d   : > { %v3578_v7 = vpop.f32.mrf.mxu0 }
0x151e   : > { %v3587_v8 = vmul.f32 0.35355338, %v3578_v7  ;;  %v3592_v9 = vsel %vm3155_vm3, %v3588_v6, -inf }
0x151f   : > { %3593 = vmax.xlane.f32.xlu1 %v3592_v9  ;;  %v5385_v9 = vld [vmem:[%s7082_s13 + $0x78] sm:$0xff] }
0x1520   : > { %v3589_v10 = vsel %vm3155_vm3, %v3587_v8, -inf }
0x1521   : > { %3590 = vmax.xlane.f32.xlu0 %v3589_v10 }
0x15a8   : > { %v3594_v11 = vpop.xlane.xlu1 %3593 }
0x15a9   : > { %v3596_v12 = vsub.f32 %v3588_v6, %v3594_v11 }
0x15aa   : > { %v3591_v13 = vpop.xlane.xlu0 %3590 }
0x15ab   : > { %v3599_v16 = vmul.f32 1.442695, %v3596_v12  ;;  %v3595_v17 = vsub.f32 %v3587_v8, %v3591_v13 }
0x15ad   : > { %6164 = vpow2.f32 %v3599_v16  ;;  %v3597_v18 = vmul.f32 1.442695, %v3595_v17 }
0x15af   : > { %6166 = vpow2.f32 %v3597_v18  ;;  %v5384_v18 = vld [vmem:[%s7082_s13 + $0x70] sm:$0xff] }
0x15ba   : > { %v6165_v19 = vpop.eup %6164 }
0x15bb   : > { %v3604_v39 = vsel %vm3155_vm3, %v6165_v19, 0.0 }
0x15bc   : > { %v6167_v20 = vpop.eup %6166  ;;  %3605 = vadd.xlane.f32.xlu1 %v3604_v39  ;;  %v5382_v39 = vld [vmem:[%s7082_s13 + $0x60] sm:$0xff] }
0x15bd   : > { %v3601_v21 = vsel %vm3155_vm3, %v6167_v20, 0.0 }
0x15be   : > { %3602 = vadd.xlane.f32.xlu0 %v3601_v21  ;;  %v5396_v21 = vld [vmem:[%s7084_s15 + $0x70] sm:$0xff] }
0x1645   : > { %v3606_v23 = vpop.xlane.xlu1 %3605 }
0x1646   : > { %6168 = vrcp.f32 %v3606_v23  ;;  %v5394_v23 = vld [vmem:[%s7084_s15 + $0x60] sm:$0xff] }
0x1647   : > { %v3603_v24 = vpop.xlane.xlu0 %3602 }
0x1648   : > { %6170 = vrcp.f32 %v3603_v24  ;;  %v5379_v24 = vld [vmem:[%s7085_s16 + $0x10] sm:$0xff] }
0x1653   : > { %v6169_v25 = vpop.eup %6168 }
0x1654   : > { %v3610_v28 = vmul.f32 %v6169_v25, %v6165_v19  ;;  %v5383_v19 = vld [vmem:[%s7082_s13 + $0x68] sm:$0xff]  ;;  %v5391_v25 = vld [vmem:[%s7083_s14 + $0x78] sm:$0xff] }
0x1655   : > { %v6171_v26 = vpop.eup %6170 }
0x1656   : > { %v3609_v27 = vmul.f32 %v6171_v26, %v6167_v20  ;;  %v5397_v20 = vld [vmem:[%s7084_s15 + $0x78] sm:$0xff] }
0x1658   : > { %5943 = vmatprep.mubr.msk.f32.mxu1 %vm3155_vm3, %v3609_v27 }
0x1659   : > { %5944 = vmatmul.mubr.msk.f32.vlgmr.msra.gmra.mxu1 %vm3155_vm3, %v3610_v28  ;;  %v5390_v28 = vld [vmem:[%s7083_s14 + $0x70] sm:$0xff] }
0x165a   : > { %5953 = vmatprep.mubr.msk.f32.mxu1 %vm986_vm2, %v3250_v2  ;;  %5952 = vmatpush3.msra.mxu1 %v3259_v22  ;;  %v5395_v22 = vld [vmem:[%s7084_s15 + $0x68] sm:$0xff] }
0x165b   : > { %5967 = vmatprep.subr.mxu1 %v5364_v29 }
0x165d   : > { %5954 = vmatmul.mubr.msk.f32.vlgmr.msra.gmra.mxu1 %vm986_vm2, %v5898_v63 }
0x165e   : > { %5968 = vmatpush3.msra.mxu1 %v5364_v29  ;;  %5975 = vmatprep.mubr.msk.f32.mxu1 %vm706_vm0, %v6717_v14  ;;  %v5389_v29 = vld [vmem:[%s7083_s14 + $0x68] sm:$0xff] }
0x165f   : > { %5969 = vmatprep.subr.mxu1 %v5363_v30 }
0x1660   : > { %5970 = vmatpush3.msra.mxu1 %v5363_v30  ;;  %v5388_v30 = vld [vmem:[%s7083_s14 + $0x60] sm:$0xff] }
0x1661   : > { %5971 = vmatprep.subr.mxu1 %v5362_v32 }
0x1662   : > { %5972 = vmatpush3.msra.mxu1 %v5362_v32 }
0x1663   : > { %5973 = vmatprep.subr.mxu1 %v5361_v33 }
0x1664   : > { %5974 = vmatpush3.msra.mxu1 %v5361_v33 }
0x1665   : > { %5976 = vmatmul.mubr.msk.f32.vlgmr.msra.gmra.mxu1 %vm706_vm0, %v6719_v15 }
0x1719   : > { %v5945_v37 = vpop.f32.mrf.mxu1 }
0x171b   : > { %v3683_v38 = vpop.f32.mrf.mxu1 }
0x171c   : > { %5948 = vmatprep.mubr.msk.f32.mxu0 %vm986_vm2, %v3683_v38 }
0x171d   : > { %5949 = vmatmul.mubr.msk.f32.vlgmr.msra.gmra.mxu0 %vm986_vm2, %v5945_v37  ;;  %v6851_v43 = vpop.f32.mrf.mxu1 }
0x171e   : > { %5957 = vmatpush3.msra.mxu0 %v5358_v36  ;;  %5964 = vmatprep.mubr.msk.f32.mxu0 %vm706_vm0, %v6717_v14 }
0x171f   : > { %5958 = vmatprep.subr.mxu0 %v5357_v40  ;;  %v6859_v47 = vpop.f32.mrf.mxu1 }
0x1720   : > { %5959 = vmatpush3.msra.mxu0 %v5357_v40 }
0x1721   : > { %5960 = vmatprep.subr.mxu0 %v5356_v41 }
0x1722   : > { %5961 = vmatpush3.msra.mxu0 %v5356_v41 }
0x1723   : > { %5962 = vmatprep.subr.mxu0 %v5355_v45 }
0x1724   : > { %5963 = vmatpush3.msra.mxu0 %v5355_v45 }
0x1725   : > { %5965 = vmatmul.mubr.msk.f32.vlgmr.msra.gmra.mxu0 %vm706_vm0, %v6719_v15  ;;  %v5977_v49 = vpop.f32.mrf.mxu1  ;;  %5978 = vmatprep.subr.mxu0 %v5370_v46 }
0x1726   : > { %5979 = vmatpush3.msra.mxu0 %v5370_v46  ;;  %5986 = vmatprep.mubr.msk.f32.mxu0 %vm706_vm0, %v6717_v14 }
0x1727   : > { %5989 = vmatprep.subr.msk.mxu1 %vm986_vm2, %v5977_v49  ;;  %v4007_v50 = vpop.f32.mrf.mxu1  ;;  %5980 = vmatprep.subr.mxu0 %v5369_v48 }
0x1728   : > { %5990 = vmatpush3.xpose.msk.msra.mxu1 %vm986_vm2, %v5977_v49  ;;  %5981 = vmatpush3.msra.mxu0 %v5369_v48 }
0x1729   : > { %5991 = vmatprep.subr.msk.mxu1 %vm986_vm2, %v4007_v50  ;;  %5982 = vmatprep.subr.mxu0 %v5368_v31 }
0x172a   : > { %5983 = vmatpush3.msra.mxu0 %v5368_v31 }
0x172b   : > { %5984 = vmatprep.subr.mxu0 %v5367_v1 }
0x172c   : > { %5992 = vmatpush3.xpose.msk.msra.mxu1 %vm986_vm2, %v4007_v50  ;;  %5985 = vmatpush3.msra.mxu0 %v5367_v1 }
0x172d   : > { %5987 = vmatmul.mubr.msk.f32.vlgmr.msra.gmra.mxu0 %vm706_vm0, %v6719_v15  ;;  %6003 = vmatprep.subr.mxu1 %v5379_v24 }
0x17dd   : > { %v6880_v51 = vpop.f32.mrf.mxu0 }
0x17de   : > { %v3853_v36 = vadd.f32 %v6851_v43, %v6880_v51 }
0x17df   : > { %v6882_v0 = vpop.f32.mrf.mxu0 }
0x17e0   : > { %v3848_v38 = vadd.f32 %v6859_v47, %v6882_v0 }
0x17e5   : > { %v5966_v52 = vpop.f32.mrf.mxu0 }
0x17e7   : > { %v3927_v34 = vpop.f32.mrf.mxu0 }
0x17e8   : > { %5993 = vmatprep.mubr.msk.f32.mxu1 %vm986_vm2, %v3927_v34 }
0x17e9   : > { %5994 = vmatmul.mubr.msk.f32.vlgmr.msra.gmra.mxu1 %vm986_vm2, %v5966_v52 }
0x17ea   : > { %6004 = vmatpush3.msra.mxu1 %v5379_v24 }
0x17eb   : > { %6019 = vmatprep.subr.mxu1 %v5391_v25 }
0x17ed   : > { %v5988_v53 = vpop.f32.mrf.mxu0 }
0x17ee   : > { %5996 = vmatprep.subr.mxu0 %v5988_v53 }
0x17ef   : > { %v4087_v54 = vpop.f32.mrf.mxu0  ;;  %5997 = vmatpush3.msra.mxu0 %v5988_v53 }
0x17f0   : > { %5998 = vmatprep.subr.mxu0 %v4087_v54 }
0x17f1   : > { %5999 = vmatpush3.msra.mxu0 %v4087_v54 }
0x17f2   : > { %6008 = vmatprep.subr.mxu0 %v5385_v9 }
0x18a9   : > { %v5995_v55 = vpop.f32.mrf.mxu1 }
0x18aa   : > { %v4184_v56 = vmul.f32 0.35355338, %v5995_v55 }
0x18ab   : > { %v4174_v57 = vpop.f32.mrf.mxu1 }
0x18ac   : > { %v4183_v58 = vmul.f32 0.35355338, %v4174_v57  ;;  %v4188_v59 = vsel %vm3155_vm3, %v4184_v56, -inf }
0x18ad   : > { %4189 = vmax.xlane.f32.xlu1 %v4188_v59 }
0x18ae   : > { %v4185_v60 = vsel %vm3155_vm3, %v4183_v58, -inf }
0x18af   : > { %4186 = vmax.xlane.f32.xlu0 %v4185_v60 }
0x1936   : > { %v4190_v61 = vpop.xlane.xlu1 %4189 }
0x1937   : > { %v4192_v62 = vsub.f32 %v4184_v56, %v4190_v61 }
0x1938   : > { %v4187_v63 = vpop.xlane.xlu0 %4186 }
0x1939   : > { %v4195_v2 = vmul.f32 1.442695, %v4192_v62  ;;  %v4191_v3 = vsub.f32 %v4183_v58, %v4187_v63 }
0x193b   : > { %6172 = vpow2.f32 %v4195_v2  ;;  %v4193_v4 = vmul.f32 1.442695, %v4191_v3  ;;  %v5406_v2 = vld [vmem:[%s7085_s16 + $0x18] sm:$0xff] }
0x193d   : > { %6174 = vpow2.f32 %v4193_v4 }
0x1948   : > { %v6173_v5 = vpop.eup %6172 }
0x1949   : > { %v4200_v6 = vsel %vm3155_vm3, %v6173_v5, 0.0 }
0x194a   : > { %v6175_v7 = vpop.eup %6174  ;;  %4201 = vadd.xlane.f32.xlu1 %v4200_v6  ;;  %v5409_v6 = vld [vmem:[%s7086_s17] ss:$0 sm:$0xff] }
0x194b   : > { %v4197_v8 = vsel %vm3155_vm3, %v6175_v7, 0.0 }
0x194c   : > { %4198 = vadd.xlane.f32.xlu0 %v4197_v8 }
0x19d3   : > { %v4202_v10 = vpop.xlane.xlu1 %4201 }
0x19d4   : > { %6176 = vrcp.f32 %v4202_v10 }
0x19d5   : > { %v4199_v11 = vpop.xlane.xlu0 %4198 }
0x19d6   : > { %6178 = vrcp.f32 %v4199_v11 }
0x19e1   : > { %v6177_v12 = vpop.eup %6176 }
0x19e2   : > { %v4206_v17 = vmul.f32 %v6177_v12, %v6173_v5 }
0x19e3   : > { %v6179_v13 = vpop.eup %6178 }
0x19e4   : > { %v4205_v16 = vmul.f32 %v6179_v13, %v6175_v7 }
0x19e6   : > { %6000 = vmatprep.mubr.msk.f32.mxu0 %vm3155_vm3, %v4205_v16 }
0x19e7   : > { %6001 = vmatmul.mubr.msk.f32.vlgmr.msra.gmra.mxu0 %vm3155_vm3, %v4206_v17 }
0x19e8   : > { %6009 = vmatpush3.msra.mxu0 %v5385_v9  ;;  %6016 = vmatprep.mubr.msk.f32.mxu0 %vm706_vm0, %v6717_v14 }
0x19e9   : > { %6010 = vmatprep.subr.mxu0 %v5384_v18 }
0x19ea   : > { %6011 = vmatpush3.msra.mxu0 %v5384_v18 }
0x19eb   : > { %6012 = vmatprep.subr.mxu0 %v5383_v19 }
0x19ec   : > { %6013 = vmatpush3.msra.mxu0 %v5383_v19 }
0x19ed   : > { %6014 = vmatprep.subr.mxu0 %v5382_v39 }
0x19ee   : > { %6015 = vmatpush3.msra.mxu0 %v5382_v39 }
0x19ef   : > { %6017 = vmatmul.mubr.msk.f32.vlgmr.msra.gmra.mxu0 %vm706_vm0, %v6719_v15  ;;  %6030 = vmatprep.subr.mxu0 %v5397_v20 }
0x19f0   : > { %6031 = vmatpush3.msra.mxu0 %v5397_v20  ;;  %6038 = vmatprep.mubr.msk.f32.mxu0 %vm706_vm0, %v6717_v14 }
0x19f1   : > { %6032 = vmatprep.subr.mxu0 %v5396_v21 }
0x19f2   : > { %6033 = vmatpush3.msra.mxu0 %v5396_v21 }
0x19f3   : > { %6034 = vmatprep.subr.mxu0 %v5395_v22 }
0x19f4   : > { %6035 = vmatpush3.msra.mxu0 %v5395_v22 }
0x19f5   : > { %6036 = vmatprep.subr.mxu0 %v5394_v23 }
0x19f6   : > { %6037 = vmatpush3.msra.mxu0 %v5394_v23 }
0x19f7   : > { %6039 = vmatmul.mubr.msk.f32.vlgmr.msra.gmra.mxu0 %vm706_vm0, %v6719_v15 }
0x1aa7   : > { %v6002_v26 = vpop.f32.mrf.mxu0 }
0x1aa9   : > { %v4279_v27 = vpop.f32.mrf.mxu0 }
0x1aaa   : > { %6005 = vmatprep.mubr.msk.f32.mxu1 %vm986_vm2, %v4279_v27  ;;  %v4946_v27 = vld [vmem:[%s7087_s18 + $0x8] sm:$0xff] }
0x1aab   : > { %6006 = vmatmul.mubr.msk.f32.vlgmr.msra.gmra.mxu1 %vm986_vm2, %v6002_v26  ;;  %v4947_v26 = vld [vmem:[%s7087_s18 + $0x10] sm:$0xff] }
0x1aac   : > { %6020 = vmatpush3.msra.mxu1 %v5391_v25  ;;  %6027 = vmatprep.mubr.msk.f32.mxu1 %vm706_vm0, %v6717_v14  ;;  %v4948_v25 = vld [vmem:[%s7087_s18 + $0x18] sm:$0xff] }
0x1aad   : > { %6021 = vmatprep.subr.mxu1 %v5390_v28 }
0x1aae   : > { %6022 = vmatpush3.msra.mxu1 %v5390_v28  ;;  %v4945_v28 = vld [vmem:[%s7087_s18] sm:$0xff] }
0x1aaf   : > { %v6018_v32 = vpop.f32.mrf.mxu0  ;;  %6023 = vmatprep.subr.mxu1 %v5389_v29 }
0x1ab0   : > { %6024 = vmatpush3.msra.mxu1 %v5389_v29  ;;  %v5062_v29 = vld [vmem:[%s7089_s20 + $0x78] sm:$0xff] }
0x1ab1   : > { %6025 = vmatprep.subr.mxu1 %v5388_v30  ;;  %v4444_v33 = vpop.f32.mrf.mxu0 }
0x1ab2   : > { %6026 = vmatpush3.msra.mxu1 %v5388_v30  ;;  %v5061_v30 = vld [vmem:[%s7089_s20 + $0x70] sm:$0xff] }
0x1ab3   : > { %6028 = vmatmul.mubr.msk.f32.vlgmr.msra.gmra.mxu1 %vm706_vm0, %v6719_v15 }
0x1ab4   : > { %6045 = vmatprep.mubr.msk.f32.mxu1 %vm986_vm2, %v4444_v33 }
0x1ab7   : > { %v6040_v14 = vpop.f32.mrf.mxu0 }
0x1ab8   : > { %6048 = vmatprep.subr.mxu0 %v6040_v14 }
0x1ab9   : > { %v4604_v35 = vpop.f32.mrf.mxu0  ;;  %6049 = vmatpush3.msra.mxu0 %v6040_v14 }
0x1aba   : > { %6050 = vmatprep.subr.mxu0 %v4604_v35 }
0x1abb   : > { %6051 = vmatpush3.msra.mxu0 %v4604_v35 }
0x1abc   : > { %6060 = vmatprep.subr.mxu0 %v4948_v25 }
0x1b6b   : > { %v6007_v37 = vpop.f32.mrf.mxu1 }
0x1b6c   : > { %v4372_v40 = vadd.f32 %v6007_v37, %v3853_v36 }
0x1b6d   : > { %v4362_v41 = vpop.f32.mrf.mxu1 }
0x1b6e   : > { %v4371_v45 = vadd.f32 %v4362_v41, %v3848_v38  ;;  %v5410_v41 = vld [vmem:[%s7105_s26] ss:$0 sm:$0xff] }
0x1b73   : > { %v6029_v46 = vpop.f32.mrf.mxu1 }
0x1b74   : > { %6041 = vmatprep.subr.msk.mxu1 %vm986_vm2, %v6029_v46 }
0x1b75   : > { %v4524_v15 = vpop.f32.mrf.mxu1  ;;  %6042 = vmatpush3.xpose.msk.msra.mxu1 %vm986_vm2, %v6029_v46 }
0x1b76   : > { %6043 = vmatprep.subr.msk.mxu1 %vm986_vm2, %v4524_v15 }
0x1b79   : > { %6044 = vmatpush3.xpose.msk.msra.mxu1 %vm986_vm2, %v4524_v15 }
0x1b7a   : > { %6055 = vmatprep.subr.mxu1 %v5406_v2 }
0x1b7c   : > { %6046 = vmatmul.mubr.msk.f32.vlgmr.msra.gmra.mxu1 %vm986_vm2, %v6018_v32  ;;  %v5060_v32 = vld [vmem:[%s7089_s20 + $0x68] sm:$0xff] }
0x1b7d   : > { %6056 = vmatpush3.msra.mxu1 %v5406_v2 }
0x1b7e   : > { %6071 = vmatprep.subr.mxu1 %v5062_v29 }
0x1c3c   : > { %v6047_v43 = vpop.f32.mrf.mxu1 }
0x1c3d   : > { %v4701_v48 = vmul.f32 0.35355338, %v6047_v43 }
0x1c3e   : > { %v4691_v49 = vpop.f32.mrf.mxu1 }
0x1c3f   : > { %v4700_v31 = vmul.f32 0.35355338, %v4691_v49  ;;  %v4705_v47 = vsel %vm3155_vm3, %v4701_v48, -inf }
0x1c40   : > { %4706 = vmax.xlane.f32.xlu1 %v4705_v47 }
0x1c41   : > { %v4702_v50 = vsel %vm3155_vm3, %v4700_v31, -inf }
0x1c42   : > { %4703 = vmax.xlane.f32.xlu0 %v4702_v50  ;;  %v5059_v50 = vld [vmem:[%s7089_s20 + $0x60] sm:$0xff] }
0x1cc9   : > { %v4707_v1 = vpop.xlane.xlu1 %4706 }
0x1cca   : > { %v4709_v51 = vsub.f32 %v4701_v48, %v4707_v1  ;;  %v5411_v48 = vld [vmem:[%s7076_s7] ss:$0 sm:$0xff]  ;;  %v5058_v1 = vld [vmem:[%s7089_s20 + $0x58] sm:$0xff] }
0x1ccb   : > { %v4704_v0 = vpop.xlane.xlu0 %4703 }
0x1ccc   : > { %v4712_v52 = vmul.f32 1.442695, %v4709_v51  ;;  %v4708_v34 = vsub.f32 %v4700_v31, %v4704_v0  ;;  %v5057_v51 = vld [vmem:[%s7089_s20 + $0x50] sm:$0xff]  ;;  %v5056_v0 = vld [vmem:[%s7089_s20 + $0x48] sm:$0xff] }
0x1cce   : > { %6180 = vpow2.f32 %v4712_v52  ;;  %v4710_v53 = vmul.f32 1.442695, %v4708_v34  ;;  %v5055_v52 = vld [vmem:[%s7089_s20 + $0x40] sm:$0xff]  ;;  %v5054_v34 = vld [vmem:[%s7089_s20 + $0x38] sm:$0xff] }
0x1cd0   : > { %6182 = vpow2.f32 %v4710_v53  ;;  %v5053_v53 = vld [vmem:[%s7089_s20 + $0x30] sm:$0xff] }
0x1cdb   : > { %v6181_v54 = vpop.eup %6180 }
0x1cdc   : > { %v4717_v55 = vsel %vm3155_vm3, %v6181_v54, 0.0 }
0x1cdd   : > { %v6183_v56 = vpop.eup %6182  ;;  %4718 = vadd.xlane.f32.xlu1 %v4717_v55  ;;  %v5051_v55 = vld [vmem:[%s7089_s20 + $0x20] sm:$0xff] }
0x1cde   : > { %v4714_v57 = vsel %vm3155_vm3, %v6183_v56, 0.0 }
0x1cdf   : > { %4715 = vadd.xlane.f32.xlu0 %v4714_v57  ;;  %v5049_v57 = vld [vmem:[%s7089_s20 + $0x10] sm:$0xff] }
0x1d66   : > { %v4719_v58 = vpop.xlane.xlu1 %4718 }
0x1d67   : > { %6184 = vrcp.f32 %v4719_v58  ;;  %v5048_v58 = vld [vmem:[%s7089_s20 + $0x8] sm:$0xff] }
0x1d68   : > { %v4716_v59 = vpop.xlane.xlu0 %4715 }
0x1d69   : > { %6186 = vrcp.f32 %v4716_v59  ;;  %v5047_v59 = vld [vmem:[%s7089_s20] sm:$0xff] }
0x1d74   : > { %v6185_v60 = vpop.eup %6184 }
0x1d75   : > { %v4723_v63 = vmul.f32 %v6185_v60, %v6181_v54  ;;  %v5052_v54 = vld [vmem:[%s7089_s20 + $0x28] sm:$0xff]  ;;  %v5412_v60 = vld [vmem:[%s7088_s19] ss:$0 sm:$0xff] }
0x1d76   : > { %v6187_v61 = vpop.eup %6186 }
0x1d77   : > { %v4722_v62 = vmul.f32 %v6187_v61, %v6183_v56  ;;  %v5050_v56 = vld [vmem:[%s7089_s20 + $0x18] sm:$0xff] }
0x1d79   : > { %6052 = vmatprep.mubr.msk.f32.mxu0 %vm3155_vm3, %v4722_v62 }
0x1d7a   : > { %6053 = vmatmul.mubr.msk.f32.vlgmr.msra.gmra.mxu0 %vm3155_vm3, %v4723_v63 }
0x1d7b   : > { %6061 = vmatpush3.msra.mxu0 %v4948_v25 }
0x1d7c   : > { %6062 = vmatprep.subr.mxu0 %v4947_v26 }
0x1d7d   : > { %6063 = vmatpush3.msra.mxu0 %v4947_v26 }
0x1d7e   : > { %6064 = vmatprep.subr.mxu0 %v4946_v27 }
0x1d7f   : > { %6065 = vmatpush3.msra.mxu0 %v4946_v27 }
0x1d80   : > { %6066 = vmatprep.subr.mxu0 %v4945_v28 }
0x1d81   : > { %6067 = vmatpush3.msra.mxu0 %v4945_v28 }
0x1e3a   : > { %v6054_v3 = vpop.f32.mrf.mxu0 }
0x1e3c   : > { %v4796_v4 = vpop.f32.mrf.mxu0 }
0x1e3d   : > { %6057 = vmatprep.mubr.msk.f32.mxu1 %vm986_vm2, %v4796_v4 }
0x1e3e   : > { %6058 = vmatmul.mubr.msk.f32.vlgmr.msra.gmra.mxu1 %vm986_vm2, %v6054_v3 }
0x1e3f   : > { %6072 = vmatpush3.msra.mxu1 %v5062_v29 }
0x1e40   : > { %6073 = vmatprep.subr.mxu1 %v5061_v30 }
0x1e41   : > { %6074 = vmatpush3.msra.mxu1 %v5061_v30 }
0x1e42   : > { %6075 = vmatprep.subr.mxu1 %v5060_v32 }
0x1e43   : > { %6076 = vmatpush3.msra.mxu1 %v5060_v32 }
0x1e44   : > { %6077 = vmatprep.subr.mxu1 %v5059_v50 }
0x1e45   : > { %6078 = vmatpush3.msra.mxu1 %v5059_v50 }
0x1e46   : > { %6079 = vmatprep.subr.mxu1 %v5058_v1 }
0x1e47   : > { %6080 = vmatpush3.msra.mxu1 %v5058_v1 }
0x1e48   : > { %6081 = vmatprep.subr.mxu1 %v5057_v51 }
0x1e49   : > { %6082 = vmatpush3.msra.mxu1 %v5057_v51 }
0x1e4a   : > { %6083 = vmatprep.subr.mxu1 %v5056_v0 }
0x1e4b   : > { %6084 = vmatpush3.msra.mxu1 %v5056_v0 }
0x1e4c   : > { %6085 = vmatprep.subr.mxu1 %v5055_v52 }
0x1e4d   : > { %6086 = vmatpush3.msra.mxu1 %v5055_v52 }
0x1e4e   : > { %6087 = vmatprep.subr.mxu1 %v5054_v34 }
0x1e4f   : > { %6088 = vmatpush3.msra.mxu1 %v5054_v34 }
0x1e50   : > { %6089 = vmatprep.subr.mxu1 %v5053_v53 }
0x1e51   : > { %6090 = vmatpush3.msra.mxu1 %v5053_v53 }
0x1e52   : > { %6091 = vmatprep.subr.mxu1 %v5052_v54 }
0x1e53   : > { %6092 = vmatpush3.msra.mxu1 %v5052_v54 }
0x1e54   : > { %6093 = vmatprep.subr.mxu1 %v5051_v55 }
0x1e55   : > { %6094 = vmatpush3.msra.mxu1 %v5051_v55 }
0x1e56   : > { %6095 = vmatprep.subr.mxu1 %v5050_v56 }
0x1e57   : > { %6096 = vmatpush3.msra.mxu1 %v5050_v56 }
0x1e58   : > { %6097 = vmatprep.subr.mxu1 %v5049_v57 }
0x1e59   : > { %6098 = vmatpush3.msra.mxu1 %v5049_v57 }
0x1e5a   : > { %6099 = vmatprep.subr.mxu1 %v5048_v58 }
0x1e5b   : > { %6100 = vmatpush3.msra.mxu1 %v5048_v58 }
0x1e5c   : > { %6101 = vmatprep.subr.mxu1 %v5047_v59 }
0x1e5d   : > { %6102 = vmatpush3.msra.mxu1 %v5047_v59 }
0x1efe   : > { %v6059_v5 = vpop.f32.mrf.mxu1 }
0x1eff   : > { %v4889_v7 = vadd.f32 %v6059_v5, %v4372_v40 }
0x1f00   : > { %v4879_v8 = vpop.f32.mrf.mxu1 }
0x1f01   : > { %v4898_v9 = vadd.f32 %v5409_v6, %v4889_v7  ;;  %v4888_v10 = vadd.f32 %v4879_v8, %v4371_v45 }
0x1f03   : > { %v6970_v11 = vadd.f32 %v4898_v9, %v6671_v42  ;;  %v4897_v12 = vadd.f32 %v5409_v6, %v4888_v10 }
0x1f05   : > { %v6973_v13 = vadd.f32 %v4897_v12, %v6674_v44  ;;  %v4906_v16 = vsel %vm706_vm0, %v6970_v11, 0.0 }
0x1f06   : > { %4907 = vadd.xlane.f32.xlu1 %v4906_v16 }
0x1f07   : > { %v4903_v17 = vsel %vm706_vm0, %v6973_v13, 0.0 }
0x1f08   : > { %4904 = vadd.xlane.f32.xlu0 %v4903_v17  ;;  %v5415_v17 = vld [vmem:[%s7090_s21] ss:$0 sm:$0xff] }
0x1f8f   : > { %v4908_v18 = vpop.xlane.xlu1 %4907 }
0x1f90   : > { %v4910_v19 = vmul.f32 0.03125, %v4908_v18 }
0x1f91   : > { %v4905_v39 = vpop.xlane.xlu0 %4904 }
0x1f92   : > { %v4912_v20 = vsub.f32 %v6970_v11, %v4910_v19  ;;  %v4909_v21 = vmul.f32 0.03125, %v4905_v39 }
0x1f94   : > { %v4911_v42 = vsub.f32 %v6973_v13, %v4909_v21  ;;  %v4914_v22 = vmul.f32 %v4912_v20, %v4912_v20 }
0x1f96   : > { %v4918_v44 = vsel %vm706_vm0, %v4914_v22, 0.0  ;;  %v4913_v23 = vmul.f32 %v4911_v42, %v4911_v42 }
0x1f97   : > { %4919 = vadd.xlane.f32.xlu1 %v4918_v44 }
0x1f98   : > { %v4915_v24 = vsel %vm706_vm0, %v4913_v23, 0.0 }
0x1f99   : > { %4916 = vadd.xlane.f32.xlu0 %v4915_v24 }
0x2020   : > { %v4920_v33 = vpop.xlane.xlu1 %4919 }
0x2021   : > { %v4922_v14 = vmul.f32 0.03125, %v4920_v33 }
0x2022   : > { %v4917_v35 = vpop.xlane.xlu0 %4916 }
0x2023   : > { %v4924_v36 = vadd.f32 1e-05, %v4922_v14  ;;  %v4921_v37 = vmul.f32 0.03125, %v4917_v35 }
0x2025   : > { %6188 = vrsqrt.f32 %v4924_v36  ;;  %v4923_v38 = vadd.f32 1e-05, %v4921_v37 }
0x2027   : > { %6190 = vrsqrt.f32 %v4923_v38 }
0x2032   : > { %v6189_v40 = vpop.eup %6188 }
0x2033   : > { %v4928_v45 = vmul.f32 %v6189_v40, %v4912_v20 }
0x2034   : > { %v6191_v46 = vpop.eup %6190 }
0x2035   : > { %v4927_v15 = vmul.f32 %v6191_v46, %v4911_v42  ;;  %v4936_v43 = vmul.f32 %v5410_v41, %v4928_v45 }
0x2037   : > { %v4935_v49 = vmul.f32 %v5410_v41, %v4927_v15  ;;  %v4944_v47 = vadd.f32 %v5411_v48, %v4936_v43 }
0x2039   : > { %v4943_v31 = vadd.f32 %v5411_v48, %v4935_v49 }
0x203b   : > { %6068 = vmatprep.mubr.msk.f32.mxu0 %vm706_vm0, %v4943_v31 }
0x203c   : > { %6069 = vmatmul.mubr.msk.f32.vlgmr.msra.gmra.mxu0 %vm706_vm0, %v4944_v47 }
0x20fc   : > { %v6070_v61 = vpop.f32.mrf.mxu0 }
0x20fd   : > { %v5034_v62 = vadd.f32 %v6070_v61, %v5412_v60 }
0x20fe   : > { %v5028_v63 = vpop.f32.mrf.mxu0 }
0x20ff   : > { %v5040_v2 = vmul.f32 0.70710677, %v5034_v62  ;;  %v5029_v3 = vadd.f32 %v5412_v60, %v5028_v63  ;;  %v5038_v10 = vmul.f32 0.5, %v5034_v62 }
0x2101   : > { %6192 = verf.f32 %v5040_v2  ;;  %v5039_v4 = vmul.f32 0.70710677, %v5029_v3  ;;  %v5037_v8 = vmul.f32 0.5, %v5029_v3 }
0x2103   : > { %6194 = verf.f32 %v5039_v4 }
0x210e   : > { %v6193_v5 = vpop.eup %6192 }
0x210f   : > { %v5044_v7 = vadd.f32 1.0, %v6193_v5 }
0x2110   : > { %v6195_v6 = vpop.eup %6194 }
0x2111   : > { %v5043_v9 = vadd.f32 1.0, %v6195_v6  ;;  %v5046_v16 = vmul.f32 %v5044_v7, %v5038_v10 }
0x2113   : > { %v5045_v12 = vmul.f32 %v5043_v9, %v5037_v8 }
0x2115   : > { %6103 = vmatprep.mubr.f32.mxu1 %v5045_v12 }
0x2116   : > { %6104 = vmatmul.mubr.f32.vlgmr.msra.gmra.mxu1 %v5046_v16 }
0x21d6   : > { %v6105_v18 = vpop.f32.mrf.mxu1 }
0x21d7   : > { %v5142_v19 = vadd.f32 %v6105_v18, %v5415_v17 }
0x21d8   : > { %v5136_v39 = vpop.f32.mrf.mxu1 }
0x21d9   : > { %v5146_v20 = vadd.f32 %v5142_v19, %v6970_v11  ;;  %v5137_v21 = vadd.f32 %v5415_v17, %v5136_v39 }
0x21db   : > { %5148 = vst.msk [vmem:[%s700_s25 + $0x8] sm:$0xff] %vm706_vm0, %v5146_v20  ;;  %v5145_v42 = vadd.f32 %v5137_v21, %v6973_v13 }
0x21dd   : > { %5147 = vst.msk [vmem:[%s700_s25] sm:$0xff] %vm706_vm0, %v5145_v42 }
0x21de PF: > { %s32_s3 = sadd.s32 1, %s6202_s3  }
0x21df   : > { %p29_p4 = scmp.ge.s32.totalorder %s32_s3, 4  }
0x21e1   :  { %31 = sbr.rel (!%p29_p4) target bundleno = 8 (0x8), region = 165 }

</bundles_post_ra>
